<compile_context>
chip_gen: v5e
topology: v5e:2x2
jax: 0.10.0
libtpu: 0.0.40
codegen_flags: <defaults>
</compile_context>

<pallas_src>
import functools
import numpy as np
import jax
import jax.numpy as jnp
from jax.experimental import pallas as pl
from jax.experimental.pallas import tpu as pltpu


# ----------------------------------------------------------------------------
# Kernel: entire forward recurrence in one invocation (per batch block)
# ----------------------------------------------------------------------------
def _cnode_kernel(D, Nc, hidden, n_sub,
                  # data inputs (time-major, mask products precomputed on host)
                  ym_ref, om_ref, mnd_ref, omnd_ref, rowany_ref,
                  # fused constant operands (dt pre-folded where relevant)
                  rhs1_ref, b1_ref, b2_ref, rhs2_ref, cvec2_ref,
                  rhso1_ref, co1_ref, rhso2_ref,
                  # outputs
                  ypred_ref, c0_out_ref, sig_out_ref, tailq_out_ref, last0_ref):
    T = ym_ref.shape[0]
    BB = ym_ref.shape[1]
    DN = D * Nc

    rhs1 = rhs1_ref[...]      # (DN+D+H, DN+H): [[dt*A_nd|0],[dt*Bfold|0],[0|W2]]
    b1 = b1_ref[...]          # (1, H)
    b2 = b2_ref[...]          # (1, H)
    rhs2 = rhs2_ref[...]      # (H, H+D): [dt*W3@W1 | dt*W3[:, :D]]
    cvec2 = cvec2_ref[...]    # (1, H+D): [dt*b3@W1 | dt*b3[:, :D]]
    rhso1 = rhso1_ref[...]    # (H, DN): dt*W3_tail columns in permuted read order
    co1 = co1_ref[...]        # (1, DN): n_sub*dt*b3_tail, permuted
    rhso2 = rhso2_ref[...]    # (In, H+DN): [W1 | Pq] (perm fused with W1 matmul)

    # State (all f32, (n,d)-flat Legendre layout for c0 / driver pieces):
    c0 = jnp.zeros((BB, DN), jnp.float32)        # Legendre coefficients
    sig = jnp.zeros((BB, D), jnp.float32)        # c1 head (signal / y_pred)
    tailq = jnp.zeros((BB, DN), jnp.float32)     # c1 tail, pre-permuted (read layout)
    h1pb = jnp.zeros((BB, hidden), jnp.float32) + b1   # c1 @ W1 + b1
    last0 = jnp.zeros((BB, DN), jnp.float32)     # last_h c0 slice

    for t in range(T):                           # fully unrolled (T static, small)
        S = jnp.zeros((BB, hidden), jnp.float32)

        for _ in range(n_sub):                   # fully unrolled Euler substeps
            h1 = jnp.maximum(h1pb, 0.0)
            x1 = jnp.concatenate([c0, sig, h1], axis=-1)           # (BB, DN+D+H)
            r1 = jnp.dot(x1, rhs1, preferred_element_type=jnp.float32)
            h2 = jnp.maximum(r1[:, DN:] + b2, 0.0)                 # relu(h1@W2 + b2)
            r2 = jnp.dot(h2, rhs2, preferred_element_type=jnp.float32) + cvec2
            c0 = c0 + r1[:, :DN]                 # += dt*(c0@A_nd + B[n]*sig[d])
            h1pb = h1pb + r2[:, :hidden]         # += dt*(dc1 @ W1)
            sig = sig + r2[:, hidden:]           # += dt*dc1[:, :D]
            S = S + h2

        # ---- observation update at times[t] (3-D mask branch) ----
        # tail of c1 after ODE, already permuted to the (n,d) read layout
        g_tail_nd = tailq + jnp.dot(S, rhso1,
                                    preferred_element_type=jnp.float32) + co1
        ypred_ref[t] = sig                                          # pre-update pred
        signal = ym_ref[t] + sig * om_ref[t]                        # y*m + pred*(1-m)
        driver = c0 * mnd_ref[t] + g_tail_nd * omnd_ref[t]          # (n,d)-flat
        new_c1 = jnp.concatenate([signal, driver], axis=-1)         # (BB, In)
        ro2 = jnp.dot(new_c1, rhso2, preferred_element_type=jnp.float32)
        h1pb = ro2[:, :hidden] + b1              # new_c1 @ W1 + b1
        tailq = ro2[:, hidden:]                  # permuted driver for next read
        sig = signal
        last0 = jnp.where(rowany_ref[t] > 0.0, c0, last0)

    c0_out_ref[...] = c0
    sig_out_ref[...] = sig
    tailq_out_ref[...] = tailq
    last0_ref[...] = last0


# ----------------------------------------------------------------------------
# Parameters + fused host-side constants (deterministic, synthetic)
# ----------------------------------------------------------------------------
def make_cnode_params(Nc, input_dim, hidden_dim, Delta, delta_t, n_sub, key):
    D = input_dim
    DN = D * Nc
    In = DN + D
    dt = np.float32(delta_t)

    n = np.arange(Nc)
    B_vec = ((1.0 / Delta) * np.sqrt(2.0 * n + 1.0)).astype(np.float32)
    A = np.zeros((Nc, Nc), dtype=np.float64)
    for i in range(Nc):
        for k in range(Nc):
            v = -(1.0 / Delta) * np.sqrt(2.0 * i + 1.0) * np.sqrt(2.0 * k + 1.0)
            A[i, k] = v if k <= i else v * ((-1.0) ** (i - k))
    A = A.astype(np.float32)

    ks = jax.random.split(key, 6)

    def lin(kw, kb, fan_in, fan_out):
        bound = 1.0 / np.sqrt(fan_in)
        W = np.asarray(jax.random.uniform(kw, (fan_in, fan_out), jnp.float32,
                                          -bound, bound))
        b = np.asarray(jax.random.uniform(kb, (1, fan_out), jnp.float32,
                                          -bound, bound))
        return W, b

    W1, b1 = lin(ks[0], ks[1], In, hidden_dim)
    W2, b2 = lin(ks[2], ks[3], hidden_dim, hidden_dim)
    W3, b3 = lin(ks[4], ks[5], hidden_dim, In)

    # ---- fused constants ----
    # Kernel keeps c0 in (n,d)-flat layout: c0_k[n*D+d] == c0_ref.view(B,D,Nc)[d,n]
    A_nd = np.kron(A.T, np.eye(D, dtype=np.float32)).astype(np.float32)   # (DN, DN)
    Bfold = np.zeros((D, DN), np.float32)
    for nn in range(Nc):
        for d in range(D):
            Bfold[d, nn * D + d] = B_vec[nn]

    RHS1 = np.zeros((DN + D + hidden_dim, DN + hidden_dim), np.float32)
    RHS1[:DN, :DN] = dt * A_nd
    RHS1[DN:DN + D, :DN] = dt * Bfold
    RHS1[DN + D:, DN:] = W2

    RHS2 = np.concatenate([dt * (W3 @ W1), dt * W3[:, :D]], axis=1)       # (H, H+D)
    CVEC2 = np.concatenate([dt * (b3 @ W1), dt * b3[:, :D]], axis=1)      # (1, H+D)

    # permutation q: kernel (n,d)-flat tail index i=n*D+d -> ref tail index d*Nc+n
    q = np.zeros(DN, np.int64)
    for nn in range(Nc):
        for d in range(D):
            q[nn * D + d] = d * Nc + nn
    qinv = np.argsort(q).astype(np.int32)

    RHS_O1 = (dt * W3[:, D:])[:, q]                                       # (H, DN)
    CO1 = (float(n_sub) * dt * b3[:, D:])[:, q]                           # (1, DN)

    Pq = np.zeros((In, DN), np.float32)
    for i in range(DN):
        Pq[D + q[i], i] = 1.0
    RHS_O2 = np.concatenate([W1, Pq], axis=1)                             # (In, H+DN)

    params = dict(
        RHS1=jnp.asarray(RHS1.astype(np.float32)),
        b1=jnp.asarray(b1.astype(np.float32)),
        b2=jnp.asarray(b2.astype(np.float32)),
        RHS2=jnp.asarray(RHS2.astype(np.float32)),
        CVEC2=jnp.asarray(CVEC2.astype(np.float32)),
        RHS_O1=jnp.asarray(RHS_O1.astype(np.float32)),
        CO1=jnp.asarray(CO1.astype(np.float32)),
        RHS_O2=jnp.asarray(RHS_O2.astype(np.float32)),
        qinv=qinv,
    )
    params_np = dict(A=A, B_vec=B_vec, W1=W1, b1=b1, W2=W2, b2=b2, W3=W3, b3=b3)
    return params, params_np


# ----------------------------------------------------------------------------
# Wrapper
# ----------------------------------------------------------------------------
def cnode_forward_pallas(params, times, Y, mask, *, Nc, input_dim, hidden_dim,
                         delta_t, n_sub):
    D = input_dim
    Bsz, T, _ = Y.shape
    DN = D * Nc
    H = hidden_dim

    # Mask-derived tensors precomputed once outside the recurrence (time-major).
    Yf = jnp.asarray(Y, jnp.float32)
    Mf = jnp.asarray(mask, jnp.float32)
    ym = jnp.transpose(Yf * Mf, (1, 0, 2))                        # (T, B, D)
    om = jnp.transpose(1.0 - Mf, (1, 0, 2))                       # (T, B, D)
    m_nd = jnp.transpose(jnp.tile(Mf, (1, 1, Nc)), (1, 0, 2))     # (T, B, DN) (n,d)-flat
    om_nd = jnp.transpose(jnp.tile(1.0 - Mf, (1, 1, Nc)), (1, 0, 2))
    row_any = jnp.transpose(
        (jnp.sum(Mf, axis=-1, keepdims=True) > 0.0).astype(jnp.float32), (1, 0, 2))

    # Parallel batch-block grid axis (second TensorCore on v7x for larger B).
    BB = 8 if (Bsz % 8 == 0) else Bsz
    G = Bsz // BB

    kernel = functools.partial(_cnode_kernel, D, Nc, H, int(n_sub))

    def tb_spec(last):
        return pl.BlockSpec((T, BB, last), lambda g: (0, g, 0))

    def const_spec(shape):
        return pl.BlockSpec(shape, lambda g: (0,) * len(shape))

    def b_spec(last):
        return pl.BlockSpec((BB, last), lambda g: (g, 0))

    in_specs = [
        tb_spec(D), tb_spec(D), tb_spec(DN), tb_spec(DN), tb_spec(1),
        const_spec((DN + D + H, DN + H)),
        const_spec((1, H)), const_spec((1, H)),
        const_spec((H, H + D)), const_spec((1, H + D)),
        const_spec((H, DN)), const_spec((1, DN)),
        const_spec((DN + D, H + DN)),
    ]
    out_shape = (
        jax.ShapeDtypeStruct((T, Bsz, D), jnp.float32),   # y_preds (time-major)
        jax.ShapeDtypeStruct((Bsz, DN), jnp.float32),     # final c0 ((n,d)-flat)
        jax.ShapeDtypeStruct((Bsz, D), jnp.float32),      # final c1 head (signal)
        jax.ShapeDtypeStruct((Bsz, DN), jnp.float32),     # final c1 tail (permuted)
        jax.ShapeDtypeStruct((Bsz, DN), jnp.float32),     # last_h c0 part ((n,d)-flat)
    )
    out_specs = [tb_spec(D), b_spec(DN), b_spec(D), b_spec(DN), b_spec(DN)]

    grid_spec = pltpu.PrefetchScalarGridSpec(
        num_scalar_prefetch=0, grid=(G,), in_specs=in_specs, out_specs=out_specs)

    ypred_tm, c0_f, sig_f, tailq_f, last0 = pl.pallas_call(
        kernel, out_shape=out_shape, grid_spec=grid_spec,
        compiler_params=pltpu.CompilerParams(dimension_semantics=("parallel",)),
    )(ym, om, m_nd, om_nd, row_any,
      params["RHS1"], params["b1"], params["b2"],
      params["RHS2"], params["CVEC2"],
      params["RHS_O1"], params["CO1"], params["RHS_O2"])

    # kernel's (n,d)-flat c0 layout -> reference's (d,n)-flat layout (outside kernel)
    def nd_to_dn(x):
        return x.reshape(Bsz, Nc, D).transpose(0, 2, 1).reshape(Bsz, DN)

    y_preds = jnp.transpose(ypred_tm, (1, 0, 2))
    driver_nd = jnp.take(tailq_f, jnp.asarray(params["qinv"]), axis=-1)
    c1_f = jnp.concatenate([sig_f, driver_nd], axis=-1)
    last_cn = nd_to_dn(last0)
    h_full = jnp.concatenate([nd_to_dn(c0_f), c1_f], axis=-1)
    # eval_mode=False: per-step trajectory == preds; uncertainty_mode=False -> None
    return y_preds, y_preds, times, last_cn, h_full, None, None


# ----------------------------------------------------------------------------
# Pure-numpy reference (mirrors the PyTorch forward, euler / 3-D mask branch)
# ----------------------------------------------------------------------------
def cnode_forward_reference(pnp, Y, mask, Nc, D, delta_t, n_sub):
    Y = np.asarray(Y, np.float32)
    M = np.asarray(mask, np.float32)
    Bsz, T, _ = Y.shape
    In = D * Nc + D
    A, Bv = pnp["A"], pnp["B_vec"]
    W1, b1 = pnp["W1"], pnp["b1"]
    W2, b2 = pnp["W2"], pnp["b2"]
    W3, b3 = pnp["W3"], pnp["b3"]
    c0 = np.zeros((Bsz, D * Nc), np.float32)
    c1 = np.zeros((Bsz, In), np.float32)
    last = np.zeros((Bsz, D * Nc + In), np.float32)
    preds = []
    for it in range(T):
        for _ in range(n_sub):
            out1 = c1[:, :D]
            c0v = c0.reshape(Bsz, D, Nc)
            dc0 = (c0v @ A.T + Bv[None, None, :] * out1[..., None]).reshape(Bsz, -1)
            h1 = np.maximum(c1 @ W1 + b1, 0.0)
            h2 = np.maximum(h1 @ W2 + b2, 0.0)
            dc1 = h2 @ W3 + b3
            c0 = c0 + delta_t * dc0
            c1 = c1 + delta_t * dc1
        m, y = M[:, it], Y[:, it]
        y_pred = c1[:, :D].copy()
        preds.append(y_pred)
        signal = y * m + y_pred * (1.0 - m)
        drv_no = c1[:, D:].reshape(Bsz, D, Nc).transpose(0, 2, 1)
        drv_up = c0.reshape(Bsz, D, Nc).transpose(0, 2, 1)
        driver = (drv_up * m[:, None, :] + drv_no * (1.0 - m[:, None, :])).reshape(Bsz, -1)
        new_c1 = np.concatenate([signal, driver], -1)
        h_full = np.concatenate([c0, new_c1], -1)
        upd = np.any(m != 0, axis=1)
        last[upd] = h_full[upd]
        c1 = new_c1
    return np.stack(preds, 1), last[:, :D * Nc], np.concatenate([c0, c1], -1)


# ----------------------------------------------------------------------------
if __name__ == "__main__":
    Nc, D, hidden = 8, 4, 32
    Bsz, T = 8, 6
    Delta = 1.0
    delta_t = 0.05
    n_sub = 4   # euler steps per observation interval (times are uniform multiples)
    times = np.float32(delta_t * n_sub) * np.arange(1, T + 1, dtype=np.float32)

    key = jax.random.PRNGKey(0)
    kY, kM, kW = jax.random.split(key, 3)
    Y = jax.random.normal(kY, (Bsz, T, D), jnp.float32)
    mask = (jax.random.uniform(kM, (Bsz, T, D)) < 0.5).astype(jnp.float32)

    params, params_np = make_cnode_params(Nc, D, hidden, Delta, delta_t, n_sub, kW)

    outs = cnode_forward_pallas(params, jnp.asarray(times), Y, mask,
                                Nc=Nc, input_dim=D, hidden_dim=hidden,
                                delta_t=delta_t, n_sub=n_sub)
    y_preds, y_traj, times_traj, last_cn, h_full, y_unc, y_unc_traj = outs
    jax.block_until_ready((y_preds, last_cn, h_full))

    ref_preds, ref_last_cn, ref_h = cnode_forward_reference(
        params_np, np.asarray(Y), np.asarray(mask), Nc, D, delta_t, n_sub)

    assert np.allclose(np.asarray(y_preds), ref_preds, atol=1e-2, rtol=1e-2), \
        f"y_preds mismatch, max diff {np.abs(np.asarray(y_preds) - ref_preds).max()}"
    assert np.allclose(np.asarray(last_cn), ref_last_cn, atol=1e-2, rtol=1e-2), \
        f"last_h mismatch, max diff {np.abs(np.asarray(last_cn) - ref_last_cn).max()}"
    assert np.allclose(np.asarray(h_full), ref_h, atol=1e-2, rtol=1e-2), \
        f"h mismatch, max diff {np.abs(np.asarray(h_full) - ref_h).max()}"

    print("KERNEL_OK")
</pallas_src>

<mosaic_0001>
module attributes {stable_mosaic.version = 11 : i64} {
  func.func @_cnode_kernel(%arg0: i32, %arg1: memref<6x8x4xf32, #tpu.memory_space<vmem>>, %arg2: memref<6x8x4xf32, #tpu.memory_space<vmem>>, %arg3: memref<6x8x32xf32, #tpu.memory_space<vmem>>, %arg4: memref<6x8x32xf32, #tpu.memory_space<vmem>>, %arg5: memref<6x8x1xf32, #tpu.memory_space<vmem>>, %arg6: memref<68x64xf32, #tpu.memory_space<vmem>>, %arg7: memref<1x32xf32, #tpu.memory_space<vmem>>, %arg8: memref<1x32xf32, #tpu.memory_space<vmem>>, %arg9: memref<32x36xf32, #tpu.memory_space<vmem>>, %arg10: memref<1x36xf32, #tpu.memory_space<vmem>>, %arg11: memref<32x32xf32, #tpu.memory_space<vmem>>, %arg12: memref<1x32xf32, #tpu.memory_space<vmem>>, %arg13: memref<36x64xf32, #tpu.memory_space<vmem>>, %arg14: memref<6x8x4xf32, #tpu.memory_space<vmem>>, %arg15: memref<8x32xf32, #tpu.memory_space<vmem>>, %arg16: memref<8x4xf32, #tpu.memory_space<vmem>>, %arg17: memref<8x32xf32, #tpu.memory_space<vmem>>, %arg18: memref<8x32xf32, #tpu.memory_space<vmem>>) attributes {dimension_semantics = [#tpu.dimension_semantics<parallel>], iteration_bounds = array<i64: 1>, scalar_prefetch = 0 : i64, scratch_operands = 0 : i64, tpu.core_type = #tpu.core_type<tc>, window_params = [{transform_indices = @transform_0, window_bounds = array<i64: 6, 8, 4>}, {transform_indices = @transform_1, window_bounds = array<i64: 6, 8, 4>}, {transform_indices = @transform_2, window_bounds = array<i64: 6, 8, 32>}, {transform_indices = @transform_3, window_bounds = array<i64: 6, 8, 32>}, {transform_indices = @transform_4, window_bounds = array<i64: 6, 8, 1>}, {pipeline_mode = #tpu.pipeline_mode<synchronous>, transform_indices = @transform_5, window_bounds = array<i64: 68, 64>}, {pipeline_mode = #tpu.pipeline_mode<synchronous>, transform_indices = @transform_6, window_bounds = array<i64: 1, 32>}, {pipeline_mode = #tpu.pipeline_mode<synchronous>, transform_indices = @transform_7, window_bounds = array<i64: 1, 32>}, {pipeline_mode = #tpu.pipeline_mode<synchronous>, transform_indices = @transform_8, window_bounds = array<i64: 32, 36>}, {pipeline_mode = #tpu.pipeline_mode<synchronous>, transform_indices = @transform_9, window_bounds = array<i64: 1, 36>}, {pipeline_mode = #tpu.pipeline_mode<synchronous>, transform_indices = @transform_10, window_bounds = array<i64: 32, 32>}, {pipeline_mode = #tpu.pipeline_mode<synchronous>, transform_indices = @transform_11, window_bounds = array<i64: 1, 32>}, {pipeline_mode = #tpu.pipeline_mode<synchronous>, transform_indices = @transform_12, window_bounds = array<i64: 36, 64>}, {transform_indices = @transform_13, window_bounds = array<i64: 6, 8, 4>}, {transform_indices = @transform_14, window_bounds = array<i64: 8, 32>}, {transform_indices = @transform_15, window_bounds = array<i64: 8, 4>}, {transform_indices = @transform_16, window_bounds = array<i64: 8, 32>}, {transform_indices = @transform_17, window_bounds = array<i64: 8, 32>}]} {
    %c0 = arith.constant 0 : index
    %c0_0 = arith.constant 0 : index
    %0 = vector.load %arg6[%c0, %c0_0] : memref<68x64xf32, #tpu.memory_space<vmem>>, vector<68x64xf32>
    %c0_1 = arith.constant 0 : index
    %c0_2 = arith.constant 0 : index
    %1 = vector.load %arg7[%c0_1, %c0_2] : memref<1x32xf32, #tpu.memory_space<vmem>>, vector<1x32xf32>
    %c0_3 = arith.constant 0 : index
    %c0_4 = arith.constant 0 : index
    %2 = vector.load %arg8[%c0_3, %c0_4] : memref<1x32xf32, #tpu.memory_space<vmem>>, vector<1x32xf32>
    %c0_5 = arith.constant 0 : index
    %c0_6 = arith.constant 0 : index
    %3 = vector.load %arg9[%c0_5, %c0_6] : memref<32x36xf32, #tpu.memory_space<vmem>>, vector<32x36xf32>
    %c0_7 = arith.constant 0 : index
    %c0_8 = arith.constant 0 : index
    %4 = vector.load %arg10[%c0_7, %c0_8] : memref<1x36xf32, #tpu.memory_space<vmem>>, vector<1x36xf32>
    %c0_9 = arith.constant 0 : index
    %c0_10 = arith.constant 0 : index
    %5 = vector.load %arg11[%c0_9, %c0_10] : memref<32x32xf32, #tpu.memory_space<vmem>>, vector<32x32xf32>
    %c0_11 = arith.constant 0 : index
    %c0_12 = arith.constant 0 : index
    %6 = vector.load %arg12[%c0_11, %c0_12] : memref<1x32xf32, #tpu.memory_space<vmem>>, vector<1x32xf32>
    %c0_13 = arith.constant 0 : index
    %c0_14 = arith.constant 0 : index
    %7 = vector.load %arg13[%c0_13, %c0_14] : memref<36x64xf32, #tpu.memory_space<vmem>>, vector<36x64xf32>
    %cst = arith.constant 0.000000e+00 : f32
    %8 = vector.broadcast %cst : f32 to vector<8x32xf32>
    %cst_15 = arith.constant 0.000000e+00 : f32
    %9 = vector.broadcast %cst_15 : f32 to vector<8x4xf32>
    %cst_16 = arith.constant 0.000000e+00 : f32
    %10 = vector.broadcast %cst_16 : f32 to vector<8x32xf32>
    %cst_17 = arith.constant 0.000000e+00 : f32
    %11 = vector.broadcast %cst_17 : f32 to vector<8x32xf32>
    %12 = vector.broadcast %1 : vector<1x32xf32> to vector<8x32xf32>
    %13 = arith.addf %11, %12 : vector<8x32xf32>
    %cst_18 = arith.constant 0.000000e+00 : f32
    %14 = vector.broadcast %cst_18 : f32 to vector<8x32xf32>
    %cst_19 = arith.constant 0.000000e+00 : f32
    %15 = vector.broadcast %cst_19 : f32 to vector<8x32xf32>
    %cst_20 = arith.constant 0.000000e+00 : f32
    %16 = vector.broadcast %cst_20 : f32 to vector<8x32xf32>
    %17 = arith.maximumf %13, %16 : vector<8x32xf32>
    %18 = tpu.concatenate %8, %9, %17 in 1 : vector<8x32xf32>, vector<8x4xf32>, vector<8x32xf32> -> vector<8x68xf32>
    %cst_21 = arith.constant dense<0.000000e+00> : vector<8x64xf32>
    %19 = tpu.matmul %18, %0, %cst_21 {dimension_numbers = #tpu.dot_dimension_numbers<[1], [0], [0], [1], [0, 0, 1, 1], [], []>} : vector<8x68xf32>, vector<68x64xf32>, vector<8x64xf32> -> vector<8x64xf32>
    %20 = vector.extract_strided_slice %19 {offsets = [0, 32], sizes = [8, 32], strides = [1, 1]} : vector<8x64xf32> to vector<8x32xf32>
    %21 = vector.broadcast %2 : vector<1x32xf32> to vector<8x32xf32>
    %22 = arith.addf %20, %21 : vector<8x32xf32>
    %cst_22 = arith.constant 0.000000e+00 : f32
    %23 = vector.broadcast %cst_22 : f32 to vector<8x32xf32>
    %24 = arith.maximumf %22, %23 : vector<8x32xf32>
    %cst_23 = arith.constant dense<0.000000e+00> : vector<8x36xf32>
    %25 = tpu.matmul %24, %3, %cst_23 {dimension_numbers = #tpu.dot_dimension_numbers<[1], [0], [0], [1], [0, 0, 1, 1], [], []>} : vector<8x32xf32>, vector<32x36xf32>, vector<8x36xf32> -> vector<8x36xf32>
    %26 = vector.broadcast %4 : vector<1x36xf32> to vector<8x36xf32>
    %27 = arith.addf %25, %26 : vector<8x36xf32>
    %28 = vector.extract_strided_slice %19 {offsets = [0, 0], sizes = [8, 32], strides = [1, 1]} : vector<8x64xf32> to vector<8x32xf32>
    %29 = arith.addf %8, %28 : vector<8x32xf32>
    %30 = vector.extract_strided_slice %27 {offsets = [0, 0], sizes = [8, 32], strides = [1, 1]} : vector<8x36xf32> to vector<8x32xf32>
    %31 = arith.addf %13, %30 : vector<8x32xf32>
    %32 = vector.extract_strided_slice %27 {offsets = [0, 32], sizes = [8, 4], strides = [1, 1]} : vector<8x36xf32> to vector<8x4xf32>
    %33 = arith.addf %9, %32 : vector<8x4xf32>
    %34 = arith.addf %15, %24 : vector<8x32xf32>
    %cst_24 = arith.constant 0.000000e+00 : f32
    %35 = vector.broadcast %cst_24 : f32 to vector<8x32xf32>
    %36 = arith.maximumf %31, %35 : vector<8x32xf32>
    %37 = tpu.concatenate %29, %33, %36 in 1 : vector<8x32xf32>, vector<8x4xf32>, vector<8x32xf32> -> vector<8x68xf32>
    %cst_25 = arith.constant dense<0.000000e+00> : vector<8x64xf32>
    %38 = tpu.matmul %37, %0, %cst_25 {dimension_numbers = #tpu.dot_dimension_numbers<[1], [0], [0], [1], [0, 0, 1, 1], [], []>} : vector<8x68xf32>, vector<68x64xf32>, vector<8x64xf32> -> vector<8x64xf32>
    %39 = vector.extract_strided_slice %38 {offsets = [0, 32], sizes = [8, 32], strides = [1, 1]} : vector<8x64xf32> to vector<8x32xf32>
    %40 = vector.broadcast %2 : vector<1x32xf32> to vector<8x32xf32>
    %41 = arith.addf %39, %40 : vector<8x32xf32>
    %cst_26 = arith.constant 0.000000e+00 : f32
    %42 = vector.broadcast %cst_26 : f32 to vector<8x32xf32>
    %43 = arith.maximumf %41, %42 : vector<8x32xf32>
    %cst_27 = arith.constant dense<0.000000e+00> : vector<8x36xf32>
    %44 = tpu.matmul %43, %3, %cst_27 {dimension_numbers = #tpu.dot_dimension_numbers<[1], [0], [0], [1], [0, 0, 1, 1], [], []>} : vector<8x32xf32>, vector<32x36xf32>, vector<8x36xf32> -> vector<8x36xf32>
    %45 = vector.broadcast %4 : vector<1x36xf32> to vector<8x36xf32>
    %46 = arith.addf %44, %45 : vector<8x36xf32>
    %47 = vector.extract_strided_slice %38 {offsets = [0, 0], sizes = [8, 32], strides = [1, 1]} : vector<8x64xf32> to vector<8x32xf32>
    %48 = arith.addf %29, %47 : vector<8x32xf32>
    %49 = vector.extract_strided_slice %46 {offsets = [0, 0], sizes = [8, 32], strides = [1, 1]} : vector<8x36xf32> to vector<8x32xf32>
    %50 = arith.addf %31, %49 : vector<8x32xf32>
    %51 = vector.extract_strided_slice %46 {offsets = [0, 32], sizes = [8, 4], strides = [1, 1]} : vector<8x36xf32> to vector<8x4xf32>
    %52 = arith.addf %33, %51 : vector<8x4xf32>
    %53 = arith.addf %34, %43 : vector<8x32xf32>
    %cst_28 = arith.constant 0.000000e+00 : f32
    %54 = vector.broadcast %cst_28 : f32 to vector<8x32xf32>
    %55 = arith.maximumf %50, %54 : vector<8x32xf32>
    %56 = tpu.concatenate %48, %52, %55 in 1 : vector<8x32xf32>, vector<8x4xf32>, vector<8x32xf32> -> vector<8x68xf32>
    %cst_29 = arith.constant dense<0.000000e+00> : vector<8x64xf32>
    %57 = tpu.matmul %56, %0, %cst_29 {dimension_numbers = #tpu.dot_dimension_numbers<[1], [0], [0], [1], [0, 0, 1, 1], [], []>} : vector<8x68xf32>, vector<68x64xf32>, vector<8x64xf32> -> vector<8x64xf32>
    %58 = vector.extract_strided_slice %57 {offsets = [0, 32], sizes = [8, 32], strides = [1, 1]} : vector<8x64xf32> to vector<8x32xf32>
    %59 = vector.broadcast %2 : vector<1x32xf32> to vector<8x32xf32>
    %60 = arith.addf %58, %59 : vector<8x32xf32>
    %cst_30 = arith.constant 0.000000e+00 : f32
    %61 = vector.broadcast %cst_30 : f32 to vector<8x32xf32>
    %62 = arith.maximumf %60, %61 : vector<8x32xf32>
    %cst_31 = arith.constant dense<0.000000e+00> : vector<8x36xf32>
    %63 = tpu.matmul %62, %3, %cst_31 {dimension_numbers = #tpu.dot_dimension_numbers<[1], [0], [0], [1], [0, 0, 1, 1], [], []>} : vector<8x32xf32>, vector<32x36xf32>, vector<8x36xf32> -> vector<8x36xf32>
    %64 = vector.broadcast %4 : vector<1x36xf32> to vector<8x36xf32>
    %65 = arith.addf %63, %64 : vector<8x36xf32>
    %66 = vector.extract_strided_slice %57 {offsets = [0, 0], sizes = [8, 32], strides = [1, 1]} : vector<8x64xf32> to vector<8x32xf32>
    %67 = arith.addf %48, %66 : vector<8x32xf32>
    %68 = vector.extract_strided_slice %65 {offsets = [0, 0], sizes = [8, 32], strides = [1, 1]} : vector<8x36xf32> to vector<8x32xf32>
    %69 = arith.addf %50, %68 : vector<8x32xf32>
    %70 = vector.extract_strided_slice %65 {offsets = [0, 32], sizes = [8, 4], strides = [1, 1]} : vector<8x36xf32> to vector<8x4xf32>
    %71 = arith.addf %52, %70 : vector<8x4xf32>
    %72 = arith.addf %53, %62 : vector<8x32xf32>
    %cst_32 = arith.constant 0.000000e+00 : f32
    %73 = vector.broadcast %cst_32 : f32 to vector<8x32xf32>
    %74 = arith.maximumf %69, %73 : vector<8x32xf32>
    %75 = tpu.concatenate %67, %71, %74 in 1 : vector<8x32xf32>, vector<8x4xf32>, vector<8x32xf32> -> vector<8x68xf32>
    %cst_33 = arith.constant dense<0.000000e+00> : vector<8x64xf32>
    %76 = tpu.matmul %75, %0, %cst_33 {dimension_numbers = #tpu.dot_dimension_numbers<[1], [0], [0], [1], [0, 0, 1, 1], [], []>} : vector<8x68xf32>, vector<68x64xf32>, vector<8x64xf32> -> vector<8x64xf32>
    %77 = vector.extract_strided_slice %76 {offsets = [0, 32], sizes = [8, 32], strides = [1, 1]} : vector<8x64xf32> to vector<8x32xf32>
    %78 = vector.broadcast %2 : vector<1x32xf32> to vector<8x32xf32>
    %79 = arith.addf %77, %78 : vector<8x32xf32>
    %cst_34 = arith.constant 0.000000e+00 : f32
    %80 = vector.broadcast %cst_34 : f32 to vector<8x32xf32>
    %81 = arith.maximumf %79, %80 : vector<8x32xf32>
    %cst_35 = arith.constant dense<0.000000e+00> : vector<8x36xf32>
    %82 = tpu.matmul %81, %3, %cst_35 {dimension_numbers = #tpu.dot_dimension_numbers<[1], [0], [0], [1], [0, 0, 1, 1], [], []>} : vector<8x32xf32>, vector<32x36xf32>, vector<8x36xf32> -> vector<8x36xf32>
    %83 = vector.broadcast %4 : vector<1x36xf32> to vector<8x36xf32>
    %84 = arith.addf %82, %83 : vector<8x36xf32>
    %85 = vector.extract_strided_slice %76 {offsets = [0, 0], sizes = [8, 32], strides = [1, 1]} : vector<8x64xf32> to vector<8x32xf32>
    %86 = arith.addf %67, %85 : vector<8x32xf32>
    %87 = vector.extract_strided_slice %84 {offsets = [0, 32], sizes = [8, 4], strides = [1, 1]} : vector<8x36xf32> to vector<8x4xf32>
    %88 = arith.addf %71, %87 : vector<8x4xf32>
    %89 = arith.addf %72, %81 : vector<8x32xf32>
    %cst_36 = arith.constant dense<0.000000e+00> : vector<8x32xf32>
    %90 = tpu.matmul %89, %5, %cst_36 {dimension_numbers = #tpu.dot_dimension_numbers<[1], [0], [0], [1], [0, 0, 1, 1], [], []>} : vector<8x32xf32>, vector<32x32xf32>, vector<8x32xf32> -> vector<8x32xf32>
    %91 = arith.addf %10, %90 : vector<8x32xf32>
    %92 = vector.broadcast %6 : vector<1x32xf32> to vector<8x32xf32>
    %93 = arith.addf %91, %92 : vector<8x32xf32>
    %c0_37 = arith.constant 0 : index
    %c0_38 = arith.constant 0 : index
    %c0_39 = arith.constant 0 : index
    %94 = vector.load %arg14[%c0_37, %c0_38, %c0_39] : memref<6x8x4xf32, #tpu.memory_space<vmem>>, vector<1x8x4xf32>
    %95 = vector.shape_cast %94 : vector<1x8x4xf32> to vector<8x4xf32>
    %96 = vector.shape_cast %88 : vector<8x4xf32> to vector<1x8x4xf32>
    tpu.vector_store %arg14[%c0_37, %c0_38, %c0_39], %96 {strides = array<i32>} : memref<6x8x4xf32, #tpu.memory_space<vmem>>, vector<1x8x4xf32>,
    %c0_40 = arith.constant 0 : index
    %c0_41 = arith.constant 0 : index
    %c0_42 = arith.constant 0 : index
    %97 = vector.load %arg1[%c0_40, %c0_41, %c0_42] : memref<6x8x4xf32, #tpu.memory_space<vmem>>, vector<1x8x4xf32>
    %98 = vector.shape_cast %97 : vector<1x8x4xf32> to vector<8x4xf32>
    %c0_43 = arith.constant 0 : index
    %c0_44 = arith.constant 0 : index
    %c0_45 = arith.constant 0 : index
    %99 = vector.load %arg2[%c0_43, %c0_44, %c0_45] : memref<6x8x4xf32, #tpu.memory_space<vmem>>, vector<1x8x4xf32>
    %100 = vector.shape_cast %99 : vector<1x8x4xf32> to vector<8x4xf32>
    %101 = arith.mulf %88, %100 : vector<8x4xf32>
    %102 = arith.addf %98, %101 : vector<8x4xf32>
    %c0_46 = arith.constant 0 : index
    %c0_47 = arith.constant 0 : index
    %c0_48 = arith.constant 0 : index
    %103 = vector.load %arg3[%c0_46, %c0_47, %c0_48] : memref<6x8x32xf32, #tpu.memory_space<vmem>>, vector<1x8x32xf32>
    %104 = vector.shape_cast %103 : vector<1x8x32xf32> to vector<8x32xf32>
    %105 = arith.mulf %86, %104 : vector<8x32xf32>
    %c0_49 = arith.constant 0 : index
    %c0_50 = arith.constant 0 : index
    %c0_51 = arith.constant 0 : index
    %106 = vector.load %arg4[%c0_49, %c0_50, %c0_51] : memref<6x8x32xf32, #tpu.memory_space<vmem>>, vector<1x8x32xf32>
    %107 = vector.shape_cast %106 : vector<1x8x32xf32> to vector<8x32xf32>
    %108 = arith.mulf %93, %107 : vector<8x32xf32>
    %109 = arith.addf %105, %108 : vector<8x32xf32>
    %110 = tpu.concatenate %102, %109 in 1 : vector<8x4xf32>, vector<8x32xf32> -> vector<8x36xf32>
    %cst_52 = arith.constant dense<0.000000e+00> : vector<8x64xf32>
    %111 = tpu.matmul %110, %7, %cst_52 {dimension_numbers = #tpu.dot_dimension_numbers<[1], [0], [0], [1], [0, 0, 1, 1], [], []>} : vector<8x36xf32>, vector<36x64xf32>, vector<8x64xf32> -> vector<8x64xf32>
    %112 = vector.extract_strided_slice %111 {offsets = [0, 0], sizes = [8, 32], strides = [1, 1]} : vector<8x64xf32> to vector<8x32xf32>
    %113 = vector.broadcast %1 : vector<1x32xf32> to vector<8x32xf32>
    %114 = arith.addf %112, %113 : vector<8x32xf32>
    %115 = vector.extract_strided_slice %111 {offsets = [0, 32], sizes = [8, 32], strides = [1, 1]} : vector<8x64xf32> to vector<8x32xf32>
    %c0_53 = arith.constant 0 : index
    %c0_54 = arith.constant 0 : index
    %c0_55 = arith.constant 0 : index
    %116 = vector.load %arg5[%c0_53, %c0_54, %c0_55] : memref<6x8x1xf32, #tpu.memory_space<vmem>>, vector<1x8x1xf32>
    %117 = vector.shape_cast %116 : vector<1x8x1xf32> to vector<8x1xf32>
    %cst_56 = arith.constant 0.000000e+00 : f32
    %118 = vector.broadcast %cst_56 : f32 to vector<8x1xf32>
    %119 = arith.cmpf ogt, %117, %118 : vector<8x1xf32>
    %120 = vector.shape_cast %119 : vector<8x1xi1> to vector<8x1xi1>
    %121 = vector.broadcast %120 : vector<8x1xi1> to vector<8x32xi1>
    %122 = arith.select %121, %86, %14 : vector<8x32xi1>, vector<8x32xf32>
    %cst_57 = arith.constant 0.000000e+00 : f32
    %123 = vector.broadcast %cst_57 : f32 to vector<8x32xf32>
    %cst_58 = arith.constant 0.000000e+00 : f32
    %124 = vector.broadcast %cst_58 : f32 to vector<8x32xf32>
    %125 = arith.maximumf %114, %124 : vector<8x32xf32>
    %126 = tpu.concatenate %86, %102, %125 in 1 : vector<8x32xf32>, vector<8x4xf32>, vector<8x32xf32> -> vector<8x68xf32>
    %cst_59 = arith.constant dense<0.000000e+00> : vector<8x64xf32>
    %127 = tpu.matmul %126, %0, %cst_59 {dimension_numbers = #tpu.dot_dimension_numbers<[1], [0], [0], [1], [0, 0, 1, 1], [], []>} : vector<8x68xf32>, vector<68x64xf32>, vector<8x64xf32> -> vector<8x64xf32>
    %128 = vector.extract_strided_slice %127 {offsets = [0, 32], sizes = [8, 32], strides = [1, 1]} : vector<8x64xf32> to vector<8x32xf32>
    %129 = vector.broadcast %2 : vector<1x32xf32> to vector<8x32xf32>
    %130 = arith.addf %128, %129 : vector<8x32xf32>
    %cst_60 = arith.constant 0.000000e+00 : f32
    %131 = vector.broadcast %cst_60 : f32 to vector<8x32xf32>
    %132 = arith.maximumf %130, %131 : vector<8x32xf32>
    %cst_61 = arith.constant dense<0.000000e+00> : vector<8x36xf32>
    %133 = tpu.matmul %132, %3, %cst_61 {dimension_numbers = #tpu.dot_dimension_numbers<[1], [0], [0], [1], [0, 0, 1, 1], [], []>} : vector<8x32xf32>, vector<32x36xf32>, vector<8x36xf32> -> vector<8x36xf32>
    %134 = vector.broadcast %4 : vector<1x36xf32> to vector<8x36xf32>
    %135 = arith.addf %133, %134 : vector<8x36xf32>
    %136 = vector.extract_strided_slice %127 {offsets = [0, 0], sizes = [8, 32], strides = [1, 1]} : vector<8x64xf32> to vector<8x32xf32>
    %137 = arith.addf %86, %136 : vector<8x32xf32>
    %138 = vector.extract_strided_slice %135 {offsets = [0, 0], sizes = [8, 32], strides = [1, 1]} : vector<8x36xf32> to vector<8x32xf32>
    %139 = arith.addf %114, %138 : vector<8x32xf32>
    %140 = vector.extract_strided_slice %135 {offsets = [0, 32], sizes = [8, 4], strides = [1, 1]} : vector<8x36xf32> to vector<8x4xf32>
    %141 = arith.addf %102, %140 : vector<8x4xf32>
    %142 = arith.addf %123, %132 : vector<8x32xf32>
    %cst_62 = arith.constant 0.000000e+00 : f32
    %143 = vector.broadcast %cst_62 : f32 to vector<8x32xf32>
    %144 = arith.maximumf %139, %143 : vector<8x32xf32>
    %145 = tpu.concatenate %137, %141, %144 in 1 : vector<8x32xf32>, vector<8x4xf32>, vector<8x32xf32> -> vector<8x68xf32>
    %cst_63 = arith.constant dense<0.000000e+00> : vector<8x64xf32>
    %146 = tpu.matmul %145, %0, %cst_63 {dimension_numbers = #tpu.dot_dimension_numbers<[1], [0], [0], [1], [0, 0, 1, 1], [], []>} : vector<8x68xf32>, vector<68x64xf32>, vector<8x64xf32> -> vector<8x64xf32>
    %147 = vector.extract_strided_slice %146 {offsets = [0, 32], sizes = [8, 32], strides = [1, 1]} : vector<8x64xf32> to vector<8x32xf32>
    %148 = vector.broadcast %2 : vector<1x32xf32> to vector<8x32xf32>
    %149 = arith.addf %147, %148 : vector<8x32xf32>
    %cst_64 = arith.constant 0.000000e+00 : f32
    %150 = vector.broadcast %cst_64 : f32 to vector<8x32xf32>
    %151 = arith.maximumf %149, %150 : vector<8x32xf32>
    %cst_65 = arith.constant dense<0.000000e+00> : vector<8x36xf32>
    %152 = tpu.matmul %151, %3, %cst_65 {dimension_numbers = #tpu.dot_dimension_numbers<[1], [0], [0], [1], [0, 0, 1, 1], [], []>} : vector<8x32xf32>, vector<32x36xf32>, vector<8x36xf32> -> vector<8x36xf32>
    %153 = vector.broadcast %4 : vector<1x36xf32> to vector<8x36xf32>
    %154 = arith.addf %152, %153 : vector<8x36xf32>
    %155 = vector.extract_strided_slice %146 {offsets = [0, 0], sizes = [8, 32], strides = [1, 1]} : vector<8x64xf32> to vector<8x32xf32>
    %156 = arith.addf %137, %155 : vector<8x32xf32>
    %157 = vector.extract_strided_slice %154 {offsets = [0, 0], sizes = [8, 32], strides = [1, 1]} : vector<8x36xf32> to vector<8x32xf32>
    %158 = arith.addf %139, %157 : vector<8x32xf32>
    %159 = vector.extract_strided_slice %154 {offsets = [0, 32], sizes = [8, 4], strides = [1, 1]} : vector<8x36xf32> to vector<8x4xf32>
    %160 = arith.addf %141, %159 : vector<8x4xf32>
    %161 = arith.addf %142, %151 : vector<8x32xf32>
    %cst_66 = arith.constant 0.000000e+00 : f32
    %162 = vector.broadcast %cst_66 : f32 to vector<8x32xf32>
    %163 = arith.maximumf %158, %162 : vector<8x32xf32>
    %164 = tpu.concatenate %156, %160, %163 in 1 : vector<8x32xf32>, vector<8x4xf32>, vector<8x32xf32> -> vector<8x68xf32>
    %cst_67 = arith.constant dense<0.000000e+00> : vector<8x64xf32>
    %165 = tpu.matmul %164, %0, %cst_67 {dimension_numbers = #tpu.dot_dimension_numbers<[1], [0], [0], [1], [0, 0, 1, 1], [], []>} : vector<8x68xf32>, vector<68x64xf32>, vector<8x64xf32> -> vector<8x64xf32>
    %166 = vector.extract_strided_slice %165 {offsets = [0, 32], sizes = [8, 32], strides = [1, 1]} : vector<8x64xf32> to vector<8x32xf32>
    %167 = vector.broadcast %2 : vector<1x32xf32> to vector<8x32xf32>
    %168 = arith.addf %166, %167 : vector<8x32xf32>
    %cst_68 = arith.constant 0.000000e+00 : f32
    %169 = vector.broadcast %cst_68 : f32 to vector<8x32xf32>
    %170 = arith.maximumf %168, %169 : vector<8x32xf32>
    %cst_69 = arith.constant dense<0.000000e+00> : vector<8x36xf32>
    %171 = tpu.matmul %170, %3, %cst_69 {dimension_numbers = #tpu.dot_dimension_numbers<[1], [0], [0], [1], [0, 0, 1, 1], [], []>} : vector<8x32xf32>, vector<32x36xf32>, vector<8x36xf32> -> vector<8x36xf32>
    %172 = vector.broadcast %4 : vector<1x36xf32> to vector<8x36xf32>
    %173 = arith.addf %171, %172 : vector<8x36xf32>
    %174 = vector.extract_strided_slice %165 {offsets = [0, 0], sizes = [8, 32], strides = [1, 1]} : vector<8x64xf32> to vector<8x32xf32>
    %175 = arith.addf %156, %174 : vector<8x32xf32>
    %176 = vector.extract_strided_slice %173 {offsets = [0, 0], sizes = [8, 32], strides = [1, 1]} : vector<8x36xf32> to vector<8x32xf32>
    %177 = arith.addf %158, %176 : vector<8x32xf32>
    %178 = vector.extract_strided_slice %173 {offsets = [0, 32], sizes = [8, 4], strides = [1, 1]} : vector<8x36xf32> to vector<8x4xf32>
    %179 = arith.addf %160, %178 : vector<8x4xf32>
    %180 = arith.addf %161, %170 : vector<8x32xf32>
    %cst_70 = arith.constant 0.000000e+00 : f32
    %181 = vector.broadcast %cst_70 : f32 to vector<8x32xf32>
    %182 = arith.maximumf %177, %181 : vector<8x32xf32>
    %183 = tpu.concatenate %175, %179, %182 in 1 : vector<8x32xf32>, vector<8x4xf32>, vector<8x32xf32> -> vector<8x68xf32>
    %cst_71 = arith.constant dense<0.000000e+00> : vector<8x64xf32>
    %184 = tpu.matmul %183, %0, %cst_71 {dimension_numbers = #tpu.dot_dimension_numbers<[1], [0], [0], [1], [0, 0, 1, 1], [], []>} : vector<8x68xf32>, vector<68x64xf32>, vector<8x64xf32> -> vector<8x64xf32>
    %185 = vector.extract_strided_slice %184 {offsets = [0, 32], sizes = [8, 32], strides = [1, 1]} : vector<8x64xf32> to vector<8x32xf32>
    %186 = vector.broadcast %2 : vector<1x32xf32> to vector<8x32xf32>
    %187 = arith.addf %185, %186 : vector<8x32xf32>
    %cst_72 = arith.constant 0.000000e+00 : f32
    %188 = vector.broadcast %cst_72 : f32 to vector<8x32xf32>
    %189 = arith.maximumf %187, %188 : vector<8x32xf32>
    %cst_73 = arith.constant dense<0.000000e+00> : vector<8x36xf32>
    %190 = tpu.matmul %189, %3, %cst_73 {dimension_numbers = #tpu.dot_dimension_numbers<[1], [0], [0], [1], [0, 0, 1, 1], [], []>} : vector<8x32xf32>, vector<32x36xf32>, vector<8x36xf32> -> vector<8x36xf32>
    %191 = vector.broadcast %4 : vector<1x36xf32> to vector<8x36xf32>
    %192 = arith.addf %190, %191 : vector<8x36xf32>
    %193 = vector.extract_strided_slice %184 {offsets = [0, 0], sizes = [8, 32], strides = [1, 1]} : vector<8x64xf32> to vector<8x32xf32>
    %194 = arith.addf %175, %193 : vector<8x32xf32>
    %195 = vector.extract_strided_slice %192 {offsets = [0, 32], sizes = [8, 4], strides = [1, 1]} : vector<8x36xf32> to vector<8x4xf32>
    %196 = arith.addf %179, %195 : vector<8x4xf32>
    %197 = arith.addf %180, %189 : vector<8x32xf32>
    %cst_74 = arith.constant dense<0.000000e+00> : vector<8x32xf32>
    %198 = tpu.matmul %197, %5, %cst_74 {dimension_numbers = #tpu.dot_dimension_numbers<[1], [0], [0], [1], [0, 0, 1, 1], [], []>} : vector<8x32xf32>, vector<32x32xf32>, vector<8x32xf32> -> vector<8x32xf32>
    %199 = arith.addf %115, %198 : vector<8x32xf32>
    %200 = vector.broadcast %6 : vector<1x32xf32> to vector<8x32xf32>
    %201 = arith.addf %199, %200 : vector<8x32xf32>
    %c1 = arith.constant 1 : index
    %c0_75 = arith.constant 0 : index
    %c0_76 = arith.constant 0 : index
    %202 = vector.load %arg14[%c1, %c0_75, %c0_76] : memref<6x8x4xf32, #tpu.memory_space<vmem>>, vector<1x8x4xf32>
    %203 = vector.shape_cast %202 : vector<1x8x4xf32> to vector<8x4xf32>
    %204 = vector.shape_cast %196 : vector<8x4xf32> to vector<1x8x4xf32>
    tpu.vector_store %arg14[%c1, %c0_75, %c0_76], %204 {strides = array<i32>} : memref<6x8x4xf32, #tpu.memory_space<vmem>>, vector<1x8x4xf32>,
    %c1_77 = arith.constant 1 : index
    %c0_78 = arith.constant 0 : index
    %c0_79 = arith.constant 0 : index
    %205 = vector.load %arg1[%c1_77, %c0_78, %c0_79] : memref<6x8x4xf32, #tpu.memory_space<vmem>>, vector<1x8x4xf32>
    %206 = vector.shape_cast %205 : vector<1x8x4xf32> to vector<8x4xf32>
    %c1_80 = arith.constant 1 : index
    %c0_81 = arith.constant 0 : index
    %c0_82 = arith.constant 0 : index
    %207 = vector.load %arg2[%c1_80, %c0_81, %c0_82] : memref<6x8x4xf32, #tpu.memory_space<vmem>>, vector<1x8x4xf32>
    %208 = vector.shape_cast %207 : vector<1x8x4xf32> to vector<8x4xf32>
    %209 = arith.mulf %196, %208 : vector<8x4xf32>
    %210 = arith.addf %206, %209 : vector<8x4xf32>
    %c1_83 = arith.constant 1 : index
    %c0_84 = arith.constant 0 : index
    %c0_85 = arith.constant 0 : index
    %211 = vector.load %arg3[%c1_83, %c0_84, %c0_85] : memref<6x8x32xf32, #tpu.memory_space<vmem>>, vector<1x8x32xf32>
    %212 = vector.shape_cast %211 : vector<1x8x32xf32> to vector<8x32xf32>
    %213 = arith.mulf %194, %212 : vector<8x32xf32>
    %c1_86 = arith.constant 1 : index
    %c0_87 = arith.constant 0 : index
    %c0_88 = arith.constant 0 : index
    %214 = vector.load %arg4[%c1_86, %c0_87, %c0_88] : memref<6x8x32xf32, #tpu.memory_space<vmem>>, vector<1x8x32xf32>
    %215 = vector.shape_cast %214 : vector<1x8x32xf32> to vector<8x32xf32>
    %216 = arith.mulf %201, %215 : vector<8x32xf32>
    %217 = arith.addf %213, %216 : vector<8x32xf32>
    %218 = tpu.concatenate %210, %217 in 1 : vector<8x4xf32>, vector<8x32xf32> -> vector<8x36xf32>
    %cst_89 = arith.constant dense<0.000000e+00> : vector<8x64xf32>
    %219 = tpu.matmul %218, %7, %cst_89 {dimension_numbers = #tpu.dot_dimension_numbers<[1], [0], [0], [1], [0, 0, 1, 1], [], []>} : vector<8x36xf32>, vector<36x64xf32>, vector<8x64xf32> -> vector<8x64xf32>
    %220 = vector.extract_strided_slice %219 {offsets = [0, 0], sizes = [8, 32], strides = [1, 1]} : vector<8x64xf32> to vector<8x32xf32>
    %221 = vector.broadcast %1 : vector<1x32xf32> to vector<8x32xf32>
    %222 = arith.addf %220, %221 : vector<8x32xf32>
    %223 = vector.extract_strided_slice %219 {offsets = [0, 32], sizes = [8, 32], strides = [1, 1]} : vector<8x64xf32> to vector<8x32xf32>
    %c1_90 = arith.constant 1 : index
    %c0_91 = arith.constant 0 : index
    %c0_92 = arith.constant 0 : index
    %224 = vector.load %arg5[%c1_90, %c0_91, %c0_92] : memref<6x8x1xf32, #tpu.memory_space<vmem>>, vector<1x8x1xf32>
    %225 = vector.shape_cast %224 : vector<1x8x1xf32> to vector<8x1xf32>
    %cst_93 = arith.constant 0.000000e+00 : f32
    %226 = vector.broadcast %cst_93 : f32 to vector<8x1xf32>
    %227 = arith.cmpf ogt, %225, %226 : vector<8x1xf32>
    %228 = vector.shape_cast %227 : vector<8x1xi1> to vector<8x1xi1>
    %229 = vector.broadcast %228 : vector<8x1xi1> to vector<8x32xi1>
    %230 = arith.select %229, %194, %122 : vector<8x32xi1>, vector<8x32xf32>
    %cst_94 = arith.constant 0.000000e+00 : f32
    %231 = vector.broadcast %cst_94 : f32 to vector<8x32xf32>
    %cst_95 = arith.constant 0.000000e+00 : f32
    %232 = vector.broadcast %cst_95 : f32 to vector<8x32xf32>
    %233 = arith.maximumf %222, %232 : vector<8x32xf32>
    %234 = tpu.concatenate %194, %210, %233 in 1 : vector<8x32xf32>, vector<8x4xf32>, vector<8x32xf32> -> vector<8x68xf32>
    %cst_96 = arith.constant dense<0.000000e+00> : vector<8x64xf32>
    %235 = tpu.matmul %234, %0, %cst_96 {dimension_numbers = #tpu.dot_dimension_numbers<[1], [0], [0], [1], [0, 0, 1, 1], [], []>} : vector<8x68xf32>, vector<68x64xf32>, vector<8x64xf32> -> vector<8x64xf32>
    %236 = vector.extract_strided_slice %235 {offsets = [0, 32], sizes = [8, 32], strides = [1, 1]} : vector<8x64xf32> to vector<8x32xf32>
    %237 = vector.broadcast %2 : vector<1x32xf32> to vector<8x32xf32>
    %238 = arith.addf %236, %237 : vector<8x32xf32>
    %cst_97 = arith.constant 0.000000e+00 : f32
    %239 = vector.broadcast %cst_97 : f32 to vector<8x32xf32>
    %240 = arith.maximumf %238, %239 : vector<8x32xf32>
    %cst_98 = arith.constant dense<0.000000e+00> : vector<8x36xf32>
    %241 = tpu.matmul %240, %3, %cst_98 {dimension_numbers = #tpu.dot_dimension_numbers<[1], [0], [0], [1], [0, 0, 1, 1], [], []>} : vector<8x32xf32>, vector<32x36xf32>, vector<8x36xf32> -> vector<8x36xf32>
    %242 = vector.broadcast %4 : vector<1x36xf32> to vector<8x36xf32>
    %243 = arith.addf %241, %242 : vector<8x36xf32>
    %244 = vector.extract_strided_slice %235 {offsets = [0, 0], sizes = [8, 32], strides = [1, 1]} : vector<8x64xf32> to vector<8x32xf32>
    %245 = arith.addf %194, %244 : vector<8x32xf32>
    %246 = vector.extract_strided_slice %243 {offsets = [0, 0], sizes = [8, 32], strides = [1, 1]} : vector<8x36xf32> to vector<8x32xf32>
    %247 = arith.addf %222, %246 : vector<8x32xf32>
    %248 = vector.extract_strided_slice %243 {offsets = [0, 32], sizes = [8, 4], strides = [1, 1]} : vector<8x36xf32> to vector<8x4xf32>
    %249 = arith.addf %210, %248 : vector<8x4xf32>
    %250 = arith.addf %231, %240 : vector<8x32xf32>
    %cst_99 = arith.constant 0.000000e+00 : f32
    %251 = vector.broadcast %cst_99 : f32 to vector<8x32xf32>
    %252 = arith.maximumf %247, %251 : vector<8x32xf32>
    %253 = tpu.concatenate %245, %249, %252 in 1 : vector<8x32xf32>, vector<8x4xf32>, vector<8x32xf32> -> vector<8x68xf32>
    %cst_100 = arith.constant dense<0.000000e+00> : vector<8x64xf32>
    %254 = tpu.matmul %253, %0, %cst_100 {dimension_numbers = #tpu.dot_dimension_numbers<[1], [0], [0], [1], [0, 0, 1, 1], [], []>} : vector<8x68xf32>, vector<68x64xf32>, vector<8x64xf32> -> vector<8x64xf32>
    %255 = vector.extract_strided_slice %254 {offsets = [0, 32], sizes = [8, 32], strides = [1, 1]} : vector<8x64xf32> to vector<8x32xf32>
    %256 = vector.broadcast %2 : vector<1x32xf32> to vector<8x32xf32>
    %257 = arith.addf %255, %256 : vector<8x32xf32>
    %cst_101 = arith.constant 0.000000e+00 : f32
    %258 = vector.broadcast %cst_101 : f32 to vector<8x32xf32>
    %259 = arith.maximumf %257, %258 : vector<8x32xf32>
    %cst_102 = arith.constant dense<0.000000e+00> : vector<8x36xf32>
    %260 = tpu.matmul %259, %3, %cst_102 {dimension_numbers = #tpu.dot_dimension_numbers<[1], [0], [0], [1], [0, 0, 1, 1], [], []>} : vector<8x32xf32>, vector<32x36xf32>, vector<8x36xf32> -> vector<8x36xf32>
    %261 = vector.broadcast %4 : vector<1x36xf32> to vector<8x36xf32>
    %262 = arith.addf %260, %261 : vector<8x36xf32>
    %263 = vector.extract_strided_slice %254 {offsets = [0, 0], sizes = [8, 32], strides = [1, 1]} : vector<8x64xf32> to vector<8x32xf32>
    %264 = arith.addf %245, %263 : vector<8x32xf32>
    %265 = vector.extract_strided_slice %262 {offsets = [0, 0], sizes = [8, 32], strides = [1, 1]} : vector<8x36xf32> to vector<8x32xf32>
    %266 = arith.addf %247, %265 : vector<8x32xf32>
    %267 = vector.extract_strided_slice %262 {offsets = [0, 32], sizes = [8, 4], strides = [1, 1]} : vector<8x36xf32> to vector<8x4xf32>
    %268 = arith.addf %249, %267 : vector<8x4xf32>
    %269 = arith.addf %250, %259 : vector<8x32xf32>
    %cst_103 = arith.constant 0.000000e+00 : f32
    %270 = vector.broadcast %cst_103 : f32 to vector<8x32xf32>
    %271 = arith.maximumf %266, %270 : vector<8x32xf32>
    %272 = tpu.concatenate %264, %268, %271 in 1 : vector<8x32xf32>, vector<8x4xf32>, vector<8x32xf32> -> vector<8x68xf32>
    %cst_104 = arith.constant dense<0.000000e+00> : vector<8x64xf32>
    %273 = tpu.matmul %272, %0, %cst_104 {dimension_numbers = #tpu.dot_dimension_numbers<[1], [0], [0], [1], [0, 0, 1, 1], [], []>} : vector<8x68xf32>, vector<68x64xf32>, vector<8x64xf32> -> vector<8x64xf32>
    %274 = vector.extract_strided_slice %273 {offsets = [0, 32], sizes = [8, 32], strides = [1, 1]} : vector<8x64xf32> to vector<8x32xf32>
    %275 = vector.broadcast %2 : vector<1x32xf32> to vector<8x32xf32>
    %276 = arith.addf %274, %275 : vector<8x32xf32>
    %cst_105 = arith.constant 0.000000e+00 : f32
    %277 = vector.broadcast %cst_105 : f32 to vector<8x32xf32>
    %278 = arith.maximumf %276, %277 : vector<8x32xf32>
    %cst_106 = arith.constant dense<0.000000e+00> : vector<8x36xf32>
    %279 = tpu.matmul %278, %3, %cst_106 {dimension_numbers = #tpu.dot_dimension_numbers<[1], [0], [0], [1], [0, 0, 1, 1], [], []>} : vector<8x32xf32>, vector<32x36xf32>, vector<8x36xf32> -> vector<8x36xf32>
    %280 = vector.broadcast %4 : vector<1x36xf32> to vector<8x36xf32>
    %281 = arith.addf %279, %280 : vector<8x36xf32>
    %282 = vector.extract_strided_slice %273 {offsets = [0, 0], sizes = [8, 32], strides = [1, 1]} : vector<8x64xf32> to vector<8x32xf32>
    %283 = arith.addf %264, %282 : vector<8x32xf32>
    %284 = vector.extract_strided_slice %281 {offsets = [0, 0], sizes = [8, 32], strides = [1, 1]} : vector<8x36xf32> to vector<8x32xf32>
    %285 = arith.addf %266, %284 : vector<8x32xf32>
    %286 = vector.extract_strided_slice %281 {offsets = [0, 32], sizes = [8, 4], strides = [1, 1]} : vector<8x36xf32> to vector<8x4xf32>
    %287 = arith.addf %268, %286 : vector<8x4xf32>
    %288 = arith.addf %269, %278 : vector<8x32xf32>
    %cst_107 = arith.constant 0.000000e+00 : f32
    %289 = vector.broadcast %cst_107 : f32 to vector<8x32xf32>
    %290 = arith.maximumf %285, %289 : vector<8x32xf32>
    %291 = tpu.concatenate %283, %287, %290 in 1 : vector<8x32xf32>, vector<8x4xf32>, vector<8x32xf32> -> vector<8x68xf32>
    %cst_108 = arith.constant dense<0.000000e+00> : vector<8x64xf32>
    %292 = tpu.matmul %291, %0, %cst_108 {dimension_numbers = #tpu.dot_dimension_numbers<[1], [0], [0], [1], [0, 0, 1, 1], [], []>} : vector<8x68xf32>, vector<68x64xf32>, vector<8x64xf32> -> vector<8x64xf32>
    %293 = vector.extract_strided_slice %292 {offsets = [0, 32], sizes = [8, 32], strides = [1, 1]} : vector<8x64xf32> to vector<8x32xf32>
    %294 = vector.broadcast %2 : vector<1x32xf32> to vector<8x32xf32>
    %295 = arith.addf %293, %294 : vector<8x32xf32>
    %cst_109 = arith.constant 0.000000e+00 : f32
    %296 = vector.broadcast %cst_109 : f32 to vector<8x32xf32>
    %297 = arith.maximumf %295, %296 : vector<8x32xf32>
    %cst_110 = arith.constant dense<0.000000e+00> : vector<8x36xf32>
    %298 = tpu.matmul %297, %3, %cst_110 {dimension_numbers = #tpu.dot_dimension_numbers<[1], [0], [0], [1], [0, 0, 1, 1], [], []>} : vector<8x32xf32>, vector<32x36xf32>, vector<8x36xf32> -> vector<8x36xf32>
    %299 = vector.broadcast %4 : vector<1x36xf32> to vector<8x36xf32>
    %300 = arith.addf %298, %299 : vector<8x36xf32>
    %301 = vector.extract_strided_slice %292 {offsets = [0, 0], sizes = [8, 32], strides = [1, 1]} : vector<8x64xf32> to vector<8x32xf32>
    %302 = arith.addf %283, %301 : vector<8x32xf32>
    %303 = vector.extract_strided_slice %300 {offsets = [0, 32], sizes = [8, 4], strides = [1, 1]} : vector<8x36xf32> to vector<8x4xf32>
    %304 = arith.addf %287, %303 : vector<8x4xf32>
    %305 = arith.addf %288, %297 : vector<8x32xf32>
    %cst_111 = arith.constant dense<0.000000e+00> : vector<8x32xf32>
    %306 = tpu.matmul %305, %5, %cst_111 {dimension_numbers = #tpu.dot_dimension_numbers<[1], [0], [0], [1], [0, 0, 1, 1], [], []>} : vector<8x32xf32>, vector<32x32xf32>, vector<8x32xf32> -> vector<8x32xf32>
    %307 = arith.addf %223, %306 : vector<8x32xf32>
    %308 = vector.broadcast %6 : vector<1x32xf32> to vector<8x32xf32>
    %309 = arith.addf %307, %308 : vector<8x32xf32>
    %c2 = arith.constant 2 : index
    %c0_112 = arith.constant 0 : index
    %c0_113 = arith.constant 0 : index
    %310 = vector.load %arg14[%c2, %c0_112, %c0_113] : memref<6x8x4xf32, #tpu.memory_space<vmem>>, vector<1x8x4xf32>
    %311 = vector.shape_cast %310 : vector<1x8x4xf32> to vector<8x4xf32>
    %312 = vector.shape_cast %304 : vector<8x4xf32> to vector<1x8x4xf32>
    tpu.vector_store %arg14[%c2, %c0_112, %c0_113], %312 {strides = array<i32>} : memref<6x8x4xf32, #tpu.memory_space<vmem>>, vector<1x8x4xf32>,
    %c2_114 = arith.constant 2 : index
    %c0_115 = arith.constant 0 : index
    %c0_116 = arith.constant 0 : index
    %313 = vector.load %arg1[%c2_114, %c0_115, %c0_116] : memref<6x8x4xf32, #tpu.memory_space<vmem>>, vector<1x8x4xf32>
    %314 = vector.shape_cast %313 : vector<1x8x4xf32> to vector<8x4xf32>
    %c2_117 = arith.constant 2 : index
    %c0_118 = arith.constant 0 : index
    %c0_119 = arith.constant 0 : index
    %315 = vector.load %arg2[%c2_117, %c0_118, %c0_119] : memref<6x8x4xf32, #tpu.memory_space<vmem>>, vector<1x8x4xf32>
    %316 = vector.shape_cast %315 : vector<1x8x4xf32> to vector<8x4xf32>
    %317 = arith.mulf %304, %316 : vector<8x4xf32>
    %318 = arith.addf %314, %317 : vector<8x4xf32>
    %c2_120 = arith.constant 2 : index
    %c0_121 = arith.constant 0 : index
    %c0_122 = arith.constant 0 : index
    %319 = vector.load %arg3[%c2_120, %c0_121, %c0_122] : memref<6x8x32xf32, #tpu.memory_space<vmem>>, vector<1x8x32xf32>
    %320 = vector.shape_cast %319 : vector<1x8x32xf32> to vector<8x32xf32>
    %321 = arith.mulf %302, %320 : vector<8x32xf32>
    %c2_123 = arith.constant 2 : index
    %c0_124 = arith.constant 0 : index
    %c0_125 = arith.constant 0 : index
    %322 = vector.load %arg4[%c2_123, %c0_124, %c0_125] : memref<6x8x32xf32, #tpu.memory_space<vmem>>, vector<1x8x32xf32>
    %323 = vector.shape_cast %322 : vector<1x8x32xf32> to vector<8x32xf32>
    %324 = arith.mulf %309, %323 : vector<8x32xf32>
    %325 = arith.addf %321, %324 : vector<8x32xf32>
    %326 = tpu.concatenate %318, %325 in 1 : vector<8x4xf32>, vector<8x32xf32> -> vector<8x36xf32>
    %cst_126 = arith.constant dense<0.000000e+00> : vector<8x64xf32>
    %327 = tpu.matmul %326, %7, %cst_126 {dimension_numbers = #tpu.dot_dimension_numbers<[1], [0], [0], [1], [0, 0, 1, 1], [], []>} : vector<8x36xf32>, vector<36x64xf32>, vector<8x64xf32> -> vector<8x64xf32>
    %328 = vector.extract_strided_slice %327 {offsets = [0, 0], sizes = [8, 32], strides = [1, 1]} : vector<8x64xf32> to vector<8x32xf32>
    %329 = vector.broadcast %1 : vector<1x32xf32> to vector<8x32xf32>
    %330 = arith.addf %328, %329 : vector<8x32xf32>
    %331 = vector.extract_strided_slice %327 {offsets = [0, 32], sizes = [8, 32], strides = [1, 1]} : vector<8x64xf32> to vector<8x32xf32>
    %c2_127 = arith.constant 2 : index
    %c0_128 = arith.constant 0 : index
    %c0_129 = arith.constant 0 : index
    %332 = vector.load %arg5[%c2_127, %c0_128, %c0_129] : memref<6x8x1xf32, #tpu.memory_space<vmem>>, vector<1x8x1xf32>
    %333 = vector.shape_cast %332 : vector<1x8x1xf32> to vector<8x1xf32>
    %cst_130 = arith.constant 0.000000e+00 : f32
    %334 = vector.broadcast %cst_130 : f32 to vector<8x1xf32>
    %335 = arith.cmpf ogt, %333, %334 : vector<8x1xf32>
    %336 = vector.shape_cast %335 : vector<8x1xi1> to vector<8x1xi1>
    %337 = vector.broadcast %336 : vector<8x1xi1> to vector<8x32xi1>
    %338 = arith.select %337, %302, %230 : vector<8x32xi1>, vector<8x32xf32>
    %cst_131 = arith.constant 0.000000e+00 : f32
    %339 = vector.broadcast %cst_131 : f32 to vector<8x32xf32>
    %cst_132 = arith.constant 0.000000e+00 : f32
    %340 = vector.broadcast %cst_132 : f32 to vector<8x32xf32>
    %341 = arith.maximumf %330, %340 : vector<8x32xf32>
    %342 = tpu.concatenate %302, %318, %341 in 1 : vector<8x32xf32>, vector<8x4xf32>, vector<8x32xf32> -> vector<8x68xf32>
    %cst_133 = arith.constant dense<0.000000e+00> : vector<8x64xf32>
    %343 = tpu.matmul %342, %0, %cst_133 {dimension_numbers = #tpu.dot_dimension_numbers<[1], [0], [0], [1], [0, 0, 1, 1], [], []>} : vector<8x68xf32>, vector<68x64xf32>, vector<8x64xf32> -> vector<8x64xf32>
    %344 = vector.extract_strided_slice %343 {offsets = [0, 32], sizes = [8, 32], strides = [1, 1]} : vector<8x64xf32> to vector<8x32xf32>
    %345 = vector.broadcast %2 : vector<1x32xf32> to vector<8x32xf32>
    %346 = arith.addf %344, %345 : vector<8x32xf32>
    %cst_134 = arith.constant 0.000000e+00 : f32
    %347 = vector.broadcast %cst_134 : f32 to vector<8x32xf32>
    %348 = arith.maximumf %346, %347 : vector<8x32xf32>
    %cst_135 = arith.constant dense<0.000000e+00> : vector<8x36xf32>
    %349 = tpu.matmul %348, %3, %cst_135 {dimension_numbers = #tpu.dot_dimension_numbers<[1], [0], [0], [1], [0, 0, 1, 1], [], []>} : vector<8x32xf32>, vector<32x36xf32>, vector<8x36xf32> -> vector<8x36xf32>
    %350 = vector.broadcast %4 : vector<1x36xf32> to vector<8x36xf32>
    %351 = arith.addf %349, %350 : vector<8x36xf32>
    %352 = vector.extract_strided_slice %343 {offsets = [0, 0], sizes = [8, 32], strides = [1, 1]} : vector<8x64xf32> to vector<8x32xf32>
    %353 = arith.addf %302, %352 : vector<8x32xf32>
    %354 = vector.extract_strided_slice %351 {offsets = [0, 0], sizes = [8, 32], strides = [1, 1]} : vector<8x36xf32> to vector<8x32xf32>
    %355 = arith.addf %330, %354 : vector<8x32xf32>
    %356 = vector.extract_strided_slice %351 {offsets = [0, 32], sizes = [8, 4], strides = [1, 1]} : vector<8x36xf32> to vector<8x4xf32>
    %357 = arith.addf %318, %356 : vector<8x4xf32>
    %358 = arith.addf %339, %348 : vector<8x32xf32>
    %cst_136 = arith.constant 0.000000e+00 : f32
    %359 = vector.broadcast %cst_136 : f32 to vector<8x32xf32>
    %360 = arith.maximumf %355, %359 : vector<8x32xf32>
    %361 = tpu.concatenate %353, %357, %360 in 1 : vector<8x32xf32>, vector<8x4xf32>, vector<8x32xf32> -> vector<8x68xf32>
    %cst_137 = arith.constant dense<0.000000e+00> : vector<8x64xf32>
    %362 = tpu.matmul %361, %0, %cst_137 {dimension_numbers = #tpu.dot_dimension_numbers<[1], [0], [0], [1], [0, 0, 1, 1], [], []>} : vector<8x68xf32>, vector<68x64xf32>, vector<8x64xf32> -> vector<8x64xf32>
    %363 = vector.extract_strided_slice %362 {offsets = [0, 32], sizes = [8, 32], strides = [1, 1]} : vector<8x64xf32> to vector<8x32xf32>
    %364 = vector.broadcast %2 : vector<1x32xf32> to vector<8x32xf32>
    %365 = arith.addf %363, %364 : vector<8x32xf32>
    %cst_138 = arith.constant 0.000000e+00 : f32
    %366 = vector.broadcast %cst_138 : f32 to vector<8x32xf32>
    %367 = arith.maximumf %365, %366 : vector<8x32xf32>
    %cst_139 = arith.constant dense<0.000000e+00> : vector<8x36xf32>
    %368 = tpu.matmul %367, %3, %cst_139 {dimension_numbers = #tpu.dot_dimension_numbers<[1], [0], [0], [1], [0, 0, 1, 1], [], []>} : vector<8x32xf32>, vector<32x36xf32>, vector<8x36xf32> -> vector<8x36xf32>
    %369 = vector.broadcast %4 : vector<1x36xf32> to vector<8x36xf32>
    %370 = arith.addf %368, %369 : vector<8x36xf32>
    %371 = vector.extract_strided_slice %362 {offsets = [0, 0], sizes = [8, 32], strides = [1, 1]} : vector<8x64xf32> to vector<8x32xf32>
    %372 = arith.addf %353, %371 : vector<8x32xf32>
    %373 = vector.extract_strided_slice %370 {offsets = [0, 0], sizes = [8, 32], strides = [1, 1]} : vector<8x36xf32> to vector<8x32xf32>
    %374 = arith.addf %355, %373 : vector<8x32xf32>
    %375 = vector.extract_strided_slice %370 {offsets = [0, 32], sizes = [8, 4], strides = [1, 1]} : vector<8x36xf32> to vector<8x4xf32>
    %376 = arith.addf %357, %375 : vector<8x4xf32>
    %377 = arith.addf %358, %367 : vector<8x32xf32>
    %cst_140 = arith.constant 0.000000e+00 : f32
    %378 = vector.broadcast %cst_140 : f32 to vector<8x32xf32>
    %379 = arith.maximumf %374, %378 : vector<8x32xf32>
    %380 = tpu.concatenate %372, %376, %379 in 1 : vector<8x32xf32>, vector<8x4xf32>, vector<8x32xf32> -> vector<8x68xf32>
    %cst_141 = arith.constant dense<0.000000e+00> : vector<8x64xf32>
    %381 = tpu.matmul %380, %0, %cst_141 {dimension_numbers = #tpu.dot_dimension_numbers<[1], [0], [0], [1], [0, 0, 1, 1], [], []>} : vector<8x68xf32>, vector<68x64xf32>, vector<8x64xf32> -> vector<8x64xf32>
    %382 = vector.extract_strided_slice %381 {offsets = [0, 32], sizes = [8, 32], strides = [1, 1]} : vector<8x64xf32> to vector<8x32xf32>
    %383 = vector.broadcast %2 : vector<1x32xf32> to vector<8x32xf32>
    %384 = arith.addf %382, %383 : vector<8x32xf32>
    %cst_142 = arith.constant 0.000000e+00 : f32
    %385 = vector.broadcast %cst_142 : f32 to vector<8x32xf32>
    %386 = arith.maximumf %384, %385 : vector<8x32xf32>
    %cst_143 = arith.constant dense<0.000000e+00> : vector<8x36xf32>
    %387 = tpu.matmul %386, %3, %cst_143 {dimension_numbers = #tpu.dot_dimension_numbers<[1], [0], [0], [1], [0, 0, 1, 1], [], []>} : vector<8x32xf32>, vector<32x36xf32>, vector<8x36xf32> -> vector<8x36xf32>
    %388 = vector.broadcast %4 : vector<1x36xf32> to vector<8x36xf32>
    %389 = arith.addf %387, %388 : vector<8x36xf32>
    %390 = vector.extract_strided_slice %381 {offsets = [0, 0], sizes = [8, 32], strides = [1, 1]} : vector<8x64xf32> to vector<8x32xf32>
    %391 = arith.addf %372, %390 : vector<8x32xf32>
    %392 = vector.extract_strided_slice %389 {offsets = [0, 0], sizes = [8, 32], strides = [1, 1]} : vector<8x36xf32> to vector<8x32xf32>
    %393 = arith.addf %374, %392 : vector<8x32xf32>
    %394 = vector.extract_strided_slice %389 {offsets = [0, 32], sizes = [8, 4], strides = [1, 1]} : vector<8x36xf32> to vector<8x4xf32>
    %395 = arith.addf %376, %394 : vector<8x4xf32>
    %396 = arith.addf %377, %386 : vector<8x32xf32>
    %cst_144 = arith.constant 0.000000e+00 : f32
    %397 = vector.broadcast %cst_144 : f32 to vector<8x32xf32>
    %398 = arith.maximumf %393, %397 : vector<8x32xf32>
    %399 = tpu.concatenate %391, %395, %398 in 1 : vector<8x32xf32>, vector<8x4xf32>, vector<8x32xf32> -> vector<8x68xf32>
    %cst_145 = arith.constant dense<0.000000e+00> : vector<8x64xf32>
    %400 = tpu.matmul %399, %0, %cst_145 {dimension_numbers = #tpu.dot_dimension_numbers<[1], [0], [0], [1], [0, 0, 1, 1], [], []>} : vector<8x68xf32>, vector<68x64xf32>, vector<8x64xf32> -> vector<8x64xf32>
    %401 = vector.extract_strided_slice %400 {offsets = [0, 32], sizes = [8, 32], strides = [1, 1]} : vector<8x64xf32> to vector<8x32xf32>
    %402 = vector.broadcast %2 : vector<1x32xf32> to vector<8x32xf32>
    %403 = arith.addf %401, %402 : vector<8x32xf32>
    %cst_146 = arith.constant 0.000000e+00 : f32
    %404 = vector.broadcast %cst_146 : f32 to vector<8x32xf32>
    %405 = arith.maximumf %403, %404 : vector<8x32xf32>
    %cst_147 = arith.constant dense<0.000000e+00> : vector<8x36xf32>
    %406 = tpu.matmul %405, %3, %cst_147 {dimension_numbers = #tpu.dot_dimension_numbers<[1], [0], [0], [1], [0, 0, 1, 1], [], []>} : vector<8x32xf32>, vector<32x36xf32>, vector<8x36xf32> -> vector<8x36xf32>
    %407 = vector.broadcast %4 : vector<1x36xf32> to vector<8x36xf32>
    %408 = arith.addf %406, %407 : vector<8x36xf32>
    %409 = vector.extract_strided_slice %400 {offsets = [0, 0], sizes = [8, 32], strides = [1, 1]} : vector<8x64xf32> to vector<8x32xf32>
    %410 = arith.addf %391, %409 : vector<8x32xf32>
    %411 = vector.extract_strided_slice %408 {offsets = [0, 32], sizes = [8, 4], strides = [1, 1]} : vector<8x36xf32> to vector<8x4xf32>
    %412 = arith.addf %395, %411 : vector<8x4xf32>
    %413 = arith.addf %396, %405 : vector<8x32xf32>
    %cst_148 = arith.constant dense<0.000000e+00> : vector<8x32xf32>
    %414 = tpu.matmul %413, %5, %cst_148 {dimension_numbers = #tpu.dot_dimension_numbers<[1], [0], [0], [1], [0, 0, 1, 1], [], []>} : vector<8x32xf32>, vector<32x32xf32>, vector<8x32xf32> -> vector<8x32xf32>
    %415 = arith.addf %331, %414 : vector<8x32xf32>
    %416 = vector.broadcast %6 : vector<1x32xf32> to vector<8x32xf32>
    %417 = arith.addf %415, %416 : vector<8x32xf32>
    %c3 = arith.constant 3 : index
    %c0_149 = arith.constant 0 : index
    %c0_150 = arith.constant 0 : index
    %418 = vector.load %arg14[%c3, %c0_149, %c0_150] : memref<6x8x4xf32, #tpu.memory_space<vmem>>, vector<1x8x4xf32>
    %419 = vector.shape_cast %418 : vector<1x8x4xf32> to vector<8x4xf32>
    %420 = vector.shape_cast %412 : vector<8x4xf32> to vector<1x8x4xf32>
    tpu.vector_store %arg14[%c3, %c0_149, %c0_150], %420 {strides = array<i32>} : memref<6x8x4xf32, #tpu.memory_space<vmem>>, vector<1x8x4xf32>,
    %c3_151 = arith.constant 3 : index
    %c0_152 = arith.constant 0 : index
    %c0_153 = arith.constant 0 : index
    %421 = vector.load %arg1[%c3_151, %c0_152, %c0_153] : memref<6x8x4xf32, #tpu.memory_space<vmem>>, vector<1x8x4xf32>
    %422 = vector.shape_cast %421 : vector<1x8x4xf32> to vector<8x4xf32>
    %c3_154 = arith.constant 3 : index
    %c0_155 = arith.constant 0 : index
    %c0_156 = arith.constant 0 : index
    %423 = vector.load %arg2[%c3_154, %c0_155, %c0_156] : memref<6x8x4xf32, #tpu.memory_space<vmem>>, vector<1x8x4xf32>
    %424 = vector.shape_cast %423 : vector<1x8x4xf32> to vector<8x4xf32>
    %425 = arith.mulf %412, %424 : vector<8x4xf32>
    %426 = arith.addf %422, %425 : vector<8x4xf32>
    %c3_157 = arith.constant 3 : index
    %c0_158 = arith.constant 0 : index
    %c0_159 = arith.constant 0 : index
    %427 = vector.load %arg3[%c3_157, %c0_158, %c0_159] : memref<6x8x32xf32, #tpu.memory_space<vmem>>, vector<1x8x32xf32>
    %428 = vector.shape_cast %427 : vector<1x8x32xf32> to vector<8x32xf32>
    %429 = arith.mulf %410, %428 : vector<8x32xf32>
    %c3_160 = arith.constant 3 : index
    %c0_161 = arith.constant 0 : index
    %c0_162 = arith.constant 0 : index
    %430 = vector.load %arg4[%c3_160, %c0_161, %c0_162] : memref<6x8x32xf32, #tpu.memory_space<vmem>>, vector<1x8x32xf32>
    %431 = vector.shape_cast %430 : vector<1x8x32xf32> to vector<8x32xf32>
    %432 = arith.mulf %417, %431 : vector<8x32xf32>
    %433 = arith.addf %429, %432 : vector<8x32xf32>
    %434 = tpu.concatenate %426, %433 in 1 : vector<8x4xf32>, vector<8x32xf32> -> vector<8x36xf32>
    %cst_163 = arith.constant dense<0.000000e+00> : vector<8x64xf32>
    %435 = tpu.matmul %434, %7, %cst_163 {dimension_numbers = #tpu.dot_dimension_numbers<[1], [0], [0], [1], [0, 0, 1, 1], [], []>} : vector<8x36xf32>, vector<36x64xf32>, vector<8x64xf32> -> vector<8x64xf32>
    %436 = vector.extract_strided_slice %435 {offsets = [0, 0], sizes = [8, 32], strides = [1, 1]} : vector<8x64xf32> to vector<8x32xf32>
    %437 = vector.broadcast %1 : vector<1x32xf32> to vector<8x32xf32>
    %438 = arith.addf %436, %437 : vector<8x32xf32>
    %439 = vector.extract_strided_slice %435 {offsets = [0, 32], sizes = [8, 32], strides = [1, 1]} : vector<8x64xf32> to vector<8x32xf32>
    %c3_164 = arith.constant 3 : index
    %c0_165 = arith.constant 0 : index
    %c0_166 = arith.constant 0 : index
    %440 = vector.load %arg5[%c3_164, %c0_165, %c0_166] : memref<6x8x1xf32, #tpu.memory_space<vmem>>, vector<1x8x1xf32>
    %441 = vector.shape_cast %440 : vector<1x8x1xf32> to vector<8x1xf32>
    %cst_167 = arith.constant 0.000000e+00 : f32
    %442 = vector.broadcast %cst_167 : f32 to vector<8x1xf32>
    %443 = arith.cmpf ogt, %441, %442 : vector<8x1xf32>
    %444 = vector.shape_cast %443 : vector<8x1xi1> to vector<8x1xi1>
    %445 = vector.broadcast %444 : vector<8x1xi1> to vector<8x32xi1>
    %446 = arith.select %445, %410, %338 : vector<8x32xi1>, vector<8x32xf32>
    %cst_168 = arith.constant 0.000000e+00 : f32
    %447 = vector.broadcast %cst_168 : f32 to vector<8x32xf32>
    %cst_169 = arith.constant 0.000000e+00 : f32
    %448 = vector.broadcast %cst_169 : f32 to vector<8x32xf32>
    %449 = arith.maximumf %438, %448 : vector<8x32xf32>
    %450 = tpu.concatenate %410, %426, %449 in 1 : vector<8x32xf32>, vector<8x4xf32>, vector<8x32xf32> -> vector<8x68xf32>
    %cst_170 = arith.constant dense<0.000000e+00> : vector<8x64xf32>
    %451 = tpu.matmul %450, %0, %cst_170 {dimension_numbers = #tpu.dot_dimension_numbers<[1], [0], [0], [1], [0, 0, 1, 1], [], []>} : vector<8x68xf32>, vector<68x64xf32>, vector<8x64xf32> -> vector<8x64xf32>
    %452 = vector.extract_strided_slice %451 {offsets = [0, 32], sizes = [8, 32], strides = [1, 1]} : vector<8x64xf32> to vector<8x32xf32>
    %453 = vector.broadcast %2 : vector<1x32xf32> to vector<8x32xf32>
    %454 = arith.addf %452, %453 : vector<8x32xf32>
    %cst_171 = arith.constant 0.000000e+00 : f32
    %455 = vector.broadcast %cst_171 : f32 to vector<8x32xf32>
    %456 = arith.maximumf %454, %455 : vector<8x32xf32>
    %cst_172 = arith.constant dense<0.000000e+00> : vector<8x36xf32>
    %457 = tpu.matmul %456, %3, %cst_172 {dimension_numbers = #tpu.dot_dimension_numbers<[1], [0], [0], [1], [0, 0, 1, 1], [], []>} : vector<8x32xf32>, vector<32x36xf32>, vector<8x36xf32> -> vector<8x36xf32>
    %458 = vector.broadcast %4 : vector<1x36xf32> to vector<8x36xf32>
    %459 = arith.addf %457, %458 : vector<8x36xf32>
    %460 = vector.extract_strided_slice %451 {offsets = [0, 0], sizes = [8, 32], strides = [1, 1]} : vector<8x64xf32> to vector<8x32xf32>
    %461 = arith.addf %410, %460 : vector<8x32xf32>
    %462 = vector.extract_strided_slice %459 {offsets = [0, 0], sizes = [8, 32], strides = [1, 1]} : vector<8x36xf32> to vector<8x32xf32>
    %463 = arith.addf %438, %462 : vector<8x32xf32>
    %464 = vector.extract_strided_slice %459 {offsets = [0, 32], sizes = [8, 4], strides = [1, 1]} : vector<8x36xf32> to vector<8x4xf32>
    %465 = arith.addf %426, %464 : vector<8x4xf32>
    %466 = arith.addf %447, %456 : vector<8x32xf32>
    %cst_173 = arith.constant 0.000000e+00 : f32
    %467 = vector.broadcast %cst_173 : f32 to vector<8x32xf32>
    %468 = arith.maximumf %463, %467 : vector<8x32xf32>
    %469 = tpu.concatenate %461, %465, %468 in 1 : vector<8x32xf32>, vector<8x4xf32>, vector<8x32xf32> -> vector<8x68xf32>
    %cst_174 = arith.constant dense<0.000000e+00> : vector<8x64xf32>
    %470 = tpu.matmul %469, %0, %cst_174 {dimension_numbers = #tpu.dot_dimension_numbers<[1], [0], [0], [1], [0, 0, 1, 1], [], []>} : vector<8x68xf32>, vector<68x64xf32>, vector<8x64xf32> -> vector<8x64xf32>
    %471 = vector.extract_strided_slice %470 {offsets = [0, 32], sizes = [8, 32], strides = [1, 1]} : vector<8x64xf32> to vector<8x32xf32>
    %472 = vector.broadcast %2 : vector<1x32xf32> to vector<8x32xf32>
    %473 = arith.addf %471, %472 : vector<8x32xf32>
    %cst_175 = arith.constant 0.000000e+00 : f32
    %474 = vector.broadcast %cst_175 : f32 to vector<8x32xf32>
    %475 = arith.maximumf %473, %474 : vector<8x32xf32>
    %cst_176 = arith.constant dense<0.000000e+00> : vector<8x36xf32>
    %476 = tpu.matmul %475, %3, %cst_176 {dimension_numbers = #tpu.dot_dimension_numbers<[1], [0], [0], [1], [0, 0, 1, 1], [], []>} : vector<8x32xf32>, vector<32x36xf32>, vector<8x36xf32> -> vector<8x36xf32>
    %477 = vector.broadcast %4 : vector<1x36xf32> to vector<8x36xf32>
    %478 = arith.addf %476, %477 : vector<8x36xf32>
    %479 = vector.extract_strided_slice %470 {offsets = [0, 0], sizes = [8, 32], strides = [1, 1]} : vector<8x64xf32> to vector<8x32xf32>
    %480 = arith.addf %461, %479 : vector<8x32xf32>
    %481 = vector.extract_strided_slice %478 {offsets = [0, 0], sizes = [8, 32], strides = [1, 1]} : vector<8x36xf32> to vector<8x32xf32>
    %482 = arith.addf %463, %481 : vector<8x32xf32>
    %483 = vector.extract_strided_slice %478 {offsets = [0, 32], sizes = [8, 4], strides = [1, 1]} : vector<8x36xf32> to vector<8x4xf32>
    %484 = arith.addf %465, %483 : vector<8x4xf32>
    %485 = arith.addf %466, %475 : vector<8x32xf32>
    %cst_177 = arith.constant 0.000000e+00 : f32
    %486 = vector.broadcast %cst_177 : f32 to vector<8x32xf32>
    %487 = arith.maximumf %482, %486 : vector<8x32xf32>
    %488 = tpu.concatenate %480, %484, %487 in 1 : vector<8x32xf32>, vector<8x4xf32>, vector<8x32xf32> -> vector<8x68xf32>
    %cst_178 = arith.constant dense<0.000000e+00> : vector<8x64xf32>
    %489 = tpu.matmul %488, %0, %cst_178 {dimension_numbers = #tpu.dot_dimension_numbers<[1], [0], [0], [1], [0, 0, 1, 1], [], []>} : vector<8x68xf32>, vector<68x64xf32>, vector<8x64xf32> -> vector<8x64xf32>
    %490 = vector.extract_strided_slice %489 {offsets = [0, 32], sizes = [8, 32], strides = [1, 1]} : vector<8x64xf32> to vector<8x32xf32>
    %491 = vector.broadcast %2 : vector<1x32xf32> to vector<8x32xf32>
    %492 = arith.addf %490, %491 : vector<8x32xf32>
    %cst_179 = arith.constant 0.000000e+00 : f32
    %493 = vector.broadcast %cst_179 : f32 to vector<8x32xf32>
    %494 = arith.maximumf %492, %493 : vector<8x32xf32>
    %cst_180 = arith.constant dense<0.000000e+00> : vector<8x36xf32>
    %495 = tpu.matmul %494, %3, %cst_180 {dimension_numbers = #tpu.dot_dimension_numbers<[1], [0], [0], [1], [0, 0, 1, 1], [], []>} : vector<8x32xf32>, vector<32x36xf32>, vector<8x36xf32> -> vector<8x36xf32>
    %496 = vector.broadcast %4 : vector<1x36xf32> to vector<8x36xf32>
    %497 = arith.addf %495, %496 : vector<8x36xf32>
    %498 = vector.extract_strided_slice %489 {offsets = [0, 0], sizes = [8, 32], strides = [1, 1]} : vector<8x64xf32> to vector<8x32xf32>
    %499 = arith.addf %480, %498 : vector<8x32xf32>
    %500 = vector.extract_strided_slice %497 {offsets = [0, 0], sizes = [8, 32], strides = [1, 1]} : vector<8x36xf32> to vector<8x32xf32>
    %501 = arith.addf %482, %500 : vector<8x32xf32>
    %502 = vector.extract_strided_slice %497 {offsets = [0, 32], sizes = [8, 4], strides = [1, 1]} : vector<8x36xf32> to vector<8x4xf32>
    %503 = arith.addf %484, %502 : vector<8x4xf32>
    %504 = arith.addf %485, %494 : vector<8x32xf32>
    %cst_181 = arith.constant 0.000000e+00 : f32
    %505 = vector.broadcast %cst_181 : f32 to vector<8x32xf32>
    %506 = arith.maximumf %501, %505 : vector<8x32xf32>
    %507 = tpu.concatenate %499, %503, %506 in 1 : vector<8x32xf32>, vector<8x4xf32>, vector<8x32xf32> -> vector<8x68xf32>
    %cst_182 = arith.constant dense<0.000000e+00> : vector<8x64xf32>
    %508 = tpu.matmul %507, %0, %cst_182 {dimension_numbers = #tpu.dot_dimension_numbers<[1], [0], [0], [1], [0, 0, 1, 1], [], []>} : vector<8x68xf32>, vector<68x64xf32>, vector<8x64xf32> -> vector<8x64xf32>
    %509 = vector.extract_strided_slice %508 {offsets = [0, 32], sizes = [8, 32], strides = [1, 1]} : vector<8x64xf32> to vector<8x32xf32>
    %510 = vector.broadcast %2 : vector<1x32xf32> to vector<8x32xf32>
    %511 = arith.addf %509, %510 : vector<8x32xf32>
    %cst_183 = arith.constant 0.000000e+00 : f32
    %512 = vector.broadcast %cst_183 : f32 to vector<8x32xf32>
    %513 = arith.maximumf %511, %512 : vector<8x32xf32>
    %cst_184 = arith.constant dense<0.000000e+00> : vector<8x36xf32>
    %514 = tpu.matmul %513, %3, %cst_184 {dimension_numbers = #tpu.dot_dimension_numbers<[1], [0], [0], [1], [0, 0, 1, 1], [], []>} : vector<8x32xf32>, vector<32x36xf32>, vector<8x36xf32> -> vector<8x36xf32>
    %515 = vector.broadcast %4 : vector<1x36xf32> to vector<8x36xf32>
    %516 = arith.addf %514, %515 : vector<8x36xf32>
    %517 = vector.extract_strided_slice %508 {offsets = [0, 0], sizes = [8, 32], strides = [1, 1]} : vector<8x64xf32> to vector<8x32xf32>
    %518 = arith.addf %499, %517 : vector<8x32xf32>
    %519 = vector.extract_strided_slice %516 {offsets = [0, 32], sizes = [8, 4], strides = [1, 1]} : vector<8x36xf32> to vector<8x4xf32>
    %520 = arith.addf %503, %519 : vector<8x4xf32>
    %521 = arith.addf %504, %513 : vector<8x32xf32>
    %cst_185 = arith.constant dense<0.000000e+00> : vector<8x32xf32>
    %522 = tpu.matmul %521, %5, %cst_185 {dimension_numbers = #tpu.dot_dimension_numbers<[1], [0], [0], [1], [0, 0, 1, 1], [], []>} : vector<8x32xf32>, vector<32x32xf32>, vector<8x32xf32> -> vector<8x32xf32>
    %523 = arith.addf %439, %522 : vector<8x32xf32>
    %524 = vector.broadcast %6 : vector<1x32xf32> to vector<8x32xf32>
    %525 = arith.addf %523, %524 : vector<8x32xf32>
    %c4 = arith.constant 4 : index
    %c0_186 = arith.constant 0 : index
    %c0_187 = arith.constant 0 : index
    %526 = vector.load %arg14[%c4, %c0_186, %c0_187] : memref<6x8x4xf32, #tpu.memory_space<vmem>>, vector<1x8x4xf32>
    %527 = vector.shape_cast %526 : vector<1x8x4xf32> to vector<8x4xf32>
    %528 = vector.shape_cast %520 : vector<8x4xf32> to vector<1x8x4xf32>
    tpu.vector_store %arg14[%c4, %c0_186, %c0_187], %528 {strides = array<i32>} : memref<6x8x4xf32, #tpu.memory_space<vmem>>, vector<1x8x4xf32>,
    %c4_188 = arith.constant 4 : index
    %c0_189 = arith.constant 0 : index
    %c0_190 = arith.constant 0 : index
    %529 = vector.load %arg1[%c4_188, %c0_189, %c0_190] : memref<6x8x4xf32, #tpu.memory_space<vmem>>, vector<1x8x4xf32>
    %530 = vector.shape_cast %529 : vector<1x8x4xf32> to vector<8x4xf32>
    %c4_191 = arith.constant 4 : index
    %c0_192 = arith.constant 0 : index
    %c0_193 = arith.constant 0 : index
    %531 = vector.load %arg2[%c4_191, %c0_192, %c0_193] : memref<6x8x4xf32, #tpu.memory_space<vmem>>, vector<1x8x4xf32>
    %532 = vector.shape_cast %531 : vector<1x8x4xf32> to vector<8x4xf32>
    %533 = arith.mulf %520, %532 : vector<8x4xf32>
    %534 = arith.addf %530, %533 : vector<8x4xf32>
    %c4_194 = arith.constant 4 : index
    %c0_195 = arith.constant 0 : index
    %c0_196 = arith.constant 0 : index
    %535 = vector.load %arg3[%c4_194, %c0_195, %c0_196] : memref<6x8x32xf32, #tpu.memory_space<vmem>>, vector<1x8x32xf32>
    %536 = vector.shape_cast %535 : vector<1x8x32xf32> to vector<8x32xf32>
    %537 = arith.mulf %518, %536 : vector<8x32xf32>
    %c4_197 = arith.constant 4 : index
    %c0_198 = arith.constant 0 : index
    %c0_199 = arith.constant 0 : index
    %538 = vector.load %arg4[%c4_197, %c0_198, %c0_199] : memref<6x8x32xf32, #tpu.memory_space<vmem>>, vector<1x8x32xf32>
    %539 = vector.shape_cast %538 : vector<1x8x32xf32> to vector<8x32xf32>
    %540 = arith.mulf %525, %539 : vector<8x32xf32>
    %541 = arith.addf %537, %540 : vector<8x32xf32>
    %542 = tpu.concatenate %534, %541 in 1 : vector<8x4xf32>, vector<8x32xf32> -> vector<8x36xf32>
    %cst_200 = arith.constant dense<0.000000e+00> : vector<8x64xf32>
    %543 = tpu.matmul %542, %7, %cst_200 {dimension_numbers = #tpu.dot_dimension_numbers<[1], [0], [0], [1], [0, 0, 1, 1], [], []>} : vector<8x36xf32>, vector<36x64xf32>, vector<8x64xf32> -> vector<8x64xf32>
    %544 = vector.extract_strided_slice %543 {offsets = [0, 0], sizes = [8, 32], strides = [1, 1]} : vector<8x64xf32> to vector<8x32xf32>
    %545 = vector.broadcast %1 : vector<1x32xf32> to vector<8x32xf32>
    %546 = arith.addf %544, %545 : vector<8x32xf32>
    %547 = vector.extract_strided_slice %543 {offsets = [0, 32], sizes = [8, 32], strides = [1, 1]} : vector<8x64xf32> to vector<8x32xf32>
    %c4_201 = arith.constant 4 : index
    %c0_202 = arith.constant 0 : index
    %c0_203 = arith.constant 0 : index
    %548 = vector.load %arg5[%c4_201, %c0_202, %c0_203] : memref<6x8x1xf32, #tpu.memory_space<vmem>>, vector<1x8x1xf32>
    %549 = vector.shape_cast %548 : vector<1x8x1xf32> to vector<8x1xf32>
    %cst_204 = arith.constant 0.000000e+00 : f32
    %550 = vector.broadcast %cst_204 : f32 to vector<8x1xf32>
    %551 = arith.cmpf ogt, %549, %550 : vector<8x1xf32>
    %552 = vector.shape_cast %551 : vector<8x1xi1> to vector<8x1xi1>
    %553 = vector.broadcast %552 : vector<8x1xi1> to vector<8x32xi1>
    %554 = arith.select %553, %518, %446 : vector<8x32xi1>, vector<8x32xf32>
    %cst_205 = arith.constant 0.000000e+00 : f32
    %555 = vector.broadcast %cst_205 : f32 to vector<8x32xf32>
    %cst_206 = arith.constant 0.000000e+00 : f32
    %556 = vector.broadcast %cst_206 : f32 to vector<8x32xf32>
    %557 = arith.maximumf %546, %556 : vector<8x32xf32>
    %558 = tpu.concatenate %518, %534, %557 in 1 : vector<8x32xf32>, vector<8x4xf32>, vector<8x32xf32> -> vector<8x68xf32>
    %cst_207 = arith.constant dense<0.000000e+00> : vector<8x64xf32>
    %559 = tpu.matmul %558, %0, %cst_207 {dimension_numbers = #tpu.dot_dimension_numbers<[1], [0], [0], [1], [0, 0, 1, 1], [], []>} : vector<8x68xf32>, vector<68x64xf32>, vector<8x64xf32> -> vector<8x64xf32>
    %560 = vector.extract_strided_slice %559 {offsets = [0, 32], sizes = [8, 32], strides = [1, 1]} : vector<8x64xf32> to vector<8x32xf32>
    %561 = vector.broadcast %2 : vector<1x32xf32> to vector<8x32xf32>
    %562 = arith.addf %560, %561 : vector<8x32xf32>
    %cst_208 = arith.constant 0.000000e+00 : f32
    %563 = vector.broadcast %cst_208 : f32 to vector<8x32xf32>
    %564 = arith.maximumf %562, %563 : vector<8x32xf32>
    %cst_209 = arith.constant dense<0.000000e+00> : vector<8x36xf32>
    %565 = tpu.matmul %564, %3, %cst_209 {dimension_numbers = #tpu.dot_dimension_numbers<[1], [0], [0], [1], [0, 0, 1, 1], [], []>} : vector<8x32xf32>, vector<32x36xf32>, vector<8x36xf32> -> vector<8x36xf32>
    %566 = vector.broadcast %4 : vector<1x36xf32> to vector<8x36xf32>
    %567 = arith.addf %565, %566 : vector<8x36xf32>
    %568 = vector.extract_strided_slice %559 {offsets = [0, 0], sizes = [8, 32], strides = [1, 1]} : vector<8x64xf32> to vector<8x32xf32>
    %569 = arith.addf %518, %568 : vector<8x32xf32>
    %570 = vector.extract_strided_slice %567 {offsets = [0, 0], sizes = [8, 32], strides = [1, 1]} : vector<8x36xf32> to vector<8x32xf32>
    %571 = arith.addf %546, %570 : vector<8x32xf32>
    %572 = vector.extract_strided_slice %567 {offsets = [0, 32], sizes = [8, 4], strides = [1, 1]} : vector<8x36xf32> to vector<8x4xf32>
    %573 = arith.addf %534, %572 : vector<8x4xf32>
    %574 = arith.addf %555, %564 : vector<8x32xf32>
    %cst_210 = arith.constant 0.000000e+00 : f32
    %575 = vector.broadcast %cst_210 : f32 to vector<8x32xf32>
    %576 = arith.maximumf %571, %575 : vector<8x32xf32>
    %577 = tpu.concatenate %569, %573, %576 in 1 : vector<8x32xf32>, vector<8x4xf32>, vector<8x32xf32> -> vector<8x68xf32>
    %cst_211 = arith.constant dense<0.000000e+00> : vector<8x64xf32>
    %578 = tpu.matmul %577, %0, %cst_211 {dimension_numbers = #tpu.dot_dimension_numbers<[1], [0], [0], [1], [0, 0, 1, 1], [], []>} : vector<8x68xf32>, vector<68x64xf32>, vector<8x64xf32> -> vector<8x64xf32>
    %579 = vector.extract_strided_slice %578 {offsets = [0, 32], sizes = [8, 32], strides = [1, 1]} : vector<8x64xf32> to vector<8x32xf32>
    %580 = vector.broadcast %2 : vector<1x32xf32> to vector<8x32xf32>
    %581 = arith.addf %579, %580 : vector<8x32xf32>
    %cst_212 = arith.constant 0.000000e+00 : f32
    %582 = vector.broadcast %cst_212 : f32 to vector<8x32xf32>
    %583 = arith.maximumf %581, %582 : vector<8x32xf32>
    %cst_213 = arith.constant dense<0.000000e+00> : vector<8x36xf32>
    %584 = tpu.matmul %583, %3, %cst_213 {dimension_numbers = #tpu.dot_dimension_numbers<[1], [0], [0], [1], [0, 0, 1, 1], [], []>} : vector<8x32xf32>, vector<32x36xf32>, vector<8x36xf32> -> vector<8x36xf32>
    %585 = vector.broadcast %4 : vector<1x36xf32> to vector<8x36xf32>
    %586 = arith.addf %584, %585 : vector<8x36xf32>
    %587 = vector.extract_strided_slice %578 {offsets = [0, 0], sizes = [8, 32], strides = [1, 1]} : vector<8x64xf32> to vector<8x32xf32>
    %588 = arith.addf %569, %587 : vector<8x32xf32>
    %589 = vector.extract_strided_slice %586 {offsets = [0, 0], sizes = [8, 32], strides = [1, 1]} : vector<8x36xf32> to vector<8x32xf32>
    %590 = arith.addf %571, %589 : vector<8x32xf32>
    %591 = vector.extract_strided_slice %586 {offsets = [0, 32], sizes = [8, 4], strides = [1, 1]} : vector<8x36xf32> to vector<8x4xf32>
    %592 = arith.addf %573, %591 : vector<8x4xf32>
    %593 = arith.addf %574, %583 : vector<8x32xf32>
    %cst_214 = arith.constant 0.000000e+00 : f32
    %594 = vector.broadcast %cst_214 : f32 to vector<8x32xf32>
    %595 = arith.maximumf %590, %594 : vector<8x32xf32>
    %596 = tpu.concatenate %588, %592, %595 in 1 : vector<8x32xf32>, vector<8x4xf32>, vector<8x32xf32> -> vector<8x68xf32>
    %cst_215 = arith.constant dense<0.000000e+00> : vector<8x64xf32>
    %597 = tpu.matmul %596, %0, %cst_215 {dimension_numbers = #tpu.dot_dimension_numbers<[1], [0], [0], [1], [0, 0, 1, 1], [], []>} : vector<8x68xf32>, vector<68x64xf32>, vector<8x64xf32> -> vector<8x64xf32>
    %598 = vector.extract_strided_slice %597 {offsets = [0, 32], sizes = [8, 32], strides = [1, 1]} : vector<8x64xf32> to vector<8x32xf32>
    %599 = vector.broadcast %2 : vector<1x32xf32> to vector<8x32xf32>
    %600 = arith.addf %598, %599 : vector<8x32xf32>
    %cst_216 = arith.constant 0.000000e+00 : f32
    %601 = vector.broadcast %cst_216 : f32 to vector<8x32xf32>
    %602 = arith.maximumf %600, %601 : vector<8x32xf32>
    %cst_217 = arith.constant dense<0.000000e+00> : vector<8x36xf32>
    %603 = tpu.matmul %602, %3, %cst_217 {dimension_numbers = #tpu.dot_dimension_numbers<[1], [0], [0], [1], [0, 0, 1, 1], [], []>} : vector<8x32xf32>, vector<32x36xf32>, vector<8x36xf32> -> vector<8x36xf32>
    %604 = vector.broadcast %4 : vector<1x36xf32> to vector<8x36xf32>
    %605 = arith.addf %603, %604 : vector<8x36xf32>
    %606 = vector.extract_strided_slice %597 {offsets = [0, 0], sizes = [8, 32], strides = [1, 1]} : vector<8x64xf32> to vector<8x32xf32>
    %607 = arith.addf %588, %606 : vector<8x32xf32>
    %608 = vector.extract_strided_slice %605 {offsets = [0, 0], sizes = [8, 32], strides = [1, 1]} : vector<8x36xf32> to vector<8x32xf32>
    %609 = arith.addf %590, %608 : vector<8x32xf32>
    %610 = vector.extract_strided_slice %605 {offsets = [0, 32], sizes = [8, 4], strides = [1, 1]} : vector<8x36xf32> to vector<8x4xf32>
    %611 = arith.addf %592, %610 : vector<8x4xf32>
    %612 = arith.addf %593, %602 : vector<8x32xf32>
    %cst_218 = arith.constant 0.000000e+00 : f32
    %613 = vector.broadcast %cst_218 : f32 to vector<8x32xf32>
    %614 = arith.maximumf %609, %613 : vector<8x32xf32>
    %615 = tpu.concatenate %607, %611, %614 in 1 : vector<8x32xf32>, vector<8x4xf32>, vector<8x32xf32> -> vector<8x68xf32>
    %cst_219 = arith.constant dense<0.000000e+00> : vector<8x64xf32>
    %616 = tpu.matmul %615, %0, %cst_219 {dimension_numbers = #tpu.dot_dimension_numbers<[1], [0], [0], [1], [0, 0, 1, 1], [], []>} : vector<8x68xf32>, vector<68x64xf32>, vector<8x64xf32> -> vector<8x64xf32>
    %617 = vector.extract_strided_slice %616 {offsets = [0, 32], sizes = [8, 32], strides = [1, 1]} : vector<8x64xf32> to vector<8x32xf32>
    %618 = vector.broadcast %2 : vector<1x32xf32> to vector<8x32xf32>
    %619 = arith.addf %617, %618 : vector<8x32xf32>
    %cst_220 = arith.constant 0.000000e+00 : f32
    %620 = vector.broadcast %cst_220 : f32 to vector<8x32xf32>
    %621 = arith.maximumf %619, %620 : vector<8x32xf32>
    %cst_221 = arith.constant dense<0.000000e+00> : vector<8x36xf32>
    %622 = tpu.matmul %621, %3, %cst_221 {dimension_numbers = #tpu.dot_dimension_numbers<[1], [0], [0], [1], [0, 0, 1, 1], [], []>} : vector<8x32xf32>, vector<32x36xf32>, vector<8x36xf32> -> vector<8x36xf32>
    %623 = vector.broadcast %4 : vector<1x36xf32> to vector<8x36xf32>
    %624 = arith.addf %622, %623 : vector<8x36xf32>
    %625 = vector.extract_strided_slice %616 {offsets = [0, 0], sizes = [8, 32], strides = [1, 1]} : vector<8x64xf32> to vector<8x32xf32>
    %626 = arith.addf %607, %625 : vector<8x32xf32>
    %627 = vector.extract_strided_slice %624 {offsets = [0, 32], sizes = [8, 4], strides = [1, 1]} : vector<8x36xf32> to vector<8x4xf32>
    %628 = arith.addf %611, %627 : vector<8x4xf32>
    %629 = arith.addf %612, %621 : vector<8x32xf32>
    %cst_222 = arith.constant dense<0.000000e+00> : vector<8x32xf32>
    %630 = tpu.matmul %629, %5, %cst_222 {dimension_numbers = #tpu.dot_dimension_numbers<[1], [0], [0], [1], [0, 0, 1, 1], [], []>} : vector<8x32xf32>, vector<32x32xf32>, vector<8x32xf32> -> vector<8x32xf32>
    %631 = arith.addf %547, %630 : vector<8x32xf32>
    %632 = vector.broadcast %6 : vector<1x32xf32> to vector<8x32xf32>
    %633 = arith.addf %631, %632 : vector<8x32xf32>
    %c5 = arith.constant 5 : index
    %c0_223 = arith.constant 0 : index
    %c0_224 = arith.constant 0 : index
    %634 = vector.load %arg14[%c5, %c0_223, %c0_224] : memref<6x8x4xf32, #tpu.memory_space<vmem>>, vector<1x8x4xf32>
    %635 = vector.shape_cast %634 : vector<1x8x4xf32> to vector<8x4xf32>
    %636 = vector.shape_cast %628 : vector<8x4xf32> to vector<1x8x4xf32>
    tpu.vector_store %arg14[%c5, %c0_223, %c0_224], %636 {strides = array<i32>} : memref<6x8x4xf32, #tpu.memory_space<vmem>>, vector<1x8x4xf32>,
    %c5_225 = arith.constant 5 : index
    %c0_226 = arith.constant 0 : index
    %c0_227 = arith.constant 0 : index
    %637 = vector.load %arg1[%c5_225, %c0_226, %c0_227] : memref<6x8x4xf32, #tpu.memory_space<vmem>>, vector<1x8x4xf32>
    %638 = vector.shape_cast %637 : vector<1x8x4xf32> to vector<8x4xf32>
    %c5_228 = arith.constant 5 : index
    %c0_229 = arith.constant 0 : index
    %c0_230 = arith.constant 0 : index
    %639 = vector.load %arg2[%c5_228, %c0_229, %c0_230] : memref<6x8x4xf32, #tpu.memory_space<vmem>>, vector<1x8x4xf32>
    %640 = vector.shape_cast %639 : vector<1x8x4xf32> to vector<8x4xf32>
    %641 = arith.mulf %628, %640 : vector<8x4xf32>
    %642 = arith.addf %638, %641 : vector<8x4xf32>
    %c5_231 = arith.constant 5 : index
    %c0_232 = arith.constant 0 : index
    %c0_233 = arith.constant 0 : index
    %643 = vector.load %arg3[%c5_231, %c0_232, %c0_233] : memref<6x8x32xf32, #tpu.memory_space<vmem>>, vector<1x8x32xf32>
    %644 = vector.shape_cast %643 : vector<1x8x32xf32> to vector<8x32xf32>
    %645 = arith.mulf %626, %644 : vector<8x32xf32>
    %c5_234 = arith.constant 5 : index
    %c0_235 = arith.constant 0 : index
    %c0_236 = arith.constant 0 : index
    %646 = vector.load %arg4[%c5_234, %c0_235, %c0_236] : memref<6x8x32xf32, #tpu.memory_space<vmem>>, vector<1x8x32xf32>
    %647 = vector.shape_cast %646 : vector<1x8x32xf32> to vector<8x32xf32>
    %648 = arith.mulf %633, %647 : vector<8x32xf32>
    %649 = arith.addf %645, %648 : vector<8x32xf32>
    %650 = tpu.concatenate %642, %649 in 1 : vector<8x4xf32>, vector<8x32xf32> -> vector<8x36xf32>
    %cst_237 = arith.constant dense<0.000000e+00> : vector<8x64xf32>
    %651 = tpu.matmul %650, %7, %cst_237 {dimension_numbers = #tpu.dot_dimension_numbers<[1], [0], [0], [1], [0, 0, 1, 1], [], []>} : vector<8x36xf32>, vector<36x64xf32>, vector<8x64xf32> -> vector<8x64xf32>
    %652 = vector.extract_strided_slice %651 {offsets = [0, 32], sizes = [8, 32], strides = [1, 1]} : vector<8x64xf32> to vector<8x32xf32>
    %c5_238 = arith.constant 5 : index
    %c0_239 = arith.constant 0 : index
    %c0_240 = arith.constant 0 : index
    %653 = vector.load %arg5[%c5_238, %c0_239, %c0_240] : memref<6x8x1xf32, #tpu.memory_space<vmem>>, vector<1x8x1xf32>
    %654 = vector.shape_cast %653 : vector<1x8x1xf32> to vector<8x1xf32>
    %cst_241 = arith.constant 0.000000e+00 : f32
    %655 = vector.broadcast %cst_241 : f32 to vector<8x1xf32>
    %656 = arith.cmpf ogt, %654, %655 : vector<8x1xf32>
    %657 = vector.shape_cast %656 : vector<8x1xi1> to vector<8x1xi1>
    %658 = vector.broadcast %657 : vector<8x1xi1> to vector<8x32xi1>
    %659 = arith.select %658, %626, %554 : vector<8x32xi1>, vector<8x32xf32>
    %c0_242 = arith.constant 0 : index
    %c0_243 = arith.constant 0 : index
    %660 = vector.load %arg15[%c0_242, %c0_243] : memref<8x32xf32, #tpu.memory_space<vmem>>, vector<8x32xf32>
    tpu.vector_store %arg15[%c0_242, %c0_243], %626 {strides = array<i32>} : memref<8x32xf32, #tpu.memory_space<vmem>>, vector<8x32xf32>,
    %c0_244 = arith.constant 0 : index
    %c0_245 = arith.constant 0 : index
    %661 = vector.load %arg16[%c0_244, %c0_245] : memref<8x4xf32, #tpu.memory_space<vmem>>, vector<8x4xf32>
    tpu.vector_store %arg16[%c0_244, %c0_245], %642 {strides = array<i32>} : memref<8x4xf32, #tpu.memory_space<vmem>>, vector<8x4xf32>,
    %c0_246 = arith.constant 0 : index
    %c0_247 = arith.constant 0 : index
    %662 = vector.load %arg17[%c0_246, %c0_247] : memref<8x32xf32, #tpu.memory_space<vmem>>, vector<8x32xf32>
    tpu.vector_store %arg17[%c0_246, %c0_247], %652 {strides = array<i32>} : memref<8x32xf32, #tpu.memory_space<vmem>>, vector<8x32xf32>,
    %c0_248 = arith.constant 0 : index
    %c0_249 = arith.constant 0 : index
    %663 = vector.load %arg18[%c0_248, %c0_249] : memref<8x32xf32, #tpu.memory_space<vmem>>, vector<8x32xf32>
    tpu.vector_store %arg18[%c0_248, %c0_249], %659 {strides = array<i32>} : memref<8x32xf32, #tpu.memory_space<vmem>>, vector<8x32xf32>,
    return
  }
  func.func @transform_0(%arg0: i32) -> (i32, i32, i32) {
    %c0_i32 = arith.constant 0 : i32
    %c0_i32_0 = arith.constant 0 : i32
    %c0_i32_1 = arith.constant 0 : i32
    return %c0_i32, %arg0, %c0_i32_0 : i32, i32, i32
  }
  func.func @transform_1(%arg0: i32) -> (i32, i32, i32) {
    %c0_i32 = arith.constant 0 : i32
    %c0_i32_0 = arith.constant 0 : i32
    %c0_i32_1 = arith.constant 0 : i32
    return %c0_i32, %arg0, %c0_i32_0 : i32, i32, i32
  }
  func.func @transform_2(%arg0: i32) -> (i32, i32, i32) {
    %c0_i32 = arith.constant 0 : i32
    %c0_i32_0 = arith.constant 0 : i32
    %c0_i32_1 = arith.constant 0 : i32
    return %c0_i32, %arg0, %c0_i32_0 : i32, i32, i32
  }
  func.func @transform_3(%arg0: i32) -> (i32, i32, i32) {
    %c0_i32 = arith.constant 0 : i32
    %c0_i32_0 = arith.constant 0 : i32
    %c0_i32_1 = arith.constant 0 : i32
    return %c0_i32, %arg0, %c0_i32_0 : i32, i32, i32
  }
  func.func @transform_4(%arg0: i32) -> (i32, i32, i32) {
    %c0_i32 = arith.constant 0 : i32
    %c0_i32_0 = arith.constant 0 : i32
    %c0_i32_1 = arith.constant 0 : i32
    return %c0_i32, %arg0, %c0_i32_0 : i32, i32, i32
  }
  func.func @transform_5(%arg0: i32) -> (i32, i32) {
    %c0_i32 = arith.constant 0 : i32
    %c0_i32_0 = arith.constant 0 : i32
    %c0_i32_1 = arith.constant 0 : i32
    return %c0_i32, %c0_i32_0 : i32, i32
  }
  func.func @transform_6(%arg0: i32) -> (i32, i32) {
    %c0_i32 = arith.constant 0 : i32
    %c0_i32_0 = arith.constant 0 : i32
    %c0_i32_1 = arith.constant 0 : i32
    return %c0_i32, %c0_i32_0 : i32, i32
  }
  func.func @transform_7(%arg0: i32) -> (i32, i32) {
    %c0_i32 = arith.constant 0 : i32
    %c0_i32_0 = arith.constant 0 : i32
    %c0_i32_1 = arith.constant 0 : i32
    return %c0_i32, %c0_i32_0 : i32, i32
  }
  func.func @transform_8(%arg0: i32) -> (i32, i32) {
    %c0_i32 = arith.constant 0 : i32
    %c0_i32_0 = arith.constant 0 : i32
    %c0_i32_1 = arith.constant 0 : i32
    return %c0_i32, %c0_i32_0 : i32, i32
  }
  func.func @transform_9(%arg0: i32) -> (i32, i32) {
    %c0_i32 = arith.constant 0 : i32
    %c0_i32_0 = arith.constant 0 : i32
    %c0_i32_1 = arith.constant 0 : i32
    return %c0_i32, %c0_i32_0 : i32, i32
  }
  func.func @transform_10(%arg0: i32) -> (i32, i32) {
    %c0_i32 = arith.constant 0 : i32
    %c0_i32_0 = arith.constant 0 : i32
    %c0_i32_1 = arith.constant 0 : i32
    return %c0_i32, %c0_i32_0 : i32, i32
  }
  func.func @transform_11(%arg0: i32) -> (i32, i32) {
    %c0_i32 = arith.constant 0 : i32
    %c0_i32_0 = arith.constant 0 : i32
    %c0_i32_1 = arith.constant 0 : i32
    return %c0_i32, %c0_i32_0 : i32, i32
  }
  func.func @transform_12(%arg0: i32) -> (i32, i32) {
    %c0_i32 = arith.constant 0 : i32
    %c0_i32_0 = arith.constant 0 : i32
    %c0_i32_1 = arith.constant 0 : i32
    return %c0_i32, %c0_i32_0 : i32, i32
  }
  func.func @transform_13(%arg0: i32) -> (i32, i32, i32) {
    %c0_i32 = arith.constant 0 : i32
    %c0_i32_0 = arith.constant 0 : i32
    %c0_i32_1 = arith.constant 0 : i32
    return %c0_i32, %arg0, %c0_i32_0 : i32, i32, i32
  }
  func.func @transform_14(%arg0: i32) -> (i32, i32) {
    %c0_i32 = arith.constant 0 : i32
    %c0_i32_0 = arith.constant 0 : i32
    return %arg0, %c0_i32 : i32, i32
  }
  func.func @transform_15(%arg0: i32) -> (i32, i32) {
    %c0_i32 = arith.constant 0 : i32
    %c0_i32_0 = arith.constant 0 : i32
    return %arg0, %c0_i32 : i32, i32
  }
  func.func @transform_16(%arg0: i32) -> (i32, i32) {
    %c0_i32 = arith.constant 0 : i32
    %c0_i32_0 = arith.constant 0 : i32
    return %arg0, %c0_i32 : i32, i32
  }
  func.func @transform_17(%arg0: i32) -> (i32, i32) {
    %c0_i32 = arith.constant 0 : i32
    %c0_i32_0 = arith.constant 0 : i32
    return %arg0, %c0_i32 : i32, i32
  }
}

</mosaic_0001>

<bundles_post_ra>
// kernel: tpu_custom_call.1
= control target key start
LH: loop header
LB: loop body
LE: loop exit
PB: predicated region body
PF: predicated region fallthrough
CT: control target
= control target key end

     0   :  { %s3820_s0 = inlined_call_operand.vmem [shape: f32[6,8,4], index: 0, kind: input, shape index: {}]   ;;  %s3821_s1 = inlined_call_operand.vmem [shape: f32[6,8,4], index: 1, kind: input, shape index: {}]   ;;  %s3822_s2 = inlined_call_operand.vmem [shape: f32[6,8,32], index: 2, kind: input, shape index: {}]   ;;  %s3823_s3 = inlined_call_operand.vmem [shape: f32[6,8,32], index: 3, kind: input, shape index: {}]   ;;  %s3824_s4 = inlined_call_operand.vmem [shape: f32[6,8,1], index: 4, kind: input, shape index: {}]   ;;  %s3825_s5 = inlined_call_operand.vmem [shape: f32[68,64], index: 5, kind: input, shape index: {}]   ;;  %s3826_s6 = inlined_call_operand.vmem [shape: f32[1,32], index: 6, kind: input, shape index: {}]   ;;  %s3827_s7 = inlined_call_operand.vmem [shape: f32[1,32], index: 7, kind: input, shape index: {}]   ;;  %s3828_s8 = inlined_call_operand.vmem [shape: f32[32,36], index: 8, kind: input, shape index: {}]   ;;  %s3829_s9 = inlined_call_operand.vmem [shape: f32[1,36], index: 9, kind: input, shape index: {}]   ;;  %s3830_s10 = inlined_call_operand.vmem [shape: f32[32,32], index: 10, kind: input, shape index: {}]   ;;  %s3831_s11 = inlined_call_operand.vmem [shape: f32[1,32], index: 11, kind: input, shape index: {}]   ;;  %s3832_s12 = inlined_call_operand.vmem [shape: f32[36,64], index: 12, kind: input, shape index: {}]   ;;  %s3833_s13 = inlined_call_operand.vmem [shape: f32[6,8,4], index: 13, kind: output, shape index: {0}]   ;;  %s3834_s14 = inlined_call_operand.hbm [shape: f32[8,32], index: 14, kind: output, shape index: {1}]   ;;  %s3835_s15 = inlined_call_operand.vmem [shape: f32[8,4], index: 15, kind: output, shape index: {2}]   ;;  %s3836_s16 = inlined_call_operand.hbm [shape: f32[8,32], index: 16, kind: output, shape index: {3}]   ;;  %s3837_s17 = inlined_call_operand.hbm [shape: f32[8,32], index: 17, kind: output, shape index: {4}]  }
   0x1   :  { %3840 = sst [smem:[#allocation9_spill]] %s3820_s0 }
   0x2   :  { %3841 = sst [smem:[#allocation10_spill]] %s3821_s1 }
   0x3   :  { %23 = vsyncpa [#allocation3], 0  ;;  %v2665_v0 = vld [vmem:[%s3826_s6] ss:$0 sm:$0xff]  ;;  %vm92_vm0 = vcmask 1043456   ;;  %v2675_v2 = vld [vmem:[%s3825_s5 + $0x38] sm:$0xff] }
   0x4   :  { %v2670_v1 = vld [vmem:[%s3825_s5 + $0x40] sm:$0xf]  ;;  %v81_v3 = vmax.f32 %v2665_v0, 0.0  ;;  %v2685_v4 = vld [vmem:[%s3825_s5 + $0x30] sm:$0xff]  ;;  %s2564_s18 = smov 36  }
   0x5   :  { %2329 = vmatpush.msk.msra.mxu0 %vm92_vm0, %v2670_v1  ;;  %2332 = vmatpush.msk.msra.mxu2 %vm92_vm0, %v2670_v1 }
   0x6   :  { %83 = vrot.lane.b32.xlu0 %v81_v3, %s2564_s18 }
   0x7   :  { %104 = vmatpush.msra.mxu0 %v2675_v2 }
   0x8   :  { %24 = vsyncpa [#allocation5], 0  ;;  %v2692_v5 = vld [vmem:[%s3825_s5 + $0x28] sm:$0xff]  ;;  %174 = vmatpush.msra.mxu2 %v2675_v2  ;;  %v2699_v6 = vld [vmem:[%s3825_s5 + $0x20] sm:$0xff]  ;;  %s2565_s19 = smov 32   ;;  %vm86_vm1 = vcmask 293888  }
   0x9   :  { %105 = vmatpush.msra.mxu0 %v2685_v4  ;;  %v2706_v7 = vld [vmem:[%s3825_s5 + $0x18] sm:$0xff]  ;;  %v2713_v8 = vld [vmem:[%s3825_s5 + $0x10] sm:$0xff]  ;;  %v2720_v9 = vld [vmem:[%s3825_s5 + $0x8] sm:$0xff]  ;;  %vm88_vm2 = vcmask 556032   ;;  %s2566_s26 = smov 96   ;;  %vm129_vm3 = vcmask 261120  }
   0xa   :  { %175 = vmatpush.msra.mxu2 %v2685_v4  ;;  %v2730_v10 = vld [vmem:[%s3825_s5] sm:$0xff]  ;;  %v2743_v14 = vld [vmem:[%s3828_s8 + $0x18] sm:$0xff]  ;;  %v2748_v15 = vld [vmem:[%s3828_s8 + $0x10] sm:$0xff]  ;;  %s3842_s25 = sld [smem:[#allocation10_spill]]  ;;  %s2567_s20 = smov 4   ;;  %vm370_vm4 = vcmask 31744  }
   0xb   :  { %106 = vmatpush.msra.mxu0 %v2692_v5  ;;  %v2461_v11 = vld [vmem:[%s3827_s7] ss:$0 sm:$0xff]  ;;  %144 = vmatpush.msra.mxu1 %v2743_v14  ;;  %v2755_v16 = vld [vmem:[%s3828_s8 + $0x8] sm:$0xff]  ;;  %v2862_v59 = vld [vmem:[%s3830_s10 + $0x18] sm:$0xff]  ;;  %s2283_s29 = sshll.u32 %s3834_s14, 4  ;;  %s2569_s0 = smov [#allocation2]   ;;  %s2284_s29 = int_to_ptr.hbm [resolvable:$true] %s2283_s29 }
   0xc   :  { %176 = vmatpush.msra.mxu2 %v2692_v5  ;;  %205 = vmatpush.msra.mxu3 %v2743_v14  ;;  %v2763_v17 = vld [vmem:[%s3828_s8] sm:$0xff]  ;;  %v2867_v60 = vld [vmem:[%s3830_s10 + $0x10] sm:$0xff]  ;;  %v2873_v61 = vld [vmem:[%s3830_s10 + $0x8] sm:$0xff]  ;;  %s2296_s1 = sshll.u32 %s3836_s16, 4  ;;  %s2307_s14 = sshll.u32 %s3837_s17, 4  ;;  %s2297_s1 = int_to_ptr.hbm [resolvable:$true] %s2296_s1  ;;  %s2308_s14 = int_to_ptr.hbm [resolvable:$true] %s2307_s14 }
   0xd   :  { %107 = vmatpush.msra.mxu0 %v2699_v6  ;;  %145 = vmatpush.msra.mxu1 %v2748_v15  ;;  %v2807_v23 = vld [vmem:[%s3829_s9] ss:$0 sm:$0xff] }
   0xe   :  { %177 = vmatpush.msra.mxu2 %v2699_v6  ;;  %118 = vrot.lane.b32.xlu0 %v2461_v11, %s2565_s19  ;;  %v2879_v62 = vld [vmem:[%s3830_s10] sm:$0xff] }
   0xf   :  { %108 = vmatpush.msra.mxu0 %v2706_v7  ;;  %206 = vmatpush.msra.mxu3 %v2748_v15 }
  0x10   :  { %178 = vmatpush.msra.mxu2 %v2706_v7  ;;  %146 = vmatpush.msra.mxu1 %v2755_v16 }
  0x11   :  { %109 = vmatpush.msra.mxu0 %v2713_v8  ;;  %207 = vmatpush.msra.mxu3 %v2755_v16 }
  0x12   :  { %179 = vmatpush.msra.mxu2 %v2713_v8  ;;  %147 = vmatpush.msra.mxu1 %v2763_v17 }
  0x13   :  { %110 = vmatpush.msra.mxu0 %v2720_v9  ;;  %208 = vmatpush.msra.mxu3 %v2763_v17 }
  0x14   :  { %180 = vmatpush.msra.mxu2 %v2720_v9  ;;  %2335 = vmatpush.msk.msrb.mxu1 %vm92_vm0, %v2670_v1 }
  0x15   :  { %111 = vmatpush.msra.mxu0 %v2730_v10  ;;  %266 = vmatpush.msrb.mxu3 %v2743_v14 }
  0x16   :  { %181 = vmatpush.msra.mxu2 %v2730_v10  ;;  %235 = vmatpush.msrb.mxu1 %v2675_v2 }
  0x17   :  { %327 = vmatpush.msrb.mxu0 %v2743_v14  ;;  %267 = vmatpush.msrb.mxu3 %v2748_v15 }
  0x18   :  { %236 = vmatpush.msrb.mxu1 %v2685_v4  ;;  %358 = vmatpush.msrb.mxu2 %v2862_v59 }
  0x19   :  { %328 = vmatpush.msrb.mxu0 %v2748_v15  ;;  %268 = vmatpush.msrb.mxu3 %v2755_v16 }
  0x1a   :  { %237 = vmatpush.msrb.mxu1 %v2692_v5  ;;  %359 = vmatpush.msrb.mxu2 %v2867_v60 }
  0x1b   :  { %329 = vmatpush.msrb.mxu0 %v2755_v16  ;;  %269 = vmatpush.msrb.mxu3 %v2763_v17 }
  0x1c   :  { %238 = vmatpush.msrb.mxu1 %v2699_v6  ;;  %360 = vmatpush.msrb.mxu2 %v2873_v61 }
  0x1d   :  { %330 = vmatpush.msrb.mxu0 %v2763_v17 }
  0x1e   :  { %239 = vmatpush.msrb.mxu1 %v2706_v7  ;;  %361 = vmatpush.msrb.mxu2 %v2879_v62 }
  0x20   :  { %240 = vmatpush.msrb.mxu1 %v2713_v8 }
  0x22   :  { %241 = vmatpush.msrb.mxu1 %v2720_v9 }
  0x24   :  { %242 = vmatpush.msrb.mxu1 %v2730_v10 }
  0x78   :  { %v84_v12 = vpop.permute.xlu0 %83 }
  0x79   :  { %v87_v13 = vsel %vm86_vm1, 0.0, %v84_v12 }
  0x7a   :  { %2330 = vmatmul.msk.f32.vlgmr.msra.gmra.mxu0 %vm88_vm2, %v87_v13  ;;  %v373_v13 = vld [vmem:[%s3842_s25] sm:$0xff] }
  0x80   :  { %v2786_v18 = vpop.permute.xlu0 %118 }
  0xf7   :  { %v113_v19 = vpop.f32.mrf.mxu0 }
  0xf8   :  { %v2789_v20 = vadd.f32 %v2786_v18, %v113_v19 }
  0xfa   :  { %v122_v21 = vmax.f32 %v2789_v20, 0.0 }
  0xfc   :  { %127 = vrot.lane.b32.xlu1 %v122_v21, %s2566_s26 }
 0x16e   :  { %v128_v22 = vpop.permute.xlu1 %127 }
 0x16f   :  { %2331 = vmatmul.msk.f32.vlgmr.msra.gmra.mxu1 %vm129_vm3, %v128_v22 }
 0x170   :  { %2344 = vmatpush.msk.msra.mxu1 %vm92_vm0, %v2670_v1 }
 0x172   :  { %451 = vmatpush.msra.mxu1 %v2675_v2 }
 0x174   :  { %452 = vmatpush.msra.mxu1 %v2685_v4 }
 0x176   :  { %453 = vmatpush.msra.mxu1 %v2692_v5 }
 0x178   :  { %454 = vmatpush.msra.mxu1 %v2699_v6 }
 0x17a   :  { %455 = vmatpush.msra.mxu1 %v2706_v7 }
 0x17c   :  { %456 = vmatpush.msra.mxu1 %v2713_v8 }
 0x17e   :  { %457 = vmatpush.msra.mxu1 %v2720_v9 }
 0x180   :  { %458 = vmatpush.msra.mxu1 %v2730_v10 }
 0x1ec   :  { %v149_v24 = vpop.f32.mrf.mxu1 }
 0x1ed   :  { %v150_v25 = vadd.f32 %v2807_v23, %v149_v24 }
 0x1ef   :  { %v153_v26 = vadd.f32 %v2665_v0, %v150_v25  ;;  %v161_v29 = vsel %vm129_vm3, %v113_v19, %v150_v25 }
 0x1f1   :  { %v156_v27 = vmax.f32 %v153_v26, 0.0 }
 0x1f3   :  { %158 = vrot.lane.b32.xlu1 %v156_v27, %s2564_s18 }
 0x265   :  { %v159_v28 = vpop.permute.xlu1 %158 }
 0x266   :  { %v162_v30 = vsel %vm86_vm1, %v161_v29, %v159_v28 }
 0x267   :  { %2333 = vmatmul.msk.f32.vlgmr.msra.gmra.mxu2 %vm88_vm2, %v162_v30 }
 0x268   :  { %482 = vmatpush.msra.mxu2 %v2743_v14 }
 0x26a   :  { %483 = vmatpush.msra.mxu2 %v2748_v15 }
 0x26c   :  { %484 = vmatpush.msra.mxu2 %v2755_v16 }
 0x26e   :  { %485 = vmatpush.msra.mxu2 %v2763_v17 }
 0x2ea   :  { %v183_v31 = vpop.f32.mrf.mxu2 }
 0x2eb   :  { %v186_v32 = vadd.f32 %v183_v31, %v2786_v18  ;;  %v213_v40 = vadd.f32 %v183_v31, %v113_v19 }
 0x2ed   :  { %v187_v33 = vmax.f32 %v186_v32, 0.0 }
 0x2ef   :  { %189 = vrot.lane.b32.xlu2 %v187_v33, %s2566_s26  ;;  %v216_v46 = vadd.f32 %v187_v33, %v122_v21  ;;  %v2909_v21 = vld [vmem:[%s3831_s11] ss:$0 sm:$0xff]  ;;  %s3843_s11 = sld [smem:[#allocation9_spill]] }
 0x349   :  { %v190_v34 = vpop.permute.xlu2 %189 }
 0x34a   :  { %2334 = vmatmul.msk.f32.vlgmr.msra.gmra.mxu3 %vm129_vm3, %v190_v34 }
 0x34b   :  { %2338 = vmatpush.msk.msra.mxu3 %vm92_vm0, %v2670_v1 }
 0x34d   :  { %296 = vmatpush.msra.mxu3 %v2675_v2 }
 0x34f   :  { %297 = vmatpush.msra.mxu3 %v2685_v4 }
 0x351   :  { %298 = vmatpush.msra.mxu3 %v2692_v5 }
 0x353   :  { %299 = vmatpush.msra.mxu3 %v2699_v6 }
 0x355   :  { %300 = vmatpush.msra.mxu3 %v2706_v7 }
 0x357   :  { %301 = vmatpush.msra.mxu3 %v2713_v8 }
 0x359   :  { %302 = vmatpush.msra.mxu3 %v2720_v9 }
 0x35b   :  { %303 = vmatpush.msra.mxu3 %v2730_v10 }
 0x3cd   :  { %v210_v35 = vpop.f32.mrf.mxu3 }
 0x3ce   :  { %v211_v36 = vadd.f32 %v2807_v23, %v210_v35 }
 0x3d0   :  { %v214_v37 = vadd.f32 %v211_v36, %v153_v26  ;;  %v215_v39 = vadd.f32 %v211_v36, %v150_v25  ;;  %v386_v25 = vld [vmem:[%s3823_s3] sm:$0xff] }
 0x3d1   :  { %v384_v26 = vld [vmem:[%s3822_s2] sm:$0xff] }
 0x3d2   :  { %v217_v38 = vmax.f32 %v214_v37, 0.0  ;;  %v222_v41 = vsel %vm129_vm3, %v213_v40, %v215_v39  ;;  %v2930_v36 = vld [vmem:[%s3832_s12 + $0x20] sm:$0xf] }
 0x3d3   :  { %2342 = vmatpush.msk.msra.mxu0 %vm92_vm0, %v2930_v36 }
 0x3d4   :  { %219 = vrot.lane.b32.xlu2 %v217_v38, %s2564_s18  ;;  %v2943_v38 = vld [vmem:[%s3832_s12 + $0x10] sm:$0xff] }
 0x42e   :  { %v220_v42 = vpop.permute.xlu2 %219 }
 0x42f   :  { %v223_v43 = vsel %vm86_vm1, %v222_v41, %v220_v42  ;;  %v372_v41 = vld [vmem:[%s3843_s11] sm:$0xff] }
 0x430   :  { %2336 = vmatmul.msk.f32.vlgmr.msrb.gmra.mxu1 %vm88_vm2, %v223_v43 }
 0x431   :  { %2353 = vmatpush.msk.msrb.mxu1 %vm92_vm0, %v2670_v1 }
 0x433   :  { %658 = vmatpush.msrb.mxu1 %v2675_v2 }
 0x435   :  { %659 = vmatpush.msrb.mxu1 %v2685_v4 }
 0x437   :  { %660 = vmatpush.msrb.mxu1 %v2692_v5 }
 0x439   :  { %661 = vmatpush.msrb.mxu1 %v2699_v6 }
 0x43b   :  { %662 = vmatpush.msrb.mxu1 %v2706_v7 }
 0x43d   :  { %663 = vmatpush.msrb.mxu1 %v2713_v8 }
 0x43f   :  { %664 = vmatpush.msrb.mxu1 %v2720_v9 }
 0x441   :  { %665 = vmatpush.msrb.mxu1 %v2730_v10 }
 0x4ad   :  { %v244_v44 = vpop.f32.mrf.mxu1 }
 0x4ae   :  { %v247_v45 = vadd.f32 %v244_v44, %v2786_v18  ;;  %v274_v55 = vadd.f32 %v244_v44, %v213_v40  ;;  %v2955_v40 = vld [vmem:[%s3832_s12] sm:$0xff] }
 0x4b0   :  { %v248_v47 = vmax.f32 %v247_v45, 0.0 }
 0x4b2   :  { %v277_v48 = vadd.f32 %v248_v47, %v216_v46  ;;  %250 = vrot.lane.b32.xlu0 %v248_v47, %s2566_s26 }
 0x524   :  { %v251_v49 = vpop.permute.xlu0 %250 }
 0x525   :  { %2337 = vmatmul.msk.f32.vlgmr.msrb.gmra.mxu3 %vm129_vm3, %v251_v49 }
 0x526   :  { %551 = vmatpush.msrb.mxu3 %v2743_v14 }
 0x528   :  { %552 = vmatpush.msrb.mxu3 %v2748_v15 }
 0x52a   :  { %553 = vmatpush.msrb.mxu3 %v2755_v16 }
 0x52c   :  { %554 = vmatpush.msrb.mxu3 %v2763_v17 }
 0x5a8   :  { %v271_v50 = vpop.f32.mrf.mxu3 }
 0x5a9   :  { %v272_v51 = vadd.f32 %v2807_v23, %v271_v50 }
 0x5ab   :  { %v275_v52 = vadd.f32 %v272_v51, %v214_v37  ;;  %v276_v54 = vadd.f32 %v272_v51, %v215_v39  ;;  %v2937_v37 = vld [vmem:[%s3832_s12 + $0x18] sm:$0xff]  ;;  %v2948_v39 = vld [vmem:[%s3832_s12 + $0x8] sm:$0xff] }
 0x5ac   :  { %412 = vmatpush.msra.mxu0 %v2937_v37 }
 0x5ad   :  { %v278_v53 = vmax.f32 %v275_v52, 0.0  ;;  %v283_v56 = vsel %vm129_vm3, %v274_v55, %v276_v54 }
 0x5ae   :  { %413 = vmatpush.msra.mxu0 %v2943_v38 }
 0x5af   :  { %280 = vrot.lane.b32.xlu1 %v278_v53, %s2564_s18 }
 0x5b0   :  { %414 = vmatpush.msra.mxu0 %v2948_v39 }
 0x5b2   :  { %415 = vmatpush.msra.mxu0 %v2955_v40 }
 0x5b7   :  { %375 = vrot.lane.b32.xlu1 %v373_v13, %s2565_s19 }
 0x621   :  { %v281_v57 = vpop.permute.xlu1 %280 }
 0x622   :  { %v284_v58 = vsel %vm86_vm1, %v283_v56, %v281_v57 }
 0x623   :  { %2339 = vmatmul.msk.f32.vlgmr.msra.gmra.mxu3 %vm88_vm2, %v284_v58 }
 0x624   :  { %620 = vmatpush.msra.mxu3 %v2743_v14 }
 0x626   :  { %621 = vmatpush.msra.mxu3 %v2748_v15 }
 0x628   :  { %622 = vmatpush.msra.mxu3 %v2755_v16 }
 0x629   :  { %v376_v33 = vpop.permute.xlu1 %375 }
 0x62a   :  { %623 = vmatpush.msra.mxu3 %v2763_v17 }
 0x6a6   :  { %v305_v63 = vpop.f32.mrf.mxu3 }
 0x6a7   :  { %v308_v3 = vadd.f32 %v305_v63, %v2786_v18  ;;  %v2911_v22 = vadd.f32 %v305_v63, %v274_v55 }
 0x6a9   :  { %v309_v11 = vmax.f32 %v308_v3, 0.0  ;;  %v385_v29 = vmul.f32 %v384_v26, %v2911_v22 }
 0x6ab   :  { %311 = vrot.lane.b32.xlu0 %v309_v11, %s2566_s26  ;;  %v337_v12 = vadd.f32 %v309_v11, %v277_v48 }
 0x6ad   :  { %342 = vrot.lane.b32.xlu2 %v337_v12, %s2566_s26 }
 0x707   :  { %v343_v19 = vpop.permute.xlu2 %342 }
 0x708   :  { %2341 = vmatmul.msk.f32.vlgmr.msrb.gmra.mxu2 %vm129_vm3, %v343_v19 }
 0x709   :  { %2347 = vmatpush.msk.msrb.mxu2 %vm92_vm0, %v2670_v1 }
 0x70b   :  { %520 = vmatpush.msrb.mxu2 %v2675_v2 }
 0x70d   :  { %521 = vmatpush.msrb.mxu2 %v2685_v4 }
 0x70f   :  { %522 = vmatpush.msrb.mxu2 %v2692_v5 }
 0x711   :  { %523 = vmatpush.msrb.mxu2 %v2699_v6 }
 0x713   :  { %524 = vmatpush.msrb.mxu2 %v2706_v7 }
 0x715   :  { %525 = vmatpush.msrb.mxu2 %v2713_v8 }
 0x717   :  { %526 = vmatpush.msrb.mxu2 %v2720_v9 }
 0x719   :  { %527 = vmatpush.msrb.mxu2 %v2730_v10 }
 0x71d   :  { %v312_v20 = vpop.permute.xlu0 %311 }
 0x71e   :  { %2340 = vmatmul.msk.f32.vlgmr.msrb.gmra.mxu0 %vm129_vm3, %v312_v20 }
 0x71f   :  { %2350 = vmatpush.msk.msrb.mxu0 %vm92_vm0, %v2670_v1 }
 0x721   :  { %589 = vmatpush.msrb.mxu0 %v2675_v2 }
 0x723   :  { %590 = vmatpush.msrb.mxu0 %v2685_v4 }
 0x725   :  { %591 = vmatpush.msrb.mxu0 %v2692_v5 }
 0x727   :  { %592 = vmatpush.msrb.mxu0 %v2699_v6 }
 0x729   :  { %593 = vmatpush.msrb.mxu0 %v2706_v7 }
 0x72b   :  { %594 = vmatpush.msrb.mxu0 %v2713_v8 }
 0x72d   :  { %595 = vmatpush.msrb.mxu0 %v2720_v9 }
 0x72f   :  { %596 = vmatpush.msrb.mxu0 %v2730_v10 }
 0x78b   :  { %v363_v24 = vpop.f32.mrf.mxu2 }
 0x78c   :  { %v364_v27 = vadd.f32 %v2909_v21, %v363_v24 }
 0x78e   :  { %v387_v28 = vmul.f32 %v386_v25, %v364_v27 }
 0x790   :  { %v388_v30 = vadd.f32 %v387_v28, %v385_v29 }
 0x792   :  { %390 = vrot.lane.b32.xlu0 %v388_v30, %s2567_s20 }
 0x79b   :  { %v332_v31 = vpop.f32.mrf.mxu0 }
 0x79c   :  { %v333_v32 = vadd.f32 %v2807_v23, %v332_v31 }
 0x79e   :  { %v2923_v34 = vadd.f32 %v333_v32, %v276_v54 }
 0x7a0   :  { %v378_v35 = vmul.f32 %v376_v33, %v2923_v34 }
 0x7a2   :  { %380 = vrot.lane.b32.xlu2 %v378_v35, %s2566_s26 }
 0x7fc   :  { %v381_v42 = vpop.permute.xlu2 %380 }
 0x7fd   :  { %v383_v43 = vadd.f32 %v381_v42, %v372_v41 }
 0x7ff   :  { %431 = vrot.lane.b32.xlu1 %v383_v43, %s2565_s19 }
 0x804   :  { %v391_v44 = vpop.permute.xlu0 %390 }
 0x805   :  { %v393_v45 = vsel %vm370_vm4, %v383_v43, %v391_v44 }
 0x806   :  { %2343 = vmatmul.msk.f32.vlgmr.msra.gmra.mxu0 %vm86_vm1, %v393_v45 }
 0x807   :  { %2362 = vmatpush.msk.msra.mxu0 %vm92_vm0, %v2930_v36 }
 0x809   :  { %781 = vmatpush.msra.mxu0 %v2937_v37 }
 0x80b   :  { %782 = vmatpush.msra.mxu0 %v2943_v38 }
 0x80d   :  { %783 = vmatpush.msra.mxu0 %v2948_v39 }
 0x80f   :  { %784 = vmatpush.msra.mxu0 %v2955_v40 }
 0x871   :  { %v432_v49 = vpop.permute.xlu1 %431 }
 0x872   :  { %v438_v50 = vsel %vm129_vm3, %v2911_v22, %v432_v49 }
 0x883   :  { %v2980_v46 = vpop.f32.mrf.mxu0 }
 0x884   :  { %v420_v47 = vadd.f32 %v2665_v0, %v2980_v46 }
 0x886   :  { %v429_v48 = vmax.f32 %v420_v47, 0.0 }
 0x888   :  { %435 = vrot.lane.b32.xlu2 %v429_v48, %s2564_s18 }
 0x8e2   :  { %v436_v51 = vpop.permute.xlu2 %435 }
 0x8e3   :  { %v439_v52 = vsel %vm86_vm1, %v438_v50, %v436_v51 }
 0x8e4   :  { %2345 = vmatmul.msk.f32.vlgmr.msra.gmra.mxu1 %vm88_vm2, %v439_v52 }
 0x8e5   :  { %2368 = vmatpush.msk.msra.mxu1 %vm92_vm0, %v2670_v1 }
 0x8e7   :  { %890 = vmatpush.msra.mxu1 %v2675_v2 }
 0x8e9   :  { %891 = vmatpush.msra.mxu1 %v2685_v4 }
 0x8eb   :  { %892 = vmatpush.msra.mxu1 %v2692_v5 }
 0x8ed   :  { %893 = vmatpush.msra.mxu1 %v2699_v6 }
 0x8ef   :  { %894 = vmatpush.msra.mxu1 %v2706_v7 }
 0x8f1   :  { %895 = vmatpush.msra.mxu1 %v2713_v8 }
 0x8f3   :  { %896 = vmatpush.msra.mxu1 %v2720_v9 }
 0x8f5   :  { %897 = vmatpush.msra.mxu1 %v2730_v10 }
 0x961   :  { %v460_v53 = vpop.f32.mrf.mxu1 }
 0x962   :  { %v463_v54 = vadd.f32 %v460_v53, %v2786_v18  ;;  %v490_v13 = vadd.f32 %v460_v53, %v2911_v22 }
 0x964   :  { %v464_v55 = vmax.f32 %v463_v54, 0.0 }
 0x966   :  { %466 = vrot.lane.b32.xlu0 %v464_v55, %s2566_s26 }
 0x9d8   :  { %v467_v56 = vpop.permute.xlu0 %466 }
 0x9d9   :  { %2346 = vmatmul.msk.f32.vlgmr.msra.gmra.mxu2 %vm129_vm3, %v467_v56 }
 0x9da   :  { %721 = vmatpush.msra.mxu2 %v2862_v59 }
 0x9dc   :  { %722 = vmatpush.msra.mxu2 %v2867_v60 }
 0x9de   :  { %723 = vmatpush.msra.mxu2 %v2873_v61 }
 0x9e0   :  { %724 = vmatpush.msra.mxu2 %v2879_v62 }
 0xa5c   :  { %v487_v57 = vpop.f32.mrf.mxu2 }
 0xa5d   :  { %v488_v58 = vadd.f32 %v2807_v23, %v487_v57 }
 0xa5f   :  { %v491_v63 = vadd.f32 %v488_v58, %v420_v47  ;;  %493 = vrot.lane.b32.xlu1 %v488_v58, %s2566_s26 }
 0xa61   :  { %v498_v3 = vmax.f32 %v491_v63, 0.0 }
 0xa63   :  { %504 = vrot.lane.b32.xlu0 %v498_v3, %s2564_s18 }
 0xad1   :  { %v494_v11 = vpop.permute.xlu1 %493 }
 0xad2   :  { %v496_v12 = vadd.f32 %v494_v11, %v383_v43 }
 0xad4   :  { %500 = vrot.lane.b32.xlu2 %v496_v12, %s2565_s19 }
 0xad5   :  { %v505_v20 = vpop.permute.xlu0 %504 }
 0xb2e   :  { %v501_v19 = vpop.permute.xlu2 %500 }
 0xb2f   :  { %v507_v24 = vsel %vm129_vm3, %v490_v13, %v501_v19 }
 0xb30   :  { %v508_v25 = vsel %vm86_vm1, %v507_v24, %v505_v20 }
 0xb31   :  { %2348 = vmatmul.msk.f32.vlgmr.msrb.gmra.mxu2 %vm88_vm2, %v508_v25 }
 0xb32   :  { %852 = vmatpush.msrb.mxu2 %v2743_v14 }
 0xb34   :  { %853 = vmatpush.msrb.mxu2 %v2748_v15 }
 0xb36   :  { %854 = vmatpush.msrb.mxu2 %v2755_v16 }
 0xb38   :  { %855 = vmatpush.msrb.mxu2 %v2763_v17 }
 0xbb4   :  { %v529_v26 = vpop.f32.mrf.mxu2 }
 0xbb5   :  { %v532_v27 = vadd.f32 %v529_v26, %v2786_v18  ;;  %v559_v42 = vadd.f32 %v529_v26, %v490_v13 }
 0xbb7   :  { %v533_v28 = vmax.f32 %v532_v27, 0.0  ;;  %v2361_v27 = vld [vmem:[%s3823_s3 + $0x8] sm:$0xff] }
 0xbb9   :  { %535 = vrot.lane.b32.xlu1 %v533_v28, %s2566_s26  ;;  %v566_v50 = vadd.f32 %v533_v28, %v464_v55 }
 0xc2b   :  { %v536_v29 = vpop.permute.xlu1 %535 }
 0xc2c   :  { %2349 = vmatmul.msk.f32.vlgmr.msrb.gmra.mxu3 %vm129_vm3, %v536_v29 }
 0xc2d   :  { %689 = vmatpush.msrb.mxu3 %v2743_v14 }
 0xc2f   :  { %690 = vmatpush.msrb.mxu3 %v2748_v15 }
 0xc31   :  { %691 = vmatpush.msrb.mxu3 %v2755_v16 }
 0xc33   :  { %692 = vmatpush.msrb.mxu3 %v2763_v17 }
 0xcaf   :  { %v556_v30 = vpop.f32.mrf.mxu3 }
 0xcb0   :  { %v557_v31 = vadd.f32 %v2807_v23, %v556_v30 }
 0xcb2   :  { %v560_v32 = vadd.f32 %v557_v31, %v491_v63  ;;  %562 = vrot.lane.b32.xlu2 %v557_v31, %s2566_s26 }
 0xcb4   :  { %v567_v33 = vmax.f32 %v560_v32, 0.0 }
 0xcb6   :  { %573 = vrot.lane.b32.xlu1 %v567_v33, %s2564_s18 }
 0xd0c   :  { %v563_v35 = vpop.permute.xlu2 %562 }
 0xd0d   :  { %v565_v41 = vadd.f32 %v563_v35, %v496_v12 }
 0xd0f   :  { %569 = vrot.lane.b32.xlu0 %v565_v41, %s2565_s19 }
 0xd28   :  { %v574_v44 = vpop.permute.xlu1 %573 }
 0xd81   :  { %v570_v43 = vpop.permute.xlu0 %569 }
 0xd82   :  { %v576_v45 = vsel %vm129_vm3, %v559_v42, %v570_v43 }
 0xd83   :  { %v577_v47 = vsel %vm86_vm1, %v576_v45, %v574_v44  ;;  %v2359_v44 = vld [vmem:[%s3842_s25 + $0x8] sm:$0xff] }
 0xd84   :  { %2351 = vmatmul.msk.f32.vlgmr.msrb.gmra.mxu0 %vm88_vm2, %v577_v47 }
 0xd85   :  { %921 = vmatpush.msrb.mxu0 %v2743_v14 }
 0xd87   :  { %922 = vmatpush.msrb.mxu0 %v2748_v15 }
 0xd89   :  { %923 = vmatpush.msrb.mxu0 %v2755_v16 }
 0xd8b   :  { %924 = vmatpush.msrb.mxu0 %v2763_v17 }
 0xe01   :  { %v598_v48 = vpop.f32.mrf.mxu0 }
 0xe02   :  { %v601_v49 = vadd.f32 %v598_v48, %v2786_v18  ;;  %v628_v3 = vadd.f32 %v598_v48, %v559_v42  ;;  %v2358_v48 = vld [vmem:[%s3843_s11 + $0x8] sm:$0xff] }
 0xe04   :  { %v602_v51 = vmax.f32 %v601_v49, 0.0 }
 0xe06   :  { %v635_v52 = vadd.f32 %v602_v51, %v566_v50  ;;  %604 = vrot.lane.b32.xlu2 %v602_v51, %s2566_s26  ;;  %v2360_v51 = vld [vmem:[%s3822_s2 + $0x8] sm:$0xff] }
 0xe60   :  { %v605_v53 = vpop.permute.xlu2 %604 }
 0xe61   :  { %2352 = vmatmul.msk.f32.vlgmr.msra.gmra.mxu3 %vm129_vm3, %v605_v53 }
 0xe62   :  { %2365 = vmatpush.msk.msra.mxu3 %vm92_vm0, %v2670_v1 }
 0xe64   :  { %821 = vmatpush.msra.mxu3 %v2675_v2 }
 0xe66   :  { %822 = vmatpush.msra.mxu3 %v2685_v4 }
 0xe68   :  { %823 = vmatpush.msra.mxu3 %v2692_v5 }
 0xe6a   :  { %824 = vmatpush.msra.mxu3 %v2699_v6 }
 0xe6c   :  { %825 = vmatpush.msra.mxu3 %v2706_v7 }
 0xe6e   :  { %826 = vmatpush.msra.mxu3 %v2713_v8 }
 0xe70   :  { %827 = vmatpush.msra.mxu3 %v2720_v9 }
 0xe72   :  { %828 = vmatpush.msra.mxu3 %v2730_v10 }
 0xee4   :  { %v625_v54 = vpop.f32.mrf.mxu3 }
 0xee5   :  { %v626_v55 = vadd.f32 %v2807_v23, %v625_v54 }
 0xee7   :  { %v629_v56 = vadd.f32 %v626_v55, %v560_v32  ;;  %631 = vrot.lane.b32.xlu0 %v626_v55, %s2566_s26 }
 0xee9   :  { %v636_v57 = vmax.f32 %v629_v56, 0.0 }
 0xeeb   :  { %642 = vrot.lane.b32.xlu2 %v636_v57, %s2564_s18 }
 0xf45   :  { %v643_v12 = vpop.permute.xlu2 %642 }
 0xf59   :  { %v632_v58 = vpop.permute.xlu0 %631 }
 0xf5a   :  { %v634_v63 = vadd.f32 %v632_v58, %v565_v41 }
 0xf5c   :  { %638 = vrot.lane.b32.xlu1 %v634_v63, %s2565_s19 }
 0xfce   :  { %v639_v11 = vpop.permute.xlu1 %638 }
 0xfcf   :  { %v645_v13 = vsel %vm129_vm3, %v628_v3, %v639_v11 }
 0xfd0   :  { %v646_v19 = vsel %vm86_vm1, %v645_v13, %v643_v12 }
 0xfd1   :  { %2354 = vmatmul.msk.f32.vlgmr.msrb.gmra.mxu1 %vm88_vm2, %v646_v19 }
 0xfd2   :  { %1091 = vmatpush.msrb.mxu1 %v2862_v59 }
 0xfd4   :  { %1092 = vmatpush.msrb.mxu1 %v2867_v60 }
 0xfd6   :  { %1093 = vmatpush.msrb.mxu1 %v2873_v61 }
 0xfd8   :  { %1094 = vmatpush.msrb.mxu1 %v2879_v62 }
0x104e   :  { %v667_v20 = vpop.f32.mrf.mxu1 }
0x104f   :  { %v670_v24 = vadd.f32 %v667_v20, %v2786_v18  ;;  %v3110_v50 = vadd.f32 %v667_v20, %v628_v3 }
0x1051   :  { %v671_v25 = vmax.f32 %v670_v24, 0.0 }
0x1053   :  { %673 = vrot.lane.b32.xlu1 %v671_v25, %s2566_s26  ;;  %v703_v26 = vadd.f32 %v671_v25, %v635_v52  ;;  %v748_v52 = vmul.f32 %v2360_v51, %v3110_v50 }
0x1055   :  { %705 = vrot.lane.b32.xlu0 %v703_v26, %s2566_s26 }
0x105b   :  { %752 = vrot.lane.b32.xlu1 %v2361_v27, %s2565_s19 }
0x105d   :  { %734 = vrot.lane.b32.xlu0 %v2909_v21, %s2565_s19 }
0x10c5   :  { %v674_v28 = vpop.permute.xlu1 %673 }
0x10c6   :  { %2355 = vmatmul.msk.f32.vlgmr.msrb.gmra.mxu3 %vm129_vm3, %v674_v28 }
0x10c7   :  { %v706_v29 = vpop.permute.xlu0 %705  ;;  %2374 = vmatpush.msk.msrb.mxu3 %vm92_vm0, %v2670_v1 }
0x10c8   :  { %2356 = vmatmul.msk.f32.vlgmr.msra.gmra.mxu2 %vm129_vm3, %v706_v29 }
0x10c9   :  { %2371 = vmatpush.msk.msra.mxu2 %vm92_vm0, %v2670_v1  ;;  %1028 = vmatpush.msrb.mxu3 %v2675_v2 }
0x10cb   :  { %959 = vmatpush.msra.mxu2 %v2675_v2  ;;  %1029 = vmatpush.msrb.mxu3 %v2685_v4 }
0x10cd   :  { %960 = vmatpush.msra.mxu2 %v2685_v4  ;;  %1030 = vmatpush.msrb.mxu3 %v2692_v5  ;;  %v753_v41 = vpop.permute.xlu1 %752 }
0x10cf   :  { %961 = vmatpush.msra.mxu2 %v2692_v5  ;;  %1031 = vmatpush.msrb.mxu3 %v2699_v6  ;;  %v3094_v33 = vpop.permute.xlu0 %734 }
0x10d1   :  { %962 = vmatpush.msra.mxu2 %v2699_v6  ;;  %1032 = vmatpush.msrb.mxu3 %v2706_v7 }
0x10d3   :  { %963 = vmatpush.msra.mxu2 %v2706_v7  ;;  %1033 = vmatpush.msrb.mxu3 %v2713_v8 }
0x10d5   :  { %964 = vmatpush.msra.mxu2 %v2713_v8  ;;  %1034 = vmatpush.msrb.mxu3 %v2720_v9 }
0x10d7   :  { %965 = vmatpush.msra.mxu2 %v2720_v9  ;;  %1035 = vmatpush.msrb.mxu3 %v2730_v10 }
0x10d9   :  { %966 = vmatpush.msra.mxu2 %v2730_v10 }
0x1149   :  { %v694_v21 = vpop.f32.mrf.mxu3 }
0x114a   :  { %v695_v30 = vadd.f32 %v2807_v23, %v694_v21 }
0x114b   :  { %v726_v31 = vpop.f32.mrf.mxu2 }
0x114c   :  { %699 = vrot.lane.b32.xlu0 %v695_v30, %s2566_s26  ;;  %730 = vrot.lane.b32.xlu2 %v726_v31, %s2565_s19 }
0x11a6   :  { %v731_v32 = vpop.permute.xlu2 %730 }
0x11a7   :  { %v733_v35 = vadd.f32 %v731_v32, %v2980_v46 }
0x11a9   :  { %v737_v42 = vadd.f32 %v3094_v33, %v733_v35 }
0x11ab   :  { %v755_v43 = vmul.f32 %v753_v41, %v737_v42 }
0x11ad   :  { %757 = vrot.lane.b32.xlu2 %v755_v43, %s2566_s26 }
0x11be   :  { %v700_v45 = vpop.permute.xlu0 %699 }
0x11bf   :  { %v702_v47 = vadd.f32 %v700_v45, %v634_v63 }
0x11c1   :  { %2357 = vst.msk [vmem:[%s3833_s13 + $0x8] sm:$0xff] %vm370_vm4, %v702_v47  ;;  %v744_v46 = vmul.f32 %v2359_v44, %v702_v47 }
0x11c3   :  { %v745_v49 = vadd.f32 %v2358_v48, %v744_v46 }
0x11c5   :  { %801 = vrot.lane.b32.xlu2 %v745_v49, %s2565_s19 }
0x1207   :  { %v758_v53 = vpop.permute.xlu2 %757 }
0x1208   :  { %v760_v54 = vadd.f32 %v758_v53, %v748_v52 }
0x120a   :  { %762 = vrot.lane.b32.xlu1 %v760_v54, %s2567_s20 }
0x121f   :  { %v802_v3 = vpop.permute.xlu2 %801 }
0x1220   :  { %v808_v11 = vsel %vm129_vm3, %v3110_v50, %v802_v3 }
0x127c   :  { %v763_v55 = vpop.permute.xlu1 %762 }
0x127d   :  { %v765_v56 = vsel %vm370_vm4, %v745_v49, %v763_v55 }
0x127e   :  { %2363 = vmatmul.msk.f32.vlgmr.msra.gmra.mxu0 %vm86_vm1, %v765_v56 }
0x127f   :  { %990 = vmatpush.msra.mxu0 %v2743_v14 }
0x1281   :  { %991 = vmatpush.msra.mxu0 %v2748_v15 }
0x1283   :  { %992 = vmatpush.msra.mxu0 %v2755_v16 }
0x1285   :  { %993 = vmatpush.msra.mxu0 %v2763_v17 }
0x12fb   :  { %v3123_v57 = vpop.f32.mrf.mxu0 }
0x12fc   :  { %v789_v58 = vadd.f32 %v2665_v0, %v3123_v57 }
0x12fe   :  { %v799_v63 = vmax.f32 %v789_v58, 0.0 }
0x1300   :  { %805 = vrot.lane.b32.xlu0 %v799_v63, %s2564_s18 }
0x1372   :  { %v806_v12 = vpop.permute.xlu0 %805 }
0x1373   :  { %v809_v13 = vsel %vm86_vm1, %v808_v11, %v806_v12 }
0x1374   :  { %2366 = vmatmul.msk.f32.vlgmr.msra.gmra.mxu3 %vm88_vm2, %v809_v13 }
0x1375   :  { %2389 = vmatpush.msk.msra.mxu3 %vm92_vm0, %v2670_v1 }
0x1377   :  { %1257 = vmatpush.msra.mxu3 %v2675_v2 }
0x1379   :  { %1258 = vmatpush.msra.mxu3 %v2685_v4 }
0x137b   :  { %1259 = vmatpush.msra.mxu3 %v2692_v5 }
0x137d   :  { %1260 = vmatpush.msra.mxu3 %v2699_v6 }
0x137f   :  { %1261 = vmatpush.msra.mxu3 %v2706_v7 }
0x1381   :  { %1262 = vmatpush.msra.mxu3 %v2713_v8 }
0x1383   :  { %1263 = vmatpush.msra.mxu3 %v2720_v9 }
0x1385   :  { %1264 = vmatpush.msra.mxu3 %v2730_v10 }
0x13f7   :  { %v830_v0 = vpop.f32.mrf.mxu3 }
0x13f8   :  { %v3143_v19 = vadd.f32 %v830_v0, %v2786_v18  ;;  %v860_v30 = vadd.f32 %v830_v0, %v3110_v50 }
0x13fa   :  { %v834_v20 = vmax.f32 %v3143_v19, 0.0 }
0x13fc   :  { %836 = vrot.lane.b32.xlu1 %v834_v20, %s2566_s26 }
0x146e   :  { %v837_v24 = vpop.permute.xlu1 %836 }
0x146f   :  { %2367 = vmatmul.msk.f32.vlgmr.msrb.gmra.mxu2 %vm129_vm3, %v837_v24 }
0x1470   :  { %2383 = vmatpush.msk.msrb.mxu2 %vm92_vm0, %v2930_v36 }
0x1472   :  { %1148 = vmatpush.msrb.mxu2 %v2937_v37 }
0x1474   :  { %1149 = vmatpush.msrb.mxu2 %v2943_v38 }
0x1476   :  { %1150 = vmatpush.msrb.mxu2 %v2948_v39 }
0x1478   :  { %1151 = vmatpush.msrb.mxu2 %v2955_v40 }
0x14f2   :  { %v857_v25 = vpop.f32.mrf.mxu2 }
0x14f3   :  { %v858_v26 = vadd.f32 %v2807_v23, %v857_v25 }
0x14f5   :  { %v861_v27 = vadd.f32 %v858_v26, %v789_v58  ;;  %863 = vrot.lane.b32.xlu2 %v858_v26, %s2566_s26  ;;  %v3253_v26 = vld [vmem:[%s3825_s5 + $0x20] sm:$0xff] }
0x14f7   :  { %v868_v28 = vmax.f32 %v861_v27, 0.0 }
0x14f9   :  { %874 = vrot.lane.b32.xlu1 %v868_v28, %s2564_s18  ;;  %v3265_v28 = vld [vmem:[%s3825_s5 + $0x10] sm:$0xff] }
0x154f   :  { %v864_v29 = vpop.permute.xlu2 %863 }
0x1550   :  { %v866_v21 = vadd.f32 %v864_v29, %v745_v49  ;;  %v3271_v29 = vld [vmem:[%s3825_s5 + $0x8] sm:$0xff] }
0x1552   :  { %870 = vrot.lane.b32.xlu0 %v866_v21, %s2565_s19 }
0x156b   :  { %v875_v32 = vpop.permute.xlu1 %874 }
0x15c4   :  { %v871_v31 = vpop.permute.xlu0 %870 }
0x15c5   :  { %v877_v35 = vsel %vm129_vm3, %v860_v30, %v871_v31  ;;  %v3284_v31 = vld [vmem:[%s3828_s8 + $0x18] sm:$0xff] }
0x15c6   :  { %v878_v41 = vsel %vm86_vm1, %v877_v35, %v875_v32  ;;  %v3290_v32 = vld [vmem:[%s3828_s8 + $0x10] sm:$0xff]  ;;  %v3296_v35 = vld [vmem:[%s3828_s8 + $0x8] sm:$0xff] }
0x15c7   :  { %2369 = vmatmul.msk.f32.vlgmr.msra.gmra.mxu1 %vm88_vm2, %v878_v41  ;;  %v2382_v41 = vld [vmem:[%s3823_s3 + $0x10] sm:$0xff] }
0x15c8   :  { %1219 = vmatpush.msra.mxu1 %v2743_v14 }
0x15ca   :  { %1220 = vmatpush.msra.mxu1 %v2748_v15 }
0x15cc   :  { %1221 = vmatpush.msra.mxu1 %v2755_v16 }
0x15ce   :  { %1222 = vmatpush.msra.mxu1 %v2763_v17 }
0x1644   :  { %v899_v42 = vpop.f32.mrf.mxu1 }
0x1645   :  { %v902_v43 = vadd.f32 %v899_v42, %v2786_v18 }
0x1647   :  { %v903_v44 = vmax.f32 %v902_v43, 0.0 }
0x1649   :  { %905 = vrot.lane.b32.xlu2 %v903_v44, %s2566_s26  ;;  %v936_v58 = vadd.f32 %v903_v44, %v834_v20 }
0x16a3   :  { %v906_v45 = vpop.permute.xlu2 %905 }
0x16a4   :  { %2370 = vmatmul.msk.f32.vlgmr.msrb.gmra.mxu0 %vm129_vm3, %v906_v45 }
0x16a5   :  { %1059 = vmatpush.msrb.mxu0 %v2743_v14  ;;  %v929_v14 = vadd.f32 %v899_v42, %v860_v30 }
0x16a7   :  { %1060 = vmatpush.msrb.mxu0 %v2748_v15 }
0x16a9   :  { %1061 = vmatpush.msrb.mxu0 %v2755_v16 }
0x16ab   :  { %1062 = vmatpush.msrb.mxu0 %v2763_v17 }
0x1721   :  { %v926_v47 = vpop.f32.mrf.mxu0 }
0x1722   :  { %v927_v48 = vadd.f32 %v2807_v23, %v926_v47 }
0x1724   :  { %v930_v46 = vadd.f32 %v927_v48, %v861_v27  ;;  %932 = vrot.lane.b32.xlu0 %v927_v48, %s2566_s26  ;;  %v3259_v27 = vld [vmem:[%s3825_s5 + $0x18] sm:$0xff] }
0x1726   :  { %v937_v49 = vmax.f32 %v930_v46, 0.0 }
0x1728   :  { %943 = vrot.lane.b32.xlu2 %v937_v49, %s2564_s18  ;;  %v2380_v49 = vld [vmem:[%s3842_s25 + $0x10] sm:$0xff] }
0x1782   :  { %v944_v15 = vpop.permute.xlu2 %943 }
0x1796   :  { %v933_v51 = vpop.permute.xlu0 %932 }
0x1797   :  { %v935_v52 = vadd.f32 %v933_v51, %v866_v21  ;;  %v3277_v21 = vld [vmem:[%s3825_s5] sm:$0xff] }
0x1799   :  { %939 = vrot.lane.b32.xlu1 %v935_v52, %s2565_s19 }
0x180b   :  { %v940_v53 = vpop.permute.xlu1 %939 }
0x180c   :  { %v946_v16 = vsel %vm129_vm3, %v929_v14, %v940_v53 }
0x180d   :  { %v947_v54 = vsel %vm86_vm1, %v946_v16, %v944_v15  ;;  %v2381_v15 = vld [vmem:[%s3822_s2 + $0x10] sm:$0xff] }
0x180e   :  { %2372 = vmatmul.msk.f32.vlgmr.msra.gmra.mxu2 %vm88_vm2, %v947_v54 }
0x180f   :  { %2392 = vmatpush.msk.msra.mxu2 %vm92_vm0, %v2670_v1 }
0x1811   :  { %1326 = vmatpush.msra.mxu2 %v2675_v2 }
0x1813   :  { %1327 = vmatpush.msra.mxu2 %v2685_v4 }
0x1815   :  { %1328 = vmatpush.msra.mxu2 %v2692_v5 }
0x1817   :  { %1329 = vmatpush.msra.mxu2 %v2699_v6 }
0x1819   :  { %1330 = vmatpush.msra.mxu2 %v2706_v7 }
0x181b   :  { %1331 = vmatpush.msra.mxu2 %v2713_v8 }
0x181d   :  { %1332 = vmatpush.msra.mxu2 %v2720_v9 }
0x181f   :  { %1333 = vmatpush.msra.mxu2 %v2730_v10 }
0x1891   :  { %v968_v55 = vpop.f32.mrf.mxu2 }
0x1892   :  { %v971_v56 = vadd.f32 %v968_v55, %v2786_v18 }
0x1894   :  { %v972_v63 = vmax.f32 %v971_v56, 0.0 }
0x1896   :  { %v1005_v3 = vadd.f32 %v972_v63, %v936_v58  ;;  %974 = vrot.lane.b32.xlu0 %v972_v63, %s2566_s26 }
0x1908   :  { %v975_v11 = vpop.permute.xlu0 %974 }
0x1909   :  { %2373 = vmatmul.msk.f32.vlgmr.msra.gmra.mxu0 %vm129_vm3, %v975_v11 }
0x190a   :  { %2386 = vmatpush.msk.msra.mxu0 %vm92_vm0, %v2670_v1 }
0x190c   :  { %1188 = vmatpush.msra.mxu0 %v2675_v2 }
0x190e   :  { %1189 = vmatpush.msra.mxu0 %v2685_v4 }
0x1910   :  { %1190 = vmatpush.msra.mxu0 %v2692_v5 }
0x1912   :  { %1191 = vmatpush.msra.mxu0 %v2699_v6  ;;  %v3211_v6 = vadd.f32 %v968_v55, %v929_v14 }
0x1914   :  { %1192 = vmatpush.msra.mxu0 %v2706_v7 }
0x1916   :  { %1193 = vmatpush.msra.mxu0 %v2713_v8 }
0x1918   :  { %1194 = vmatpush.msra.mxu0 %v2720_v9 }
0x191a   :  { %1195 = vmatpush.msra.mxu0 %v2730_v10 }
0x1986   :  { %v995_v12 = vpop.f32.mrf.mxu0 }
0x1987   :  { %v996_v13 = vadd.f32 %v2807_v23, %v995_v12 }
0x1989   :  { %v999_v1 = vadd.f32 %v996_v13, %v930_v46  ;;  %1001 = vrot.lane.b32.xlu1 %v996_v13, %s2566_s26 }
0x198b   :  { %v1006_v2 = vmax.f32 %v999_v1, 0.0 }
0x198d   :  { %1012 = vrot.lane.b32.xlu0 %v1006_v2, %s2564_s18 }
0x19fb   :  { %v1002_v4 = vpop.permute.xlu1 %1001 }
0x19fc   :  { %v1004_v5 = vadd.f32 %v1002_v4, %v935_v52  ;;  %v3370_v4 = vld [vmem:[%s3828_s8] sm:$0xff] }
0x19fe   :  { %1008 = vrot.lane.b32.xlu2 %v1004_v5, %s2565_s19 }
0x19ff   :  { %v1013_v8 = vpop.permute.xlu0 %1012 }
0x1a58   :  { %v1009_v7 = vpop.permute.xlu2 %1008 }
0x1a59   :  { %v1015_v9 = vsel %vm129_vm3, %v3211_v6, %v1009_v7 }
0x1a5a   :  { %v1016_v10 = vsel %vm86_vm1, %v1015_v9, %v1013_v8 }
0x1a5b   :  { %2375 = vmatmul.msk.f32.vlgmr.msrb.gmra.mxu3 %vm88_vm2, %v1016_v10 }
0x1a5c   :  { %1458 = vmatpush.msrb.mxu3 %v2862_v59  ;;  %v3228_v59 = vld [vmem:[%s3825_s5 + $0x40] sm:$0xf] }
0x1a5e   :  { %1459 = vmatpush.msrb.mxu3 %v2867_v60  ;;  %v3235_v60 = vld [vmem:[%s3825_s5 + $0x38] sm:$0xff] }
0x1a60   :  { %1460 = vmatpush.msrb.mxu3 %v2873_v61  ;;  %v3241_v61 = vld [vmem:[%s3825_s5 + $0x30] sm:$0xff] }
0x1a62   :  { %1461 = vmatpush.msrb.mxu3 %v2879_v62  ;;  %v3247_v62 = vld [vmem:[%s3825_s5 + $0x28] sm:$0xff] }
0x1ade   :  { %v1037_v0 = vpop.f32.mrf.mxu3 }
0x1adf   :  { %v1040_v19 = vadd.f32 %v1037_v0, %v2786_v18  ;;  %v3322_v53 = vadd.f32 %v1037_v0, %v3211_v6  ;;  %v3376_v6 = vld [vmem:[%s3829_s9] ss:$0 sm:$0xff] }
0x1ae1   :  { %v1041_v20 = vmax.f32 %v1040_v19, 0.0  ;;  %v1115_v16 = vmul.f32 %v2381_v15, %v3322_v53 }
0x1ae3   :  { %1043 = vrot.lane.b32.xlu2 %v1041_v20, %s2566_s26  ;;  %v1073_v24 = vadd.f32 %v1041_v20, %v1005_v3  ;;  %v3342_v3 = vld [vmem:[%s3826_s6] ss:$0 sm:$0xff] }
0x1ae5   :  { %1075 = vrot.lane.b32.xlu1 %v1073_v24, %s2566_s26 }
0x1aed   :  { %1119 = vrot.lane.b32.xlu1 %v2382_v41, %s2565_s19 }
0x1b3d   :  { %v1044_v25 = vpop.permute.xlu2 %1043 }
0x1b3e   :  { %2376 = vmatmul.msk.f32.vlgmr.msrb.gmra.mxu0 %vm129_vm3, %v1044_v25 }
0x1b3f   :  { %2395 = vmatpush.msk.msrb.mxu0 %vm92_vm0, %v3228_v59 }
0x1b41   :  { %1395 = vmatpush.msrb.mxu0 %v3235_v60 }
0x1b43   :  { %1396 = vmatpush.msrb.mxu0 %v3241_v61 }
0x1b45   :  { %1397 = vmatpush.msrb.mxu0 %v3247_v62 }
0x1b47   :  { %1398 = vmatpush.msrb.mxu0 %v3253_v26 }
0x1b49   :  { %1399 = vmatpush.msrb.mxu0 %v3259_v27 }
0x1b4b   :  { %1400 = vmatpush.msrb.mxu0 %v3265_v28 }
0x1b4d   :  { %1401 = vmatpush.msrb.mxu0 %v3271_v29 }
0x1b4f   :  { %1402 = vmatpush.msrb.mxu0 %v3277_v21 }
0x1b57   :  { %v1076_v30 = vpop.permute.xlu1 %1075 }
0x1b58   :  { %2377 = vmatmul.msk.f32.vlgmr.msrb.gmra.mxu1 %vm129_vm3, %v1076_v30 }
0x1b59   :  { %1288 = vmatpush.msrb.mxu1 %v3284_v31 }
0x1b5b   :  { %1289 = vmatpush.msrb.mxu1 %v3290_v32 }
0x1b5d   :  { %1290 = vmatpush.msrb.mxu1 %v3296_v35 }
0x1b5f   :  { %1291 = vmatpush.msrb.mxu1 %v2763_v17  ;;  %v1120_v48 = vpop.permute.xlu1 %1119 }
0x1bbb   :  { %v1064_v43 = vpop.f32.mrf.mxu0 }
0x1bbc   :  { %v1065_v44 = vadd.f32 %v2807_v23, %v1064_v43  ;;  %v2379_v23 = vld [vmem:[%s3843_s11 + $0x10] sm:$0xff] }
0x1bd5   :  { %v1096_v42 = vpop.f32.mrf.mxu1 }
0x1bd6   :  { %1100 = vrot.lane.b32.xlu0 %v1096_v42, %s2565_s19 }
0x1bde   :  { %1069 = vrot.lane.b32.xlu0 %v1065_v44, %s2566_s26 }
0x1c48   :  { %v1101_v45 = vpop.permute.xlu0 %1100 }
0x1c49   :  { %v1103_v47 = vadd.f32 %v1101_v45, %v3123_v57 }
0x1c4b   :  { %v1104_v17 = vadd.f32 %v1103_v47, %v3094_v33 }
0x1c4d   :  { %v1122_v46 = vmul.f32 %v1120_v48, %v1104_v17 }
0x1c4f   :  { %1124 = vrot.lane.b32.xlu2 %v1122_v46, %s2566_s26 }
0x1c50   :  { %v1070_v51 = vpop.permute.xlu0 %1069 }
0x1c51   :  { %v1072_v52 = vadd.f32 %v1070_v51, %v1004_v5 }
0x1c53   :  { %2378 = vst.msk [vmem:[%s3833_s13 + $0x10] sm:$0xff] %vm370_vm4, %v1072_v52  ;;  %v1111_v57 = vmul.f32 %v2380_v49, %v1072_v52 }
0x1c55   :  { %v1112_v14 = vadd.f32 %v2379_v23, %v1111_v57 }
0x1c57   :  { %1168 = vrot.lane.b32.xlu2 %v1112_v14, %s2565_s19 }
0x1ca9   :  { %v1125_v54 = vpop.permute.xlu2 %1124 }
0x1caa   :  { %v1127_v55 = vadd.f32 %v1125_v54, %v1115_v16 }
0x1cac   :  { %1129 = vrot.lane.b32.xlu1 %v1127_v55, %s2567_s20 }
0x1d1e   :  { %v1130_v56 = vpop.permute.xlu1 %1129 }
0x1d1f   :  { %v1132_v58 = vsel %vm370_vm4, %v1112_v14, %v1130_v56 }
0x1d20   :  { %2384 = vmatmul.msk.f32.vlgmr.msrb.gmra.mxu2 %vm86_vm1, %v1132_v58 }
0x1d21   :  { %2404 = vmatpush.msk.msrb.mxu2 %vm92_vm0, %v2930_v36  ;;  %v1169_v36 = vpop.permute.xlu2 %1168 }
0x1d23   :  { %1515 = vmatpush.msrb.mxu2 %v2937_v37  ;;  %v1175_v37 = vsel %vm129_vm3, %v3322_v53, %v1169_v36 }
0x1d25   :  { %1516 = vmatpush.msrb.mxu2 %v2943_v38 }
0x1d27   :  { %1517 = vmatpush.msrb.mxu2 %v2948_v39 }
0x1d29   :  { %1518 = vmatpush.msrb.mxu2 %v2955_v40 }
0x1da3   :  { %v3337_v63 = vpop.f32.mrf.mxu2 }
0x1da4   :  { %v1156_v11 = vadd.f32 %v3342_v3, %v3337_v63 }
0x1da6   :  { %v1166_v12 = vmax.f32 %v1156_v11, 0.0 }
0x1da8   :  { %1172 = vrot.lane.b32.xlu0 %v1166_v12, %s2564_s18 }
0x1e1a   :  { %v1173_v38 = vpop.permute.xlu0 %1172 }
0x1e1b   :  { %v1176_v39 = vsel %vm86_vm1, %v1175_v37, %v1173_v38 }
0x1e1c   :  { %2387 = vmatmul.msk.f32.vlgmr.msra.gmra.mxu0 %vm88_vm2, %v1176_v39 }
0x1e1d   :  { %2410 = vmatpush.msk.msra.mxu0 %vm92_vm0, %v3228_v59 }
0x1e1f   :  { %1624 = vmatpush.msra.mxu0 %v3235_v60 }
0x1e21   :  { %1625 = vmatpush.msra.mxu0 %v3241_v61 }
0x1e23   :  { %1626 = vmatpush.msra.mxu0 %v3247_v62 }
0x1e25   :  { %1627 = vmatpush.msra.mxu0 %v3253_v26 }
0x1e27   :  { %1628 = vmatpush.msra.mxu0 %v3259_v27 }
0x1e29   :  { %1629 = vmatpush.msra.mxu0 %v3265_v28 }
0x1e2b   :  { %1630 = vmatpush.msra.mxu0 %v3271_v29 }
0x1e2d   :  { %1631 = vmatpush.msra.mxu0 %v3277_v21 }
0x1e99   :  { %v1197_v40 = vpop.f32.mrf.mxu0 }
0x1e9a   :  { %v1200_v13 = vadd.f32 %v1197_v40, %v2786_v18  ;;  %v1227_v19 = vadd.f32 %v1197_v40, %v3322_v53 }
0x1e9c   :  { %v1201_v1 = vmax.f32 %v1200_v13, 0.0 }
0x1e9e   :  { %1203 = vrot.lane.b32.xlu1 %v1201_v1, %s2566_s26 }
0x1f10   :  { %v1204_v2 = vpop.permute.xlu1 %1203 }
0x1f11   :  { %2388 = vmatmul.msk.f32.vlgmr.msra.gmra.mxu1 %vm129_vm3, %v1204_v2 }
0x1f12   :  { %1357 = vmatpush.msra.mxu1 %v3284_v31 }
0x1f14   :  { %1358 = vmatpush.msra.mxu1 %v3290_v32 }
0x1f16   :  { %1359 = vmatpush.msra.mxu1 %v3296_v35 }
0x1f18   :  { %1360 = vmatpush.msra.mxu1 %v3370_v4 }
0x1f8e   :  { %v1224_v5 = vpop.f32.mrf.mxu1 }
0x1f8f   :  { %v1225_v7 = vadd.f32 %v3376_v6, %v1224_v5 }
0x1f91   :  { %v1228_v8 = vadd.f32 %v1225_v7, %v1156_v11  ;;  %1230 = vrot.lane.b32.xlu2 %v1225_v7, %s2566_s26  ;;  %v3434_v7 = vld [vmem:[%s3830_s10 + $0x18] sm:$0xff] }
0x1f93   :  { %v1235_v9 = vmax.f32 %v1228_v8, 0.0 }
0x1f95   :  { %1241 = vrot.lane.b32.xlu1 %v1235_v9, %s2564_s18  ;;  %v3446_v9 = vld [vmem:[%s3830_s10 + $0x8] sm:$0xff] }
0x1feb   :  { %v1231_v10 = vpop.permute.xlu2 %1230 }
0x1fec   :  { %v1233_v0 = vadd.f32 %v1231_v10, %v1112_v14  ;;  %v3452_v10 = vld [vmem:[%s3830_s10] sm:$0xff] }
0x1fee   :  { %1237 = vrot.lane.b32.xlu0 %v1233_v0, %s2565_s19 }
0x2007   :  { %v1242_v24 = vpop.permute.xlu1 %1241 }
0x2060   :  { %v1238_v20 = vpop.permute.xlu0 %1237 }
0x2061   :  { %v1244_v25 = vsel %vm129_vm3, %v1227_v19, %v1238_v20 }
0x2062   :  { %v1245_v30 = vsel %vm86_vm1, %v1244_v25, %v1242_v24 }
0x2063   :  { %2390 = vmatmul.msk.f32.vlgmr.msra.gmra.mxu3 %vm88_vm2, %v1245_v30 }
0x2064   :  { %1586 = vmatpush.msra.mxu3 %v3284_v31 }
0x2066   :  { %1587 = vmatpush.msra.mxu3 %v3290_v32 }
0x2068   :  { %1588 = vmatpush.msra.mxu3 %v3296_v35 }
0x206a   :  { %1589 = vmatpush.msra.mxu3 %v3370_v4 }
0x20e6   :  { %v1266_v41 = vpop.f32.mrf.mxu3 }
0x20e7   :  { %v1269_v42 = vadd.f32 %v1266_v41, %v2786_v18  ;;  %v1296_v51 = vadd.f32 %v1266_v41, %v1227_v19  ;;  %v2403_v41 = vld [vmem:[%s3823_s3 + $0x18] sm:$0xff] }
0x20e9   :  { %v1270_v43 = vmax.f32 %v1269_v42, 0.0 }
0x20eb   :  { %1272 = vrot.lane.b32.xlu2 %v1270_v43, %s2566_s26  ;;  %v1303_v54 = vadd.f32 %v1270_v43, %v1201_v1 }
0x2145   :  { %v1273_v44 = vpop.permute.xlu2 %1272 }
0x2146   :  { %2391 = vmatmul.msk.f32.vlgmr.msrb.gmra.mxu1 %vm129_vm3, %v1273_v44 }
0x2147   :  { %1426 = vmatpush.msrb.mxu1 %v3284_v31 }
0x2149   :  { %1427 = vmatpush.msrb.mxu1 %v3290_v32 }
0x214b   :  { %1428 = vmatpush.msrb.mxu1 %v3296_v35 }
0x214d   :  { %1429 = vmatpush.msrb.mxu1 %v3370_v4 }
0x21c3   :  { %v1293_v45 = vpop.f32.mrf.mxu1 }
0x21c4   :  { %v1294_v47 = vadd.f32 %v3376_v6, %v1293_v45 }
0x21c6   :  { %v1297_v48 = vadd.f32 %v1294_v47, %v1228_v8  ;;  %1299 = vrot.lane.b32.xlu0 %v1294_v47, %s2566_s26  ;;  %v3440_v8 = vld [vmem:[%s3830_s10 + $0x10] sm:$0xff] }
0x21c8   :  { %v1304_v17 = vmax.f32 %v1297_v48, 0.0 }
0x21ca   :  { %1310 = vrot.lane.b32.xlu2 %v1304_v17, %s2564_s18 }
0x2224   :  { %v1311_v23 = vpop.permute.xlu2 %1310 }
0x2238   :  { %v1300_v46 = vpop.permute.xlu0 %1299 }
0x2239   :  { %v1302_v49 = vadd.f32 %v1300_v46, %v1233_v0 }
0x223b   :  { %1306 = vrot.lane.b32.xlu1 %v1302_v49, %s2565_s19 }
0x22ad   :  { %v1307_v52 = vpop.permute.xlu1 %1306 }
0x22ae   :  { %v1313_v57 = vsel %vm129_vm3, %v1296_v51, %v1307_v52 }
0x22af   :  { %v1314_v14 = vsel %vm86_vm1, %v1313_v57, %v1311_v23  ;;  %v2400_v23 = vld [vmem:[%s3843_s11 + $0x18] sm:$0xff] }
0x22b0   :  { %2393 = vmatmul.msk.f32.vlgmr.msra.gmra.mxu2 %vm88_vm2, %v1314_v14 }
0x22b1   :  { %1655 = vmatpush.msra.mxu2 %v3284_v31 }
0x22b3   :  { %1656 = vmatpush.msra.mxu2 %v3290_v32 }
0x22b5   :  { %1657 = vmatpush.msra.mxu2 %v3296_v35 }
0x22b7   :  { %1658 = vmatpush.msra.mxu2 %v3370_v4 }
0x2333   :  { %v1335_v15 = vpop.f32.mrf.mxu2 }
0x2334   :  { %v1338_v16 = vadd.f32 %v1335_v15, %v2786_v18  ;;  %v3425_v40 = vadd.f32 %v1335_v15, %v1296_v51  ;;  %v2402_v15 = vld [vmem:[%s3822_s2 + $0x18] sm:$0xff] }
0x2336   :  { %v1339_v55 = vmax.f32 %v1338_v16, 0.0 }
0x2338   :  { %v1372_v56 = vadd.f32 %v1339_v55, %v1303_v54  ;;  %1341 = vrot.lane.b32.xlu0 %v1339_v55, %s2566_s26 }
0x23aa   :  { %v1342_v58 = vpop.permute.xlu0 %1341 }
0x23ab   :  { %2394 = vmatmul.msk.f32.vlgmr.msra.gmra.mxu1 %vm129_vm3, %v1342_v58 }
0x23ac   :  { %2407 = vmatpush.msk.msra.mxu1 %vm92_vm0, %v3228_v59 }
0x23ae   :  { %1555 = vmatpush.msra.mxu1 %v3235_v60 }
0x23b0   :  { %1556 = vmatpush.msra.mxu1 %v3241_v61 }
0x23b2   :  { %1557 = vmatpush.msra.mxu1 %v3247_v62 }
0x23b4   :  { %1558 = vmatpush.msra.mxu1 %v3253_v26 }
0x23b6   :  { %1559 = vmatpush.msra.mxu1 %v3259_v27 }
0x23b8   :  { %1560 = vmatpush.msra.mxu1 %v3265_v28 }
0x23ba   :  { %1561 = vmatpush.msra.mxu1 %v3271_v29 }
0x23bc   :  { %1562 = vmatpush.msra.mxu1 %v3277_v21 }
0x2428   :  { %v1362_v11 = vpop.f32.mrf.mxu1 }
0x2429   :  { %v1363_v12 = vadd.f32 %v3376_v6, %v1362_v11 }
0x242b   :  { %v1366_v36 = vadd.f32 %v1363_v12, %v1297_v48  ;;  %1368 = vrot.lane.b32.xlu1 %v1363_v12, %s2566_s26 }
0x242d   :  { %v1373_v37 = vmax.f32 %v1366_v36, 0.0 }
0x242f   :  { %1379 = vrot.lane.b32.xlu0 %v1373_v37, %s2564_s18 }
0x249d   :  { %v1369_v38 = vpop.permute.xlu1 %1368 }
0x249e   :  { %v1371_v39 = vadd.f32 %v1369_v38, %v1302_v49  ;;  %v2401_v49 = vld [vmem:[%s3842_s25 + $0x18] sm:$0xff] }
0x24a0   :  { %1375 = vrot.lane.b32.xlu2 %v1371_v39, %s2565_s19 }
0x24a1   :  { %v1380_v1 = vpop.permute.xlu0 %1379 }
0x24fa   :  { %v1376_v13 = vpop.permute.xlu2 %1375 }
0x24fb   :  { %v1382_v2 = vsel %vm129_vm3, %v3425_v40, %v1376_v13 }
0x24fc   :  { %v1383_v5 = vsel %vm86_vm1, %v1382_v2, %v1380_v1 }
0x24fd   :  { %2396 = vmatmul.msk.f32.vlgmr.msrb.gmra.mxu0 %vm88_vm2, %v1383_v5 }
0x24fe   :  { %1825 = vmatpush.msrb.mxu0 %v3434_v7 }
0x2500   :  { %1826 = vmatpush.msrb.mxu0 %v3440_v8 }
0x2502   :  { %1827 = vmatpush.msrb.mxu0 %v3446_v9 }
0x2504   :  { %1828 = vmatpush.msrb.mxu0 %v3452_v10 }
0x257a   :  { %v1404_v0 = vpop.f32.mrf.mxu0 }
0x257b   :  { %v1407_v19 = vadd.f32 %v1404_v0, %v2786_v18  ;;  %v3502_v14 = vadd.f32 %v1404_v0, %v3425_v40  ;;  %v3545_v0 = vld [vmem:[%s3832_s12 + $0x20] sm:$0xf] }
0x257d   :  { %v1408_v20 = vmax.f32 %v1407_v19, 0.0  ;;  %v1482_v16 = vmul.f32 %v2402_v15, %v3502_v14  ;;  %v3552_v19 = vld [vmem:[%s3832_s12 + $0x18] sm:$0xff] }
0x257f   :  { %1410 = vrot.lane.b32.xlu2 %v1408_v20, %s2566_s26  ;;  %v1440_v24 = vadd.f32 %v1408_v20, %v1372_v56  ;;  %v3558_v20 = vld [vmem:[%s3832_s12 + $0x10] sm:$0xff] }
0x2581   :  { %1442 = vrot.lane.b32.xlu1 %v1440_v24, %s2566_s26  ;;  %v3564_v24 = vld [vmem:[%s3832_s12 + $0x8] sm:$0xff] }
0x2589   :  { %1486 = vrot.lane.b32.xlu1 %v2403_v41, %s2565_s19 }
0x25d9   :  { %v1411_v25 = vpop.permute.xlu2 %1410 }
0x25da   :  { %2397 = vmatmul.msk.f32.vlgmr.msrb.gmra.mxu1 %vm129_vm3, %v1411_v25  ;;  %v3570_v25 = vld [vmem:[%s3832_s12] sm:$0xff]  ;;  %s2571_s12 = smov [#allocation6]  }
0x25db   :  { %2416 = vmatpush.msk.msrb.mxu1 %vm92_vm0, %v3228_v59 }
0x25dd   :  { %1762 = vmatpush.msrb.mxu1 %v3235_v60 }
0x25df   :  { %1763 = vmatpush.msrb.mxu1 %v3241_v61 }
0x25e1   :  { %1764 = vmatpush.msrb.mxu1 %v3247_v62 }
0x25e3   :  { %1765 = vmatpush.msrb.mxu1 %v3253_v26 }
0x25e5   :  { %1766 = vmatpush.msrb.mxu1 %v3259_v27 }
0x25e7   :  { %1767 = vmatpush.msrb.mxu1 %v3265_v28 }
0x25e9   :  { %1768 = vmatpush.msrb.mxu1 %v3271_v29 }
0x25eb   :  { %1769 = vmatpush.msrb.mxu1 %v3277_v21 }
0x25f3   :  { %v1443_v30 = vpop.permute.xlu1 %1442 }
0x25f4   :  { %2398 = vmatmul.msk.f32.vlgmr.msrb.gmra.mxu3 %vm129_vm3, %v1443_v30 }
0x25f5   :  { %2413 = vmatpush.msk.msrb.mxu3 %vm92_vm0, %v3228_v59 }
0x25f7   :  { %1693 = vmatpush.msrb.mxu3 %v3235_v60 }
0x25f9   :  { %1694 = vmatpush.msrb.mxu3 %v3241_v61 }
0x25fb   :  { %1695 = vmatpush.msrb.mxu3 %v3247_v62  ;;  %v1487_v48 = vpop.permute.xlu1 %1486 }
0x25fd   :  { %1696 = vmatpush.msrb.mxu3 %v3253_v26 }
0x25ff   :  { %1697 = vmatpush.msrb.mxu3 %v3259_v27 }
0x2601   :  { %1698 = vmatpush.msrb.mxu3 %v3265_v28 }
0x2603   :  { %1699 = vmatpush.msrb.mxu3 %v3271_v29 }
0x2605   :  { %1700 = vmatpush.msrb.mxu3 %v3277_v21 }
0x2657   :  { %v1431_v43 = vpop.f32.mrf.mxu1 }
0x2658   :  { %v1432_v44 = vadd.f32 %v3376_v6, %v1431_v43 }
0x2677   :  { %v1463_v42 = vpop.f32.mrf.mxu3 }
0x2678   :  { %1467 = vrot.lane.b32.xlu0 %v1463_v42, %s2565_s19 }
0x2680   :  { %1436 = vrot.lane.b32.xlu0 %v1432_v44, %s2566_s26 }
0x26ea   :  { %v1468_v45 = vpop.permute.xlu0 %1467 }
0x26eb   :  { %v1470_v47 = vadd.f32 %v1468_v45, %v3337_v63 }
0x26ed   :  { %v1471_v17 = vadd.f32 %v1470_v47, %v3094_v33 }
0x26ef   :  { %v1489_v46 = vmul.f32 %v1487_v48, %v1471_v17 }
0x26f1   :  { %1491 = vrot.lane.b32.xlu2 %v1489_v46, %s2566_s26 }
0x26f2   :  { %v1437_v51 = vpop.permute.xlu0 %1436 }
0x26f3   :  { %v1439_v52 = vadd.f32 %v1437_v51, %v1371_v39 }
0x26f5   :  { %2399 = vst.msk [vmem:[%s3833_s13 + $0x18] sm:$0xff] %vm370_vm4, %v1439_v52  ;;  %v1478_v63 = vmul.f32 %v2401_v49, %v1439_v52 }
0x26f7   :  { %v1479_v57 = vadd.f32 %v2400_v23, %v1478_v63 }
0x26f9   :  { %1535 = vrot.lane.b32.xlu2 %v1479_v57, %s2565_s19 }
0x274b   :  { %v1492_v54 = vpop.permute.xlu2 %1491 }
0x274c   :  { %v1494_v55 = vadd.f32 %v1492_v54, %v1482_v16 }
0x274e   :  { %1496 = vrot.lane.b32.xlu1 %v1494_v55, %s2567_s20 }
0x2753   :  { %v1536_v37 = vpop.permute.xlu2 %1535 }
0x2754   :  { %v1542_v38 = vsel %vm129_vm3, %v3502_v14, %v1536_v37 }
0x27c0   :  { %v1497_v56 = vpop.permute.xlu1 %1496 }
0x27c1   :  { %v1499_v58 = vsel %vm370_vm4, %v1479_v57, %v1497_v56 }
0x27c2   :  { %2405 = vmatmul.msk.f32.vlgmr.msrb.gmra.mxu2 %vm86_vm1, %v1499_v58 }
0x27c3   :  { %1724 = vmatpush.msrb.mxu2 %v3284_v31 }
0x27c5   :  { %1725 = vmatpush.msrb.mxu2 %v3290_v32 }
0x27c7   :  { %1726 = vmatpush.msrb.mxu2 %v3296_v35 }
0x27c9   :  { %1727 = vmatpush.msrb.mxu2 %v3370_v4 }
0x2845   :  { %v3515_v11 = vpop.f32.mrf.mxu2 }
0x2846   :  { %v1523_v12 = vadd.f32 %v3342_v3, %v3515_v11 }
0x2848   :  { %v1533_v36 = vmax.f32 %v1523_v12, 0.0 }
0x284a   :  { %1539 = vrot.lane.b32.xlu0 %v1533_v36, %s2564_s18 }
0x28bc   :  { %v1540_v39 = vpop.permute.xlu0 %1539 }
0x28bd   :  { %v1543_v40 = vsel %vm86_vm1, %v1542_v38, %v1540_v39 }
0x28be   :  { %2408 = vmatmul.msk.f32.vlgmr.msra.gmra.mxu1 %vm88_vm2, %v1543_v40 }
0x28bf   :  { %2431 = vmatpush.msk.msra.mxu1 %vm92_vm0, %v3228_v59 }
0x28c1   :  { %1991 = vmatpush.msra.mxu1 %v3235_v60 }
0x28c3   :  { %1992 = vmatpush.msra.mxu1 %v3241_v61 }
0x28c5   :  { %1993 = vmatpush.msra.mxu1 %v3247_v62 }
0x28c7   :  { %1994 = vmatpush.msra.mxu1 %v3253_v26 }
0x28c9   :  { %1995 = vmatpush.msra.mxu1 %v3259_v27 }
0x28cb   :  { %1996 = vmatpush.msra.mxu1 %v3265_v28 }
0x28cd   :  { %1997 = vmatpush.msra.mxu1 %v3271_v29 }
0x28cf   :  { %1998 = vmatpush.msra.mxu1 %v3277_v21 }
0x293b   :  { %v1564_v13 = vpop.f32.mrf.mxu1 }
0x293c   :  { %v3535_v1 = vadd.f32 %v1564_v13, %v2786_v18  ;;  %v1594_v47 = vadd.f32 %v1564_v13, %v3502_v14 }
0x293e   :  { %v1568_v2 = vmax.f32 %v3535_v1, 0.0 }
0x2940   :  { %1570 = vrot.lane.b32.xlu1 %v1568_v2, %s2566_s26 }
0x29b2   :  { %v1571_v5 = vpop.permute.xlu1 %1570 }
0x29b3   :  { %2409 = vmatmul.msk.f32.vlgmr.msra.gmra.mxu3 %vm129_vm3, %v1571_v5 }
0x29b4   :  { %2425 = vmatpush.msk.msra.mxu3 %vm92_vm0, %v3545_v0 }
0x29b6   :  { %1882 = vmatpush.msra.mxu3 %v3552_v19 }
0x29b8   :  { %1883 = vmatpush.msra.mxu3 %v3558_v20 }
0x29ba   :  { %1884 = vmatpush.msra.mxu3 %v3564_v24 }
0x29bc   :  { %1885 = vmatpush.msra.mxu3 %v3570_v25 }
0x2a36   :  { %v1591_v30 = vpop.f32.mrf.mxu3 }
0x2a37   :  { %v1592_v41 = vadd.f32 %v3376_v6, %v1591_v30 }
0x2a39   :  { %v1595_v42 = vadd.f32 %v1592_v41, %v1523_v12  ;;  %1597 = vrot.lane.b32.xlu2 %v1592_v41, %s2566_s26 }
0x2a3b   :  { %v1602_v43 = vmax.f32 %v1595_v42, 0.0 }
0x2a3d   :  { %1608 = vrot.lane.b32.xlu1 %v1602_v43, %s2564_s18 }
0x2a93   :  { %v1598_v44 = vpop.permute.xlu2 %1597 }
0x2a94   :  { %v1600_v45 = vadd.f32 %v1598_v44, %v1479_v57 }
0x2a96   :  { %1604 = vrot.lane.b32.xlu0 %v1600_v45, %s2565_s19 }
0x2aaf   :  { %v1609_v17 = vpop.permute.xlu1 %1608 }
0x2b08   :  { %v1605_v48 = vpop.permute.xlu0 %1604 }
0x2b09   :  { %v1611_v46 = vsel %vm129_vm3, %v1594_v47, %v1605_v48 }
0x2b0a   :  { %v1612_v49 = vsel %vm86_vm1, %v1611_v46, %v1609_v17 }
0x2b0b   :  { %2411 = vmatmul.msk.f32.vlgmr.msra.gmra.mxu0 %vm88_vm2, %v1612_v49 }
0x2b0c   :  { %1953 = vmatpush.msra.mxu0 %v3284_v31 }
0x2b0e   :  { %1954 = vmatpush.msra.mxu0 %v3290_v32 }
0x2b10   :  { %1955 = vmatpush.msra.mxu0 %v3296_v35 }
0x2b12   :  { %1956 = vmatpush.msra.mxu0 %v3370_v4 }
0x2b88   :  { %v1633_v51 = vpop.f32.mrf.mxu0 }
0x2b89   :  { %v1636_v52 = vadd.f32 %v1633_v51, %v2786_v18  ;;  %v1663_v58 = vadd.f32 %v1633_v51, %v1594_v47 }
0x2b8b   :  { %v1637_v23 = vmax.f32 %v1636_v52, 0.0 }
0x2b8d   :  { %1639 = vrot.lane.b32.xlu2 %v1637_v23, %s2566_s26  ;;  %v1670_v13 = vadd.f32 %v1637_v23, %v1568_v2 }
0x2be7   :  { %v1640_v63 = vpop.permute.xlu2 %1639 }
0x2be8   :  { %2412 = vmatmul.msk.f32.vlgmr.msra.gmra.mxu2 %vm129_vm3, %v1640_v63 }
0x2be9   :  { %1793 = vmatpush.msra.mxu2 %v3284_v31 }
0x2beb   :  { %1794 = vmatpush.msra.mxu2 %v3290_v32 }
0x2bed   :  { %1795 = vmatpush.msra.mxu2 %v3296_v35 }
0x2bef   :  { %1796 = vmatpush.msra.mxu2 %v3370_v4 }
0x2c6b   :  { %v1660_v57 = vpop.f32.mrf.mxu2 }
0x2c6c   :  { %v1661_v15 = vadd.f32 %v3376_v6, %v1660_v57 }
0x2c6e   :  { %v1664_v16 = vadd.f32 %v1661_v15, %v1595_v42  ;;  %1666 = vrot.lane.b32.xlu0 %v1661_v15, %s2566_s26  ;;  %v2421_v15 = vld [vmem:[%s3843_s11 + $0x20] sm:$0xff] }
0x2c70   :  { %v1671_v54 = vmax.f32 %v1664_v16, 0.0 }
0x2c72   :  { %1677 = vrot.lane.b32.xlu2 %v1671_v54, %s2564_s18 }
0x2ccc   :  { %v1678_v36 = vpop.permute.xlu2 %1677 }
0x2ce0   :  { %v1667_v55 = vpop.permute.xlu0 %1666 }
0x2ce1   :  { %v1669_v56 = vadd.f32 %v1667_v55, %v1600_v45  ;;  %v2423_v55 = vld [vmem:[%s3822_s2 + $0x20] sm:$0xff] }
0x2ce3   :  { %1673 = vrot.lane.b32.xlu1 %v1669_v56, %s2565_s19 }
0x2d55   :  { %v1674_v12 = vpop.permute.xlu1 %1673 }
0x2d56   :  { %v1680_v37 = vsel %vm129_vm3, %v1663_v58, %v1674_v12 }
0x2d57   :  { %v1681_v38 = vsel %vm86_vm1, %v1680_v37, %v1678_v36 }
0x2d58   :  { %2414 = vmatmul.msk.f32.vlgmr.msrb.gmra.mxu3 %vm88_vm2, %v1681_v38 }
0x2d59   :  { %2022 = vmatpush.msrb.mxu3 %v3284_v31 }
0x2d5b   :  { %2023 = vmatpush.msrb.mxu3 %v3290_v32 }
0x2d5d   :  { %2024 = vmatpush.msrb.mxu3 %v3296_v35 }
0x2d5f   :  { %2025 = vmatpush.msrb.mxu3 %v3370_v4 }
0x2ddb   :  { %v1702_v39 = vpop.f32.mrf.mxu3 }
0x2ddc   :  { %v1705_v40 = vadd.f32 %v1702_v39, %v2786_v18  ;;  %v1732_v47 = vadd.f32 %v1702_v39, %v1663_v58 }
0x2dde   :  { %v1706_v5 = vmax.f32 %v1705_v40, 0.0 }
0x2de0   :  { %v1739_v30 = vadd.f32 %v1706_v5, %v1670_v13  ;;  %1708 = vrot.lane.b32.xlu0 %v1706_v5, %s2566_s26 }
0x2e52   :  { %v1709_v41 = vpop.permute.xlu0 %1708 }
0x2e53   :  { %2415 = vmatmul.msk.f32.vlgmr.msrb.gmra.mxu2 %vm129_vm3, %v1709_v41 }
0x2e54   :  { %2428 = vmatpush.msk.msrb.mxu2 %vm92_vm0, %v3228_v59 }
0x2e56   :  { %1922 = vmatpush.msrb.mxu2 %v3235_v60 }
0x2e58   :  { %1923 = vmatpush.msrb.mxu2 %v3241_v61 }
0x2e5a   :  { %1924 = vmatpush.msrb.mxu2 %v3247_v62 }
0x2e5c   :  { %1925 = vmatpush.msrb.mxu2 %v3253_v26 }
0x2e5e   :  { %1926 = vmatpush.msrb.mxu2 %v3259_v27 }
0x2e60   :  { %1927 = vmatpush.msrb.mxu2 %v3265_v28 }
0x2e62   :  { %1928 = vmatpush.msrb.mxu2 %v3271_v29 }
0x2e64   :  { %1929 = vmatpush.msrb.mxu2 %v3277_v21 }
0x2ed6   :  { %v1729_v1 = vpop.f32.mrf.mxu2 }
0x2ed7   :  { %v1730_v2 = vadd.f32 %v3376_v6, %v1729_v1 }
0x2ed9   :  { %v1733_v42 = vadd.f32 %v1730_v2, %v1664_v16  ;;  %1735 = vrot.lane.b32.xlu1 %v1730_v2, %s2566_s26 }
0x2edb   :  { %v1740_v43 = vmax.f32 %v1733_v42, 0.0 }
0x2edd   :  { %1746 = vrot.lane.b32.xlu0 %v1740_v43, %s2564_s18 }
0x2f4b   :  { %v1736_v44 = vpop.permute.xlu1 %1735 }
0x2f4c   :  { %v1738_v45 = vadd.f32 %v1736_v44, %v1669_v56 }
0x2f4e   :  { %1742 = vrot.lane.b32.xlu2 %v1738_v45, %s2565_s19 }
0x2f4f   :  { %v1747_v17 = vpop.permute.xlu0 %1746 }
0x2fa8   :  { %v1743_v48 = vpop.permute.xlu2 %1742 }
0x2fa9   :  { %v1749_v46 = vsel %vm129_vm3, %v1732_v47, %v1743_v48 }
0x2faa   :  { %v1750_v49 = vsel %vm86_vm1, %v1749_v46, %v1747_v17 }
0x2fab   :  { %2417 = vmatmul.msk.f32.vlgmr.msrb.gmra.mxu1 %vm88_vm2, %v1750_v49 }
0x2fac   :  { %2192 = vmatpush.msrb.mxu1 %v3434_v7 }
0x2fae   :  { %2193 = vmatpush.msrb.mxu1 %v3440_v8  ;;  %v2422_v8 = vld [vmem:[%s3842_s25 + $0x20] sm:$0xff] }
0x2fb0   :  { %2194 = vmatpush.msrb.mxu1 %v3446_v9 }
0x2fb2   :  { %2195 = vmatpush.msrb.mxu1 %v3452_v10 }
0x3028   :  { %v1771_v51 = vpop.f32.mrf.mxu1 }
0x3029   :  { %v1774_v52 = vadd.f32 %v1771_v51, %v2786_v18  ;;  %v3675_v54 = vadd.f32 %v1771_v51, %v1732_v47 }
0x302b   :  { %v1775_v23 = vmax.f32 %v1774_v52, 0.0  ;;  %v1849_v56 = vmul.f32 %v2423_v55, %v3675_v54 }
0x302d   :  { %1777 = vrot.lane.b32.xlu2 %v1775_v23, %s2566_s26  ;;  %v1807_v63 = vadd.f32 %v1775_v23, %v1739_v30 }
0x302f   :  { %1809 = vrot.lane.b32.xlu1 %v1807_v63, %s2566_s26 }
0x3087   :  { %v1778_v57 = vpop.permute.xlu2 %1777 }
0x3088   :  { %2418 = vmatmul.msk.f32.vlgmr.msra.gmra.mxu2 %vm129_vm3, %v1778_v57 }
0x3089   :  { %2437 = vmatpush.msk.msra.mxu2 %vm92_vm0, %v3228_v59 }
0x308b   :  { %2129 = vmatpush.msra.mxu2 %v3235_v60 }
0x308d   :  { %2130 = vmatpush.msra.mxu2 %v3241_v61 }
0x308f   :  { %2131 = vmatpush.msra.mxu2 %v3247_v62 }
0x3091   :  { %2132 = vmatpush.msra.mxu2 %v3253_v26 }
0x3093   :  { %2133 = vmatpush.msra.mxu2 %v3259_v27 }
0x3095   :  { %2134 = vmatpush.msra.mxu2 %v3265_v28 }
0x3097   :  { %2135 = vmatpush.msra.mxu2 %v3271_v29 }
0x3099   :  { %2136 = vmatpush.msra.mxu2 %v3277_v21 }
0x30a1   :  { %v1810_v7 = vpop.permute.xlu1 %1809 }
0x30a2   :  { %2419 = vmatmul.msk.f32.vlgmr.msrb.gmra.mxu0 %vm129_vm3, %v1810_v7 }
0x30a3   :  { %2434 = vmatpush.msk.msrb.mxu0 %vm92_vm0, %v3228_v59  ;;  %v2424_v59 = vld [vmem:[%s3823_s3 + $0x20] sm:$0xff] }
0x30a4   :  { %1853 = vrot.lane.b32.xlu1 %v2424_v59, %s2565_s19 }
0x30a5   :  { %2060 = vmatpush.msrb.mxu0 %v3235_v60 }
0x30a7   :  { %2061 = vmatpush.msrb.mxu0 %v3241_v61 }
0x30a9   :  { %2062 = vmatpush.msrb.mxu0 %v3247_v62 }
0x30ab   :  { %2063 = vmatpush.msrb.mxu0 %v3253_v26 }
0x30ad   :  { %2064 = vmatpush.msrb.mxu0 %v3259_v27 }
0x30af   :  { %2065 = vmatpush.msrb.mxu0 %v3265_v28 }
0x30b1   :  { %2066 = vmatpush.msrb.mxu0 %v3271_v29 }
0x30b3   :  { %2067 = vmatpush.msrb.mxu0 %v3277_v21 }
0x310b   :  { %v1798_v61 = vpop.f32.mrf.mxu2 }
0x310c   :  { %v1799_v62 = vadd.f32 %v3376_v6, %v1798_v61 }
0x3116   :  { %v1854_v28 = vpop.permute.xlu1 %1853 }
0x311f   :  { %v1830_v60 = vpop.f32.mrf.mxu0 }
0x3120   :  { %1834 = vrot.lane.b32.xlu0 %v1830_v60, %s2565_s19 }
0x3128   :  { %1803 = vrot.lane.b32.xlu0 %v1799_v62, %s2566_s26 }
0x3192   :  { %v1835_v26 = vpop.permute.xlu0 %1834 }
0x3193   :  { %v1837_v27 = vadd.f32 %v1835_v26, %v3515_v11 }
0x3195   :  { %v1838_v29 = vadd.f32 %v1837_v27, %v3094_v33 }
0x3197   :  { %v1856_v21 = vmul.f32 %v1854_v28, %v1838_v29 }
0x3199   :  { %1858 = vrot.lane.b32.xlu2 %v1856_v21, %s2566_s26 }
0x319a   :  { %v1804_v9 = vpop.permute.xlu0 %1803 }
0x319b   :  { %v1806_v10 = vadd.f32 %v1804_v9, %v1738_v45 }
0x319d   :  { %2420 = vst.msk [vmem:[%s3833_s13 + $0x20] sm:$0xff] %vm370_vm4, %v1806_v10  ;;  %v1845_v11 = vmul.f32 %v2422_v8, %v1806_v10 }
0x319f   :  { %v1846_v16 = vadd.f32 %v2421_v15, %v1845_v11 }
0x31a1   :  { %1902 = vrot.lane.b32.xlu2 %v1846_v16, %s2565_s19 }
0x31f3   :  { %v1859_v58 = vpop.permute.xlu2 %1858 }
0x31f4   :  { %v1861_v12 = vadd.f32 %v1859_v58, %v1849_v56 }
0x31f6   :  { %1863 = vrot.lane.b32.xlu1 %v1861_v12, %s2567_s20 }
0x31fb   :  { %v1903_v13 = vpop.permute.xlu2 %1902 }
0x31fc   :  { %v1909_v5 = vsel %vm129_vm3, %v3675_v54, %v1903_v13 }
0x3268   :  { %v1864_v36 = vpop.permute.xlu1 %1863 }
0x3269   :  { %v1866_v37 = vsel %vm370_vm4, %v1846_v16, %v1864_v36 }
0x326a   :  { %2426 = vmatmul.msk.f32.vlgmr.msra.gmra.mxu3 %vm86_vm1, %v1866_v37 }
0x326b   :  { %2091 = vmatpush.msra.mxu3 %v3284_v31 }
0x326d   :  { %2092 = vmatpush.msra.mxu3 %v3290_v32 }
0x326f   :  { %2093 = vmatpush.msra.mxu3 %v3296_v35 }
0x3271   :  { %2094 = vmatpush.msra.mxu3 %v3370_v4 }
0x32ed   :  { %v3688_v38 = vpop.f32.mrf.mxu3 }
0x32ee   :  { %v1890_v39 = vadd.f32 %v3342_v3, %v3688_v38 }
0x32f0   :  { %v1900_v40 = vmax.f32 %v1890_v39, 0.0 }
0x32f2   :  { %1906 = vrot.lane.b32.xlu0 %v1900_v40, %s2564_s18 }
0x3364   :  { %v1907_v30 = vpop.permute.xlu0 %1906 }
0x3365   :  { %v1910_v41 = vsel %vm86_vm1, %v1909_v5, %v1907_v30 }
0x3366   :  { %2429 = vmatmul.msk.f32.vlgmr.msrb.gmra.mxu2 %vm88_vm2, %v1910_v41 }
0x33e9   :  { %v1931_v1 = vpop.f32.mrf.mxu2 }
0x33ea   :  { %v1934_v2 = vadd.f32 %v1931_v1, %v2786_v18 }
0x33ec   :  { %v1935_v42 = vmax.f32 %v1934_v2, 0.0 }
0x33ee   :  { %1937 = vrot.lane.b32.xlu1 %v1935_v42, %s2566_s26 }
0x3460   :  { %v1938_v43 = vpop.permute.xlu1 %1937 }
0x3461   :  { %2430 = vmatmul.msk.f32.vlgmr.msra.gmra.mxu0 %vm129_vm3, %v1938_v43 }
0x3462   :  { %2446 = vmatpush.msk.msra.mxu0 %vm92_vm0, %v3545_v0  ;;  %v1961_v0 = vadd.f32 %v1931_v1, %v3675_v54  ;;  %v2568_v1 = vmov 0  }
0x3463   :  { %2458 = vset.pattern.permute.xlu0 %v2568_v1  ;;  %2457 = vset.pattern.permute.xlu2 %v2568_v1 }
0x3464   :  { %2249 = vmatpush.msra.mxu0 %v3552_v19  ;;  %2459 = vset.pattern.permute.xlu1 %v2568_v1 }
0x3466   :  { %2250 = vmatpush.msra.mxu0 %v3558_v20 }
0x3468   :  { %2251 = vmatpush.msra.mxu0 %v3564_v24 }
0x346a   :  { %2252 = vmatpush.msra.mxu0 %v3570_v25 }
0x34de   :  { %v1958_v3 = vpop.f32.mrf.mxu0 }
0x34df   :  { %v1959_v44 = vadd.f32 %v3376_v6, %v1958_v3  ;;  %v2364_v3 = vld [vmem:[%s3824_s4 + $0x8] sm:$0xff] }
0x34e0   :  { %vm792_vm5 = vcmp.gt.f32.partialorder %v2364_v3, 0.0 }
0x34e1   :  { %v1962_v45 = vadd.f32 %v1959_v44, %v1890_v39  ;;  %1964 = vrot.lane.b32.xlu2 %v1959_v44, %s2566_s26  ;;  %v793_v44 = vsel %vm792_vm5, 1, %v2568_v1 }
0x34e3   :  { %v1969_v47 = vmax.f32 %v1962_v45, 0.0 }
0x34e5   :  { %1975 = vrot.lane.b32.xlu1 %v1969_v47, %s2564_s18 }
0x353b   :  { %v1965_v48 = vpop.permute.xlu2 %1964 }
0x353c   :  { %v1967_v17 = vadd.f32 %v1965_v48, %v1846_v16 }
0x353e   :  { %1971 = vrot.lane.b32.xlu0 %v1967_v17, %s2565_s19 }
0x3557   :  { %v1976_v20 = vpop.permute.xlu1 %1975 }
0x35b0   :  { %v1972_v19 = vpop.permute.xlu0 %1971 }
0x35b1   :  { %v1978_v24 = vsel %vm129_vm3, %v1961_v0, %v1972_v19  ;;  %v2443_v19 = vld [vmem:[%s3842_s25 + $0x28] sm:$0xff] }
0x35b2   :  { %v1979_v25 = vsel %vm86_vm1, %v1978_v24, %v1976_v20 }
0x35b3   :  { %2432 = vmatmul.msk.f32.vlgmr.msra.gmra.mxu1 %vm88_vm2, %v1979_v25 }
0x3630   :  { %v2000_v46 = vpop.f32.mrf.mxu1 }
0x3631   :  { %v2003_v49 = vadd.f32 %v2000_v46, %v2786_v18 }
0x3633   :  { %v2004_v51 = vmax.f32 %v2003_v49, 0.0  ;;  %v2406_v49 = vld [vmem:[%s3824_s4 + $0x18] sm:$0xff] }
0x3634   :  { %vm1526_vm7 = vcmp.gt.f32.partialorder %v2406_v49, 0.0 }
0x3635   :  { %2006 = vrot.lane.b32.xlu2 %v2004_v51, %s2566_s26  ;;  %v2037_v27 = vadd.f32 %v2004_v51, %v1935_v42  ;;  %v2444_v51 = vld [vmem:[%s3822_s2 + $0x28] sm:$0xff] }
0x368f   :  { %v2007_v52 = vpop.permute.xlu2 %2006 }
0x3690   :  { %2433 = vmatmul.msk.f32.vlgmr.msrb.gmra.mxu3 %vm129_vm3, %v2007_v52  ;;  %v1527_v52 = vsel %vm1526_vm7, 1, %v2568_v1 }
0x3691   :  { %2160 = vmatpush.msrb.mxu3 %v3284_v31  ;;  %v2030_v31 = vadd.f32 %v2000_v46, %v1961_v0 }
0x3693   :  { %2161 = vmatpush.msrb.mxu3 %v3290_v32 }
0x3695   :  { %2162 = vmatpush.msrb.mxu3 %v3296_v35 }
0x3697   :  { %2163 = vmatpush.msrb.mxu3 %v3370_v4 }
0x3713   :  { %v2027_v23 = vpop.f32.mrf.mxu3 }
0x3714   :  { %v2028_v63 = vadd.f32 %v3376_v6, %v2027_v23  ;;  %v2448_v23 = vld [vmem:[%s3824_s4 + $0x28] sm:$0xff] }
0x3715   :  { %vm2259_vm8 = vcmp.gt.f32.partialorder %v2448_v23, 0.0 }
0x3716   :  { %v2031_v57 = vadd.f32 %v2028_v63, %v1962_v45  ;;  %2033 = vrot.lane.b32.xlu0 %v2028_v63, %s2566_s26 }
0x3718   :  { %v2038_v7 = vmax.f32 %v2031_v57, 0.0 }
0x371a   :  { %2044 = vrot.lane.b32.xlu2 %v2038_v7, %s2564_s18 }
0x3774   :  { %v2045_v32 = vpop.permute.xlu2 %2044 }
0x3788   :  { %v2034_v59 = vpop.permute.xlu0 %2033 }
0x3789   :  { %v2036_v60 = vadd.f32 %v2034_v59, %v1967_v17  ;;  %v2385_v59 = vld [vmem:[%s3824_s4 + $0x10] sm:$0xff] }
0x378a   :  { %vm1159_vm9 = vcmp.gt.f32.partialorder %v2385_v59, 0.0 }
0x378b   :  { %2040 = vrot.lane.b32.xlu1 %v2036_v60, %s2565_s19 }
0x37fd   :  { %v2041_v61 = vpop.permute.xlu1 %2040 }
0x37fe   :  { %v2047_v35 = vsel %vm129_vm3, %v2030_v31, %v2041_v61  ;;  %v2427_v61 = vld [vmem:[%s3824_s4 + $0x20] sm:$0xff] }
0x37ff   :  { %v2048_v4 = vsel %vm86_vm1, %v2047_v35, %v2045_v32  ;;  %vm1893_vm10 = vcmp.gt.f32.partialorder %v2427_v61, 0.0 }
0x3800   :  { %2435 = vmatmul.msk.f32.vlgmr.msrb.gmra.mxu0 %vm88_vm2, %v2048_v4  ;;  %v1894_v32 = vsel %vm1893_vm10, 1, %v2568_v1 }
0x387d   :  { %v2069_v62 = vpop.f32.mrf.mxu0 }
0x387e   :  { %v2072_v26 = vadd.f32 %v2069_v62, %v2786_v18  ;;  %v2099_v55 = vadd.f32 %v2069_v62, %v2030_v31  ;;  %v1160_v31 = vsel %vm1159_vm9, 1, %v2568_v1 }
0x3880   :  { %v2073_v28 = vmax.f32 %v2072_v26, 0.0 }
0x3882   :  { %v2106_v29 = vadd.f32 %v2073_v28, %v2037_v27  ;;  %2075 = vrot.lane.b32.xlu0 %v2073_v28, %s2566_s26 }
0x38f4   :  { %v2076_v21 = vpop.permute.xlu0 %2075 }
0x38f5   :  { %2436 = vmatmul.msk.f32.vlgmr.msra.gmra.mxu3 %vm129_vm3, %v2076_v21 }
0x3978   :  { %v2096_v8 = vpop.f32.mrf.mxu3 }
0x3979   :  { %v2097_v9 = vadd.f32 %v3376_v6, %v2096_v8 }
0x397b   :  { %v2100_v10 = vadd.f32 %v2097_v9, %v2031_v57  ;;  %2102 = vrot.lane.b32.xlu1 %v2097_v9, %s2566_s26 }
0x397d   :  { %v2107_v15 = vmax.f32 %v2100_v10, 0.0 }
0x397f   :  { %2113 = vrot.lane.b32.xlu0 %v2107_v15, %s2564_s18 }
0x39ed   :  { %v2103_v11 = vpop.permute.xlu1 %2102 }
0x39ee   :  { %v2105_v16 = vadd.f32 %v2103_v11, %v2036_v60  ;;  %v2260_v60 = vsel %vm2259_vm8, 1, %v2568_v1 }
0x39f0   :  { %2109 = vrot.lane.b32.xlu2 %v2105_v16, %s2565_s19 }
0x39f1   :  { %v2114_v58 = vpop.permute.xlu0 %2113 }
0x3a4a   :  { %v2110_v56 = vpop.permute.xlu2 %2109 }
0x3a4b   :  { %v2116_v12 = vsel %vm129_vm3, %v2099_v55, %v2110_v56 }
0x3a4c   :  { %v2117_v36 = vsel %vm86_vm1, %v2116_v12, %v2114_v58 }
0x3a4d   :  { %2438 = vmatmul.msk.f32.vlgmr.msra.gmra.mxu2 %vm88_vm2, %v2117_v36 }
0x3ad0   :  { %v2138_v37 = vpop.f32.mrf.mxu2 }
0x3ad1   :  { %v2141_v39 = vadd.f32 %v2138_v37, %v2786_v18  ;;  %v3739_v40 = vadd.f32 %v2138_v37, %v2099_v55  ;;  %v2445_v18 = vld [vmem:[%s3823_s3 + $0x28] sm:$0xff]  ;;  %s2281_s3 = sshll.u32 %s2569_s0, 4  ;;  %s2282_s3 = int_to_ptr.vmem [resolvable:$true] %s2281_s3 }
0x3ad3   :  { %v2142_v13 = vmax.f32 %v2141_v39, 0.0  ;;  %2266 = vst.msk [vmem:[#allocation2] sm:$0xff] %vm129_vm3, %v3739_v40  ;;  %v2216_v63 = vmul.f32 %v2444_v51, %v3739_v40 }
0x3ad4   :  { %2286 = dma.vmem_to_hbm [thread:$0]  %s2282_s3, 128, %s2284_s29, [#allocation3]  }
0x3ad5   :  { %v2174_v5 = vadd.f32 %v2142_v13, %v2106_v29  ;;  %2144 = vrot.lane.b32.xlu2 %v2142_v13, %s2566_s26 }
0x3ad7   :  { %2176 = vrot.lane.b32.xlu1 %v2174_v5, %s2566_s26 }
0x3adf   :  { %2220 = vrot.lane.b32.xlu1 %v2445_v18, %s2565_s19 }
0x3b2f   :  { %v2145_v30 = vpop.permute.xlu2 %2144 }
0x3b30   :  { %2439 = vmatmul.msk.f32.vlgmr.msrb.gmra.mxu3 %vm129_vm3, %v2145_v30 }
0x3b49   :  { %v2177_v41 = vpop.permute.xlu1 %2176 }
0x3b4a   :  { %2440 = vmatmul.msk.f32.vlgmr.msrb.gmra.mxu1 %vm129_vm3, %v2177_v41 }
0x3b51   :  { %v2221_v48 = vpop.permute.xlu1 %2220 }
0x3bb3   :  { %v2165_v42 = vpop.f32.mrf.mxu3 }
0x3bb4   :  { %v2166_v43 = vadd.f32 %v3376_v6, %v2165_v42  ;;  %v421_v6 = vld [vmem:[%s3824_s4] sm:$0xff] }
0x3bb5   :  { %vm422_vm6 = vcmp.gt.f32.partialorder %v421_v6, 0.0 }
0x3bb6   :  { %v423_v25 = vsel %vm422_vm6, 1, %v2568_v1 }
0x3bc7   :  { %v2197_v2 = vpop.f32.mrf.mxu1 }
0x3bc8   :  { %2201 = vrot.lane.b32.xlu0 %v2197_v2, %s2565_s19  ;;  %s2570_s19 = smov [#allocation4]  }
0x3bc9   :  { %s2294_s10 = sshll.u32 %s2570_s19, 4  ;;  %s2295_s10 = int_to_ptr.vmem [resolvable:$true] %s2294_s10 }
0x3bd0   :  { %2170 = vrot.lane.b32.xlu0 %v2166_v43, %s2566_s26 }
0x3bd8   :  { %795 = vperm.xlu0 %2458, %v793_v44  }
0x3c3a   :  { %v2202_v45 = vpop.permute.xlu0 %2201 }
0x3c3b   :  { %v2204_v47 = vadd.f32 %v2202_v45, %v3688_v38  ;;  %v2442_v38 = vld [vmem:[%s3843_s11 + $0x28] sm:$0xff] }
0x3c3d   :  { %v2205_v17 = vadd.f32 %v2204_v47, %v3094_v33 }
0x3c3f   :  { %v2223_v0 = vmul.f32 %v2221_v48, %v2205_v17 }
0x3c41   :  { %2225 = vrot.lane.b32.xlu2 %v2223_v0, %s2566_s26 }
0x3c42   :  { %v2171_v20 = vpop.permute.xlu0 %2170 }
0x3c43   :  { %v2173_v24 = vadd.f32 %v2171_v20, %v2105_v16 }
0x3c45   :  { %2441 = vst.msk [vmem:[%s3833_s13 + $0x28] sm:$0xff] %vm370_vm4, %v2173_v24  ;;  %v2212_v33 = vmul.f32 %v2443_v19, %v2173_v24 }
0x3c47   :  { %v2213_v46 = vadd.f32 %v2442_v38, %v2212_v33 }
0x3c49   :  { %2267 = vst.msk [vmem:[%s3835_s15] sm:$0xff] %vm370_vm4, %v2213_v46  ;;  %425 = vperm.xlu2 %2457, %v423_v25  }
0x3c4a   :  { %v796_v27 = vpop.permute.xlu0 %795 }
0x3c4b   :  { %vm797_vm12 = vcmp.eq.s32.totalorder %v796_v27, 1 }
0x3c51   :  { %1529 = vperm.xlu2 %2457, %v1527_v52  }
0x3c59   :  { %2262 = vperm.xlu2 %2457, %v2260_v60  }
0x3c9b   :  { %v2226_v57 = vpop.permute.xlu2 %2225 }
0x3c9c   :  { %v2228_v7 = vadd.f32 %v2226_v57, %v2216_v63 }
0x3c9e   :  { %2230 = vrot.lane.b32.xlu1 %v2228_v7, %s2567_s20 }
0x3ca3   :  { %v426_v35 = vpop.permute.xlu2 %425 }
0x3ca4   :  { %vm427_vm11 = vcmp.eq.s32.totalorder %v426_v35, 1 }
0x3ca5   :  { %v428_v29 = vsel %vm427_vm11, %v2911_v22, 0.0 }
0x3ca6   :  { %1162 = vperm.xlu1 %2459, %v1160_v31   ;;  %v798_v21 = vsel %vm797_vm12, %v3110_v50, %v428_v29 }
0x3cab   :  { %v1530_v26 = vpop.permute.xlu2 %1529 }
0x3cac   :  { %vm1531_vm14 = vcmp.eq.s32.totalorder %v1530_v26, 1 }
0x3cae   :  { %1896 = vperm.xlu1 %2459, %v1894_v32  }
0x3cb3   :  { %v2263_v8 = vpop.permute.xlu2 %2262 }
0x3cb4   :  { %vm2264_vm15 = vcmp.eq.s32.totalorder %v2263_v8, 1 }
0x3cb6   :  { %367 = vrot.lane.b32.xlu1 %v2923_v34, %s2566_s26 }
0x3d10   :  { %v2231_v4 = vpop.permute.xlu1 %2230 }
0x3d11   :  { %v2233_v62 = vsel %vm370_vm4, %v2213_v46, %v2231_v4 }
0x3d12   :  { %2447 = vmatmul.msk.f32.vlgmr.msra.gmra.mxu0 %vm86_vm1, %v2233_v62 }
0x3d18   :  { %v1163_v28 = vpop.permute.xlu1 %1162 }
0x3d19   :  { %vm1164_vm13 = vcmp.eq.s32.totalorder %v1163_v28, 1 }
0x3d1a   :  { %v1165_v9 = vsel %vm1164_vm13, %v3322_v53, %v798_v21 }
0x3d1b   :  { %v1532_v10 = vsel %vm1531_vm14, %v3502_v14, %v1165_v9 }
0x3d20   :  { %v1897_v34 = vpop.permute.xlu1 %1896 }
0x3d21   :  { %vm1898_vm0 = vcmp.eq.s32.totalorder %v1897_v34, 1 }
0x3d22   :  { %v1899_v15 = vsel %vm1898_vm0, %v3675_v54, %v1532_v10 }
0x3d23   :  { %v2265_v11 = vsel %vm2264_vm15, %v3739_v40, %v1899_v15 }
0x3d24   :  { %2273 = vst.msk [vmem:[#allocation6] sm:$0xff] %vm129_vm3, %v2265_v11 }
0x3d28   :  { %v368_v22 = vpop.permute.xlu1 %367 }
0x3d29   :  { %371 = vst.msk [vmem:[%s3833_s13] sm:$0xff] %vm370_vm4, %v368_v22  ;;  %s2305_s13 = sshll.u32 %s2571_s12, 4  ;;  %s2306_s13 = int_to_ptr.vmem [resolvable:$true] %s2305_s13 }
0x3d8f   :  { %v2254_v50 = vpop.f32.mrf.mxu0 }
0x3d90   :  { %2269 = vrot.lane.b32.xlu0 %v2254_v50, %s2566_s26 }
0x3e02   :  { %v2270_v53 = vpop.permute.xlu0 %2269 }
0x3e03   :  { %2272 = vst.msk [vmem:[#allocation4] sm:$0xff] %vm129_vm3, %v2270_v53 }
0x3e04   :  { %2299 = dma.vmem_to_hbm [thread:$0]  %s2295_s10, 128, %s2297_s1, [#allocation5]  }
0x3e05   :  { %2310 = dma.vmem_to_hbm [thread:$0]  %s2306_s13, 128, %s2308_s14, [#allocation5]  }
0x3e06   :  { %2560 = dma.done.wait [#allocation3], 128  }
0x3e07   :  { %2561 = vsyncadd [#allocation3], 4294967168 }
0x3e08   :  { %2562 = dma.done.wait [#allocation5], 256  }
0x3e09   :  { %2563 = vsyncadd [#allocation5], 4294967040 }
0x3e0a   :  { %2327 = vsyncpa [#allocation3], 1 }
0x3e0b   :  { %2328 = vsyncpa [#allocation5], 1 }

</bundles_post_ra>
